<compile_context>
chip_gen: v6e
topology: v6e:2x2x1
jax: 0.10.0
libtpu: 0.0.40
codegen_flags: <defaults>
</compile_context>

<pallas_src>
import numpy as np
import jax
import jax.numpy as jnp
from jax.experimental import pallas as pl
from jax.experimental.pallas import tpu as pltpu

# ----------------- small config (scaled down from the reference module) -------------
B              = 2
N_SAMPLES      = 4096          # reference: 32768
WINDOW         = 512
STEP           = 256
N_BINS         = WINDOW // 2 + 1   # 257 (kept exact: embed_periodicity = Linear(257, 8))
NF             = 16            # filterbank channels (reference: 128)
ENC_CH         = NF * 8        # encoder channels (reference: 1024)
T_FRAMES       = N_SAMPLES // STEP  # 16 (reference: 128)
CONTEXT_DIM    = 16
LATENT         = 256
N_EVENTS       = 2             # iterative refinement steps (reference: 16)
IMPULSE_SIZE   = 1024          # reference: 16384
IMP_FRAMES     = IMPULSE_SIZE // 256
RESONANCE_SIZE = N_SAMPLES     # reference: 32768
TOTAL_ATOMS    = 16            # reference: 4096
SAMPLERATE     = 22050
WEIGHT_INIT    = 0.05
HEAD_OUT       = 128           # lane-dense padded output of the fused encoder heads
ENC_K          = NF * N_BINS                      # 4112
ENC_K_PAD      = ((ENC_K + 127) // 128) * 128     # 4224 (lane-aligned K)


# ----------------------------- Pallas kernels ---------------------------------------
def _encode_kernel(x_ref, w_ref, b_ref, o_ref):
    # One lane-dense matmul: pre-composed embed_periodicity + event heads.
    o_ref[...] = (jnp.dot(x_ref[...], w_ref[...], preferred_element_type=jnp.float32)
                  + b_ref[...])


def pallas_encode_heads(xt, w, b):
    M = xt.shape[0]
    vmem = pl.BlockSpec(memory_space=pltpu.MemorySpace.VMEM)
    return pl.pallas_call(
        _encode_kernel,
        out_shape=jax.ShapeDtypeStruct((M, HEAD_OUT), jnp.float32),
        in_specs=[vmem, vmem, vmem],
        out_specs=vmem,
    )(xt.astype(jnp.float32), w, b)


def _generate_kernel(v_ref, fcw_ref, fcb_ref, envw_ref, envb_ref, selw_ref, selb_ref,
                     interp_ref, noise_ref, waves_ref, imp_ref, res_ref):
    # from_context
    emb = (jnp.dot(v_ref[...], fcw_ref[...], preferred_element_type=jnp.float32)
           + fcb_ref[...])
    # to_env(x) ** 2
    env = (jnp.dot(emb, envw_ref[...], preferred_element_type=jnp.float32)
           + envb_ref[...])
    env = env * env
    # atom selection (+ atom_bias folded into the bias), softmax
    logits = (jnp.dot(emb, selw_ref[...], preferred_element_type=jnp.float32)
              + selb_ref[...])
    m = jnp.max(logits, axis=-1, keepdims=True)
    e = jnp.exp(logits - m)
    sel = e * pl.reciprocal(jnp.sum(e, axis=-1, keepdims=True), approx=True)
    # linear-interp upsample of the envelope via a constant (IMP_FRAMES, IMPULSE_SIZE)
    # matrix on the MXU (replaces jax.image.resize + extra launch)
    env_up = jnp.dot(env, interp_ref[...], preferred_element_type=jnp.float32)
    # impulse = unit_norm(noise * env), rsqrt goes to the EUP slot
    imp = noise_ref[...] * env_up
    inv_n = jax.lax.rsqrt(jnp.sum(imp * imp, axis=-1, keepdims=True) + 1e-12)
    imp_ref[...] = imp * inv_n
    # wavetable mix: bf16 x bf16 on the MXU, f32 accumulate (sel never leaves VMEM)
    res_ref[...] = jnp.dot(sel.astype(jnp.bfloat16), waves_ref[...],
                           preferred_element_type=jnp.float32)


def pallas_generate(vflat, p):
    M = vflat.shape[0]
    vmem = pl.BlockSpec(memory_space=pltpu.MemorySpace.VMEM)
    imp, res = pl.pallas_call(
        _generate_kernel,
        out_shape=(jax.ShapeDtypeStruct((M, IMPULSE_SIZE), jnp.float32),
                   jax.ShapeDtypeStruct((M, RESONANCE_SIZE), jnp.float32)),
        in_specs=[vmem] * 10,
        out_specs=(vmem, vmem),
    )(vflat.astype(jnp.float32),
      p["fc_w"], p["fc_b"], p["env_w"], p["env_b"], p["sel_w"], p["sel_b"],
      p["interp"], p["noise2d"], p["waves_bf16"])
    return imp, res


# ----------------------------- JAX glue (FFT etc.) ----------------------------------
def fft_convolve(a, b):
    # TODO(synk): no Pallas FFT primitive; FFT convolution done with jnp.fft (XLA).
    n = a.shape[-1]
    a_p = jnp.concatenate([a, jnp.zeros_like(a)], axis=-1)
    b_p = jnp.concatenate([b, jnp.zeros_like(b)], axis=-1)
    spec = jnp.fft.rfft(a_p, axis=-1) * jnp.fft.rfft(b_p, axis=-1)
    out = jnp.fft.irfft(spec, n=2 * n, axis=-1)
    return out[..., :n]


def make_filterbank():
    # deterministic synthetic band-pass filterbank (reference loads a precomputed `fb`)
    t = np.arange(256) / SAMPLERATE
    win = np.hanning(256)
    freqs = np.geomspace(40.0, 8000.0, NF)
    fb = np.stack([np.sin(2 * np.pi * f * t) * win for f in freqs], 0).astype(np.float32)
    fb = np.pad(fb, ((0, 0), (0, N_SAMPLES - 256)))   # F.pad(fb, (0, n_samples - 256))
    return jnp.asarray(fb)


def pif(signal, fb_spec):
    # fb_spec is the cached rfft of the zero-padded constant filterbank.
    signal = signal.reshape(-1, 1, N_SAMPLES)
    sig_p = jnp.concatenate([signal, jnp.zeros_like(signal)], axis=-1)
    spec = jnp.fft.irfft(jnp.fft.rfft(sig_p, axis=-1) * fb_spec[None, :, :],
                         n=2 * N_SAMPLES, axis=-1)[..., :N_SAMPLES]     # (B, NF, N)
    spec = spec.reshape(signal.shape[0], -1, N_SAMPLES)
    spec = jnp.pad(spec, ((0, 0), (0, 0), (0, STEP)))                   # F.pad(spec, (0, 256))
    idx = np.arange(T_FRAMES)[:, None] * STEP + np.arange(WINDOW)[None, :]
    windowed = spec[..., idx]                                           # unfold(-1, 512, 256)
    ws = jnp.abs(jnp.fft.rfft(windowed, axis=-1))                       # (B, NF, T, 257)
    return ws


def experiment_spectrogram(signal, fb_spec):
    return pif(signal, fb_spec)


# ----------------------------- wavetable init (make_waves) --------------------------
def _square(t):
    return np.where(np.mod(t, 2 * np.pi) < np.pi, 1.0, -1.0)


def _sawtooth(t, width=1.0):
    frac = np.mod(t, 2 * np.pi) / (2 * np.pi)
    if width >= 1.0:
        return 2.0 * frac - 1.0
    rising = 2.0 * frac / width - 1.0
    falling = 1.0 - 2.0 * (frac - width) / (1.0 - width)
    return np.where(frac < width, rising, falling)


def musical_scale_hz(start_midi, stop_midi, n_steps):
    midis = np.linspace(start_midi, stop_midi, n_steps)
    return 440.0 * 2.0 ** ((midis - 69.0) / 12.0)


def make_waves(n_samples, f0s, samplerate):
    saw, sq, tri, sin = [], [], [], []
    for f0 in f0s:
        f0n = f0 / (samplerate // 2)
        rps = f0n * np.pi
        radians = np.linspace(0, rps * n_samples, n_samples)
        sq.append(_square(radians)[None, ...])
        saw.append(_sawtooth(radians)[None, ...])
        tri.append(_sawtooth(radians, 0.5)[None, ...])
        sin.append(np.sin(radians)[None, ...])
    waves = np.concatenate(saw + sq + tri + sin, axis=0).astype(np.float32)
    return jnp.asarray(waves.reshape(len(f0s) * 4, n_samples))


def make_linear_interp_matrix(n_in, n_out):
    # linear interpolation (half-sample offset, matches jax.image.resize "linear")
    j = np.arange(n_out)
    s = (j + 0.5) * n_in / n_out - 0.5
    s = np.clip(s, 0.0, n_in - 1)
    lo = np.floor(s).astype(np.int64)
    hi = np.minimum(lo + 1, n_in - 1)
    w_hi = (s - lo).astype(np.float32)
    m = np.zeros((n_in, n_out), np.float32)
    m[lo, j] += (1.0 - w_hi)
    m[hi, j] += w_hi
    return jnp.asarray(m)


# ----------------------------- parameters -------------------------------------------
def init_params(key):
    def u(k, shape, scale=WEIGHT_INIT):
        return jax.random.uniform(k, shape, jnp.float32, -scale, scale)
    ks = jax.random.split(key, 16)
    p = {}

    # embed_periodicity (Linear(257, 8))
    ep_w = u(ks[0], (N_BINS, 8))
    ep_b = u(ks[1], (8,))

    # event heads: to_event_vectors (ENC_CH,16) + to_event_switch (ENC_CH,1),
    # packed into a lane-dense (ENC_CH, 128) weight (extra columns zero).
    ev_w, ev_b = u(ks[2], (ENC_CH, CONTEXT_DIM)), u(ks[3], (CONTEXT_DIM,))
    sw_w, sw_b = u(ks[4], (ENC_CH, 1)), u(ks[5], (1,))
    head_w = jnp.zeros((ENC_CH, HEAD_OUT), jnp.float32)
    head_w = head_w.at[:, :CONTEXT_DIM].set(ev_w)
    head_w = head_w.at[:, CONTEXT_DIM].set(sw_w[:, 0])
    head_b = jnp.zeros((HEAD_OUT,), jnp.float32)
    head_b = head_b.at[:CONTEXT_DIM].set(ev_b)
    head_b = head_b.at[CONTEXT_DIM].set(sw_b[0])

    # Pre-compose embed_periodicity with the event heads into a single (ENC_K, 128)
    # weight.  Exact (linear composition) because the AntiCausalStack stand-in is
    # the identity (TODO below); avoids the lane-sparse (.,8) intermediate, the XLA
    # transpose copy, and one launch per encode().
    head_w_r = head_w.reshape(NF, 8, HEAD_OUT)
    enc_w = jnp.einsum('kd,fdo->fko', ep_w, head_w_r).reshape(ENC_K, HEAD_OUT)
    p["enc_w"] = jnp.pad(enc_w, ((0, ENC_K_PAD - ENC_K), (0, 0)))
    p["enc_b"] = (head_b + jnp.einsum('d,fdo->o', ep_b, head_w_r)).reshape(1, HEAD_OUT)

    # from_context
    p["fc_w"] = u(ks[6], (CONTEXT_DIM, LATENT))
    p["fc_b"] = u(ks[7], (LATENT,)).reshape(1, LATENT)

    # generation heads: to_env (LATENT,4); atom selection (LATENT,16) with atom_bias
    # folded into its bias.
    p["env_w"] = u(ks[8], (LATENT, IMP_FRAMES))
    p["env_b"] = u(ks[9], (IMP_FRAMES,)).reshape(1, IMP_FRAMES)
    sel_w, sel_b = u(ks[10], (LATENT, TOTAL_ATOMS)), u(ks[11], (TOTAL_ATOMS,))
    atom_bias = jax.random.uniform(ks[12], (TOTAL_ATOMS,), jnp.float32, -1.0, 1.0)
    p["sel_w"] = sel_w
    p["sel_b"] = (sel_b + atom_bias).reshape(1, TOTAL_ATOMS)

    # constant linear-interp upsample matrix and deterministic noise carrier
    p["interp"] = make_linear_interp_matrix(IMP_FRAMES, IMPULSE_SIZE)
    p["noise2d"] = jax.random.normal(ks[13], (1, IMPULSE_SIZE), jnp.float32)

    # cached rfft of the zero-padded constant filterbank (hottest FFT path)
    fb = make_filterbank()
    p["fb_spec"] = jnp.fft.rfft(jnp.concatenate([fb, jnp.zeros_like(fb)], axis=-1),
                                axis=-1)                               # (NF, N+1)

    f0s = musical_scale_hz(21, 106, TOTAL_ATOMS // 4)
    p["waves_bf16"] = make_waves(RESONANCE_SIZE, f0s, SAMPLERATE).astype(jnp.bfloat16)
    return p


# ----------------------------- model pieces -----------------------------------------
def encode(p, spec4):
    Bv, nf, T, _ = spec4.shape
    # (B, nf, T, bins) -> (B*T, nf*bins); this transpose is fused by XLA into the
    # spectrogram epilogue under jit.  Pad K to a lane multiple (zeros x zero rows).
    xt = spec4.transpose(0, 2, 1, 3).reshape(Bv * T, nf * N_BINS)
    xt = jnp.pad(xt, ((0, 0), (0, ENC_K_PAD - nf * N_BINS)))
    # TODO(synk): AntiCausalStack (anti-causal dilated conv stack) not defined in the
    # reference source; identity stand-in (which is what makes the pre-composition of
    # embed_periodicity + event heads exact).
    heads = pallas_encode_heads(xt, p["enc_w"], p["enc_b"])            # (B*T, 128) lane-dense
    event_vecs = heads[:, :CONTEXT_DIM].reshape(Bv, T, CONTEXT_DIM)
    switch = jnp.maximum(heads[:, CONTEXT_DIM], 0.0).reshape(Bv, T)
    # sparsify / sparsify_vectors with n_to_keep=1 (index selection kept in JAX glue)
    idx = jnp.argmax(switch, axis=-1)
    val = jnp.take_along_axis(switch, idx[:, None], axis=-1)             # (B,1)
    attn = jax.nn.one_hot(idx, T, dtype=jnp.float32) * val               # (B,T)
    vecs = jnp.take_along_axis(event_vecs, idx[:, None, None], axis=1)   # (B,1,C)
    scheduling = attn[:, None, :]                                        # (B,1,T)
    return vecs, scheduling


def generate(p, vecs, scheduling):
    Bv, E, _ = vecs.shape
    vflat = vecs.reshape(Bv * E, CONTEXT_DIM)
    amps = jnp.sum(scheduling, axis=-1, keepdims=True)                   # (B,E,1)

    # TODO(synk): ConvUpsample + NoiseModel (learned filtered-noise synth) and
    # ResonanceChain are not defined in the reference source; the fused kernel
    # stand-in amplitude-modulates a fixed noise carrier (unit-normed) and mixes the
    # wavetable atoms per event.
    imp, res = pallas_generate(vflat, p)                                 # (B*E,IMP),(B*E,RES)

    imp_pad = jnp.pad(imp, ((0, 0), (0, RESONANCE_SIZE - IMPULSE_SIZE)))
    mixed_raw = fft_convolve(imp_pad, res)                               # (B*E, RES)

    # unit_norm * amps as plain jnp: XLA fuses it with the irfft epilogue.
    n = jnp.sqrt(jnp.sum(mixed_raw * mixed_raw, axis=-1, keepdims=True))
    mixed = mixed_raw / (n + 1e-8) * amps.reshape(Bv * E, 1)
    mixed = mixed.reshape(Bv, E, RESONANCE_SIZE)

    final = jnp.pad(mixed, ((0, 0), (0, 0), (0, N_SAMPLES - RESONANCE_SIZE)))
    up = jnp.zeros((Bv, E, N_SAMPLES // STEP, STEP), jnp.float32)
    up = up.at[..., 0].set(scheduling).reshape(Bv, E, N_SAMPLES)         # up[:, :, ::256]
    final = fft_convolve(final, up)[..., :N_SAMPLES]
    # TODO(synk): ReverbGenerator not defined in the reference source; dry pass-through.
    imp = imp.reshape(Bv, E, IMPULSE_SIZE)
    return final, imp, amps, mixed


def iterative(p, x):
    spec = experiment_spectrogram(x, p["fb_spec"])
    channels, schedules, vecs = [], [], []
    for _ in range(N_EVENTS):
        v, sched = encode(p, spec)
        vecs.append(v)
        schedules.append(sched)
        ch, _, _, _ = generate(p, v, sched)                              # (B,1,N)
        current = experiment_spectrogram(ch, p["fb_spec"])
        spec = jax.lax.stop_gradient(spec - current)
        channels.append(ch)
    return (jnp.concatenate(channels, axis=1),
            jnp.concatenate(vecs, axis=1),
            jnp.concatenate(schedules, axis=1))


def forward(p, x):
    channels, vecs, scheduling = iterative(p, x)
    final, imp, amps, mixed = generate(p, vecs, scheduling)
    # default path: not random_events / random_timings, return_context=True
    return channels, vecs, imp, scheduling, amps, mixed


# jit the whole forward: the N_EVENTS loop, all FFT / reshape glue and every
# pallas_call live in one compiled executable (no eager per-op dispatch).
forward_jit = jax.jit(forward)


# ----------------------------- main --------------------------------------------------
if __name__ == "__main__":
    key = jax.random.PRNGKey(0)
    pkey, xkey = jax.random.split(key)
    params = init_params(pkey)
    x = jax.random.normal(xkey, (B, 1, N_SAMPLES), jnp.float32)
    outs = forward_jit(params, x)
    jax.block_until_ready(outs)
    print("KERNEL_OK")
</pallas_src>

<mosaic_0001>
module attributes {stable_mosaic.version = 11 : i64} {
  func.func @_encode_kernel(%arg0: memref<32x4224xf32, #tpu.memory_space<vmem>>, %arg1: memref<4224x128xf32, #tpu.memory_space<vmem>>, %arg2: memref<1x128xf32, #tpu.memory_space<vmem>>, %arg3: memref<32x128xf32, #tpu.memory_space<vmem>>) attributes {dimension_semantics = [], scalar_prefetch = 0 : i64, scratch_operands = 0 : i64, tpu.core_type = #tpu.core_type<tc>} {
    %c0 = arith.constant 0 : index
    %c0_0 = arith.constant 0 : index
    %0 = vector.load %arg0[%c0, %c0_0] : memref<32x4224xf32, #tpu.memory_space<vmem>>, vector<32x4224xf32>
    %c0_1 = arith.constant 0 : index
    %c0_2 = arith.constant 0 : index
    %1 = vector.load %arg1[%c0_1, %c0_2] : memref<4224x128xf32, #tpu.memory_space<vmem>>, vector<4224x128xf32>
    %cst = arith.constant dense<0.000000e+00> : vector<32x128xf32>
    %2 = tpu.matmul %0, %1, %cst {dimension_numbers = #tpu.dot_dimension_numbers<[1], [0], [0], [1], [0, 0, 1, 1], [], []>} : vector<32x4224xf32>, vector<4224x128xf32>, vector<32x128xf32> -> vector<32x128xf32>
    %c0_3 = arith.constant 0 : index
    %c0_4 = arith.constant 0 : index
    %3 = vector.load %arg2[%c0_3, %c0_4] : memref<1x128xf32, #tpu.memory_space<vmem>>, vector<1x128xf32>
    %4 = vector.broadcast %3 : vector<1x128xf32> to vector<32x128xf32>
    %5 = arith.addf %2, %4 : vector<32x128xf32>
    %c0_5 = arith.constant 0 : index
    %c0_6 = arith.constant 0 : index
    %6 = vector.load %arg3[%c0_5, %c0_6] : memref<32x128xf32, #tpu.memory_space<vmem>>, vector<32x128xf32>
    tpu.vector_store %arg3[%c0_5, %c0_6], %5 {strides = array<i32>} : memref<32x128xf32, #tpu.memory_space<vmem>>, vector<32x128xf32>,
    return
  }
}

module attributes {stable_mosaic.version = 11 : i64} {
  func.func @_generate_kernel(%arg0: memref<2x16xf32, #tpu.memory_space<vmem>>, %arg1: memref<16x256xf32, #tpu.memory_space<vmem>>, %arg2: memref<1x256xf32, #tpu.memory_space<vmem>>, %arg3: memref<256x4xf32, #tpu.memory_space<vmem>>, %arg4: memref<1x4xf32, #tpu.memory_space<vmem>>, %arg5: memref<256x16xf32, #tpu.memory_space<vmem>>, %arg6: memref<1x16xf32, #tpu.memory_space<vmem>>, %arg7: memref<4x1024xf32, #tpu.memory_space<vmem>>, %arg8: memref<1x1024xf32, #tpu.memory_space<vmem>>, %arg9: memref<16x4096xbf16, #tpu.memory_space<vmem>>, %arg10: memref<2x1024xf32, #tpu.memory_space<vmem>>, %arg11: memref<2x4096xf32, #tpu.memory_space<vmem>>) attributes {dimension_semantics = [], scalar_prefetch = 0 : i64, scratch_operands = 0 : i64, tpu.core_type = #tpu.core_type<tc>} {
    %c0 = arith.constant 0 : index
    %c0_0 = arith.constant 0 : index
    %0 = vector.load %arg0[%c0, %c0_0] : memref<2x16xf32, #tpu.memory_space<vmem>>, vector<2x16xf32>
    %c0_1 = arith.constant 0 : index
    %c0_2 = arith.constant 0 : index
    %1 = vector.load %arg1[%c0_1, %c0_2] : memref<16x256xf32, #tpu.memory_space<vmem>>, vector<16x256xf32>
    %cst = arith.constant dense<0.000000e+00> : vector<2x256xf32>
    %2 = tpu.matmul %0, %1, %cst {dimension_numbers = #tpu.dot_dimension_numbers<[1], [0], [0], [1], [0, 0, 1, 1], [], []>} : vector<2x16xf32>, vector<16x256xf32>, vector<2x256xf32> -> vector<2x256xf32>
    %c0_3 = arith.constant 0 : index
    %c0_4 = arith.constant 0 : index
    %3 = vector.load %arg2[%c0_3, %c0_4] : memref<1x256xf32, #tpu.memory_space<vmem>>, vector<1x256xf32>
    %4 = vector.broadcast %3 : vector<1x256xf32> to vector<2x256xf32>
    %5 = arith.addf %2, %4 : vector<2x256xf32>
    %c0_5 = arith.constant 0 : index
    %c0_6 = arith.constant 0 : index
    %6 = vector.load %arg3[%c0_5, %c0_6] : memref<256x4xf32, #tpu.memory_space<vmem>>, vector<256x4xf32>
    %cst_7 = arith.constant dense<0.000000e+00> : vector<2x4xf32>
    %7 = tpu.matmul %5, %6, %cst_7 {dimension_numbers = #tpu.dot_dimension_numbers<[1], [0], [0], [1], [0, 0, 1, 1], [], []>} : vector<2x256xf32>, vector<256x4xf32>, vector<2x4xf32> -> vector<2x4xf32>
    %c0_8 = arith.constant 0 : index
    %c0_9 = arith.constant 0 : index
    %8 = vector.load %arg4[%c0_8, %c0_9] : memref<1x4xf32, #tpu.memory_space<vmem>>, vector<1x4xf32>
    %9 = vector.broadcast %8 : vector<1x4xf32> to vector<2x4xf32>
    %10 = arith.addf %7, %9 : vector<2x4xf32>
    %11 = arith.mulf %10, %10 : vector<2x4xf32>
    %c0_10 = arith.constant 0 : index
    %c0_11 = arith.constant 0 : index
    %12 = vector.load %arg5[%c0_10, %c0_11] : memref<256x16xf32, #tpu.memory_space<vmem>>, vector<256x16xf32>
    %cst_12 = arith.constant dense<0.000000e+00> : vector<2x16xf32>
    %13 = tpu.matmul %5, %12, %cst_12 {dimension_numbers = #tpu.dot_dimension_numbers<[1], [0], [0], [1], [0, 0, 1, 1], [], []>} : vector<2x256xf32>, vector<256x16xf32>, vector<2x16xf32> -> vector<2x16xf32>
    %c0_13 = arith.constant 0 : index
    %c0_14 = arith.constant 0 : index
    %14 = vector.load %arg6[%c0_13, %c0_14] : memref<1x16xf32, #tpu.memory_space<vmem>>, vector<1x16xf32>
    %15 = vector.broadcast %14 : vector<1x16xf32> to vector<2x16xf32>
    %16 = arith.addf %13, %15 : vector<2x16xf32>
    %cst_15 = arith.constant dense<0xFF800000> : vector<2xf32>
    %17 = vector.multi_reduction <maximumf>, %16, %cst_15 [1] : vector<2x16xf32> to vector<2xf32>
    %18 = vector.shape_cast %17 : vector<2xf32> to vector<2x1xf32>
    %19 = vector.broadcast %18 : vector<2x1xf32> to vector<2x16xf32>
    %20 = arith.subf %16, %19 : vector<2x16xf32>
    %21 = math.exp %20 : vector<2x16xf32>
    %cst_16 = arith.constant dense<0.000000e+00> : vector<2xf32>
    %22 = vector.multi_reduction <add>, %21, %cst_16 [1] : vector<2x16xf32> to vector<2xf32>
    %23 = vector.shape_cast %22 : vector<2xf32> to vector<2x1xf32>
    %24 = tpu.reciprocal %23 {approx = true} : vector<2x1xf32> -> vector<2x1xf32>
    %25 = vector.broadcast %24 : vector<2x1xf32> to vector<2x16xf32>
    %26 = arith.mulf %21, %25 : vector<2x16xf32>
    %c0_17 = arith.constant 0 : index
    %c0_18 = arith.constant 0 : index
    %27 = vector.load %arg7[%c0_17, %c0_18] : memref<4x1024xf32, #tpu.memory_space<vmem>>, vector<4x1024xf32>
    %cst_19 = arith.constant dense<0.000000e+00> : vector<2x1024xf32>
    %28 = tpu.matmul %11, %27, %cst_19 {dimension_numbers = #tpu.dot_dimension_numbers<[1], [0], [0], [1], [0, 0, 1, 1], [], []>} : vector<2x4xf32>, vector<4x1024xf32>, vector<2x1024xf32> -> vector<2x1024xf32>
    %c0_20 = arith.constant 0 : index
    %c0_21 = arith.constant 0 : index
    %29 = vector.load %arg8[%c0_20, %c0_21] : memref<1x1024xf32, #tpu.memory_space<vmem>>, vector<1x1024xf32>
    %30 = vector.broadcast %29 : vector<1x1024xf32> to vector<2x1024xf32>
    %31 = arith.mulf %30, %28 : vector<2x1024xf32>
    %32 = arith.mulf %31, %31 : vector<2x1024xf32>
    %cst_22 = arith.constant dense<0.000000e+00> : vector<2xf32>
    %33 = vector.multi_reduction <add>, %32, %cst_22 [1] : vector<2x1024xf32> to vector<2xf32>
    %34 = vector.shape_cast %33 : vector<2xf32> to vector<2x1xf32>
    %cst_23 = arith.constant 9.99999996E-13 : f32
    %35 = vector.broadcast %cst_23 : f32 to vector<2x1xf32>
    %36 = arith.addf %34, %35 : vector<2x1xf32>
    %37 = math.rsqrt %36 : vector<2x1xf32>
    %38 = vector.broadcast %37 : vector<2x1xf32> to vector<2x1024xf32>
    %39 = arith.mulf %31, %38 : vector<2x1024xf32>
    %c0_24 = arith.constant 0 : index
    %c0_25 = arith.constant 0 : index
    %40 = vector.load %arg10[%c0_24, %c0_25] : memref<2x1024xf32, #tpu.memory_space<vmem>>, vector<2x1024xf32>
    tpu.vector_store %arg10[%c0_24, %c0_25], %39 {strides = array<i32>} : memref<2x1024xf32, #tpu.memory_space<vmem>>, vector<2x1024xf32>,
    %41 = arith.truncf %26 : vector<2x16xf32> to vector<2x16xbf16>
    %c0_26 = arith.constant 0 : index
    %c0_27 = arith.constant 0 : index
    %42 = vector.load %arg9[%c0_26, %c0_27] : memref<16x4096xbf16, #tpu.memory_space<vmem>>, vector<16x4096xbf16>
    %cst_28 = arith.constant dense<0.000000e+00> : vector<2x4096xf32>
    %43 = tpu.matmul %41, %42, %cst_28 {dimension_numbers = #tpu.dot_dimension_numbers<[1], [0], [0], [1], [0, 0, 1, 1], [], []>} : vector<2x16xbf16>, vector<16x4096xbf16>, vector<2x4096xf32> -> vector<2x4096xf32>
    %c0_29 = arith.constant 0 : index
    %c0_30 = arith.constant 0 : index
    %44 = vector.load %arg11[%c0_29, %c0_30] : memref<2x4096xf32, #tpu.memory_space<vmem>>, vector<2x4096xf32>
    tpu.vector_store %arg11[%c0_29, %c0_30], %43 {strides = array<i32>} : memref<2x4096xf32, #tpu.memory_space<vmem>>, vector<2x4096xf32>,
    return
  }
}

module attributes {stable_mosaic.version = 11 : i64} {
  func.func @_generate_kernel(%arg0: memref<4x16xf32, #tpu.memory_space<vmem>>, %arg1: memref<16x256xf32, #tpu.memory_space<vmem>>, %arg2: memref<1x256xf32, #tpu.memory_space<vmem>>, %arg3: memref<256x4xf32, #tpu.memory_space<vmem>>, %arg4: memref<1x4xf32, #tpu.memory_space<vmem>>, %arg5: memref<256x16xf32, #tpu.memory_space<vmem>>, %arg6: memref<1x16xf32, #tpu.memory_space<vmem>>, %arg7: memref<4x1024xf32, #tpu.memory_space<vmem>>, %arg8: memref<1x1024xf32, #tpu.memory_space<vmem>>, %arg9: memref<16x4096xbf16, #tpu.memory_space<vmem>>, %arg10: memref<4x1024xf32, #tpu.memory_space<vmem>>, %arg11: memref<4x4096xf32, #tpu.memory_space<vmem>>) attributes {dimension_semantics = [], scalar_prefetch = 0 : i64, scratch_operands = 0 : i64, tpu.core_type = #tpu.core_type<tc>} {
    %c0 = arith.constant 0 : index
    %c0_0 = arith.constant 0 : index
    %0 = vector.load %arg0[%c0, %c0_0] : memref<4x16xf32, #tpu.memory_space<vmem>>, vector<4x16xf32>
    %c0_1 = arith.constant 0 : index
    %c0_2 = arith.constant 0 : index
    %1 = vector.load %arg1[%c0_1, %c0_2] : memref<16x256xf32, #tpu.memory_space<vmem>>, vector<16x256xf32>
    %cst = arith.constant dense<0.000000e+00> : vector<4x256xf32>
    %2 = tpu.matmul %0, %1, %cst {dimension_numbers = #tpu.dot_dimension_numbers<[1], [0], [0], [1], [0, 0, 1, 1], [], []>} : vector<4x16xf32>, vector<16x256xf32>, vector<4x256xf32> -> vector<4x256xf32>
    %c0_3 = arith.constant 0 : index
    %c0_4 = arith.constant 0 : index
    %3 = vector.load %arg2[%c0_3, %c0_4] : memref<1x256xf32, #tpu.memory_space<vmem>>, vector<1x256xf32>
    %4 = vector.broadcast %3 : vector<1x256xf32> to vector<4x256xf32>
    %5 = arith.addf %2, %4 : vector<4x256xf32>
    %c0_5 = arith.constant 0 : index
    %c0_6 = arith.constant 0 : index
    %6 = vector.load %arg3[%c0_5, %c0_6] : memref<256x4xf32, #tpu.memory_space<vmem>>, vector<256x4xf32>
    %cst_7 = arith.constant dense<0.000000e+00> : vector<4x4xf32>
    %7 = tpu.matmul %5, %6, %cst_7 {dimension_numbers = #tpu.dot_dimension_numbers<[1], [0], [0], [1], [0, 0, 1, 1], [], []>} : vector<4x256xf32>, vector<256x4xf32>, vector<4x4xf32> -> vector<4x4xf32>
    %c0_8 = arith.constant 0 : index
    %c0_9 = arith.constant 0 : index
    %8 = vector.load %arg4[%c0_8, %c0_9] : memref<1x4xf32, #tpu.memory_space<vmem>>, vector<1x4xf32>
    %9 = vector.broadcast %8 : vector<1x4xf32> to vector<4x4xf32>
    %10 = arith.addf %7, %9 : vector<4x4xf32>
    %11 = arith.mulf %10, %10 : vector<4x4xf32>
    %c0_10 = arith.constant 0 : index
    %c0_11 = arith.constant 0 : index
    %12 = vector.load %arg5[%c0_10, %c0_11] : memref<256x16xf32, #tpu.memory_space<vmem>>, vector<256x16xf32>
    %cst_12 = arith.constant dense<0.000000e+00> : vector<4x16xf32>
    %13 = tpu.matmul %5, %12, %cst_12 {dimension_numbers = #tpu.dot_dimension_numbers<[1], [0], [0], [1], [0, 0, 1, 1], [], []>} : vector<4x256xf32>, vector<256x16xf32>, vector<4x16xf32> -> vector<4x16xf32>
    %c0_13 = arith.constant 0 : index
    %c0_14 = arith.constant 0 : index
    %14 = vector.load %arg6[%c0_13, %c0_14] : memref<1x16xf32, #tpu.memory_space<vmem>>, vector<1x16xf32>
    %15 = vector.broadcast %14 : vector<1x16xf32> to vector<4x16xf32>
    %16 = arith.addf %13, %15 : vector<4x16xf32>
    %cst_15 = arith.constant dense<0xFF800000> : vector<4xf32>
    %17 = vector.multi_reduction <maximumf>, %16, %cst_15 [1] : vector<4x16xf32> to vector<4xf32>
    %18 = vector.shape_cast %17 : vector<4xf32> to vector<4x1xf32>
    %19 = vector.broadcast %18 : vector<4x1xf32> to vector<4x16xf32>
    %20 = arith.subf %16, %19 : vector<4x16xf32>
    %21 = math.exp %20 : vector<4x16xf32>
    %cst_16 = arith.constant dense<0.000000e+00> : vector<4xf32>
    %22 = vector.multi_reduction <add>, %21, %cst_16 [1] : vector<4x16xf32> to vector<4xf32>
    %23 = vector.shape_cast %22 : vector<4xf32> to vector<4x1xf32>
    %24 = tpu.reciprocal %23 {approx = true} : vector<4x1xf32> -> vector<4x1xf32>
    %25 = vector.broadcast %24 : vector<4x1xf32> to vector<4x16xf32>
    %26 = arith.mulf %21, %25 : vector<4x16xf32>
    %c0_17 = arith.constant 0 : index
    %c0_18 = arith.constant 0 : index
    %27 = vector.load %arg7[%c0_17, %c0_18] : memref<4x1024xf32, #tpu.memory_space<vmem>>, vector<4x1024xf32>
    %cst_19 = arith.constant dense<0.000000e+00> : vector<4x1024xf32>
    %28 = tpu.matmul %11, %27, %cst_19 {dimension_numbers = #tpu.dot_dimension_numbers<[1], [0], [0], [1], [0, 0, 1, 1], [], []>} : vector<4x4xf32>, vector<4x1024xf32>, vector<4x1024xf32> -> vector<4x1024xf32>
    %c0_20 = arith.constant 0 : index
    %c0_21 = arith.constant 0 : index
    %29 = vector.load %arg8[%c0_20, %c0_21] : memref<1x1024xf32, #tpu.memory_space<vmem>>, vector<1x1024xf32>
    %30 = vector.broadcast %29 : vector<1x1024xf32> to vector<4x1024xf32>
    %31 = arith.mulf %30, %28 : vector<4x1024xf32>
    %32 = arith.mulf %31, %31 : vector<4x1024xf32>
    %cst_22 = arith.constant dense<0.000000e+00> : vector<4xf32>
    %33 = vector.multi_reduction <add>, %32, %cst_22 [1] : vector<4x1024xf32> to vector<4xf32>
    %34 = vector.shape_cast %33 : vector<4xf32> to vector<4x1xf32>
    %cst_23 = arith.constant 9.99999996E-13 : f32
    %35 = vector.broadcast %cst_23 : f32 to vector<4x1xf32>
    %36 = arith.addf %34, %35 : vector<4x1xf32>
    %37 = math.rsqrt %36 : vector<4x1xf32>
    %38 = vector.broadcast %37 : vector<4x1xf32> to vector<4x1024xf32>
    %39 = arith.mulf %31, %38 : vector<4x1024xf32>
    %c0_24 = arith.constant 0 : index
    %c0_25 = arith.constant 0 : index
    %40 = vector.load %arg10[%c0_24, %c0_25] : memref<4x1024xf32, #tpu.memory_space<vmem>>, vector<4x1024xf32>
    tpu.vector_store %arg10[%c0_24, %c0_25], %39 {strides = array<i32>} : memref<4x1024xf32, #tpu.memory_space<vmem>>, vector<4x1024xf32>,
    %41 = arith.truncf %26 : vector<4x16xf32> to vector<4x16xbf16>
    %c0_26 = arith.constant 0 : index
    %c0_27 = arith.constant 0 : index
    %42 = vector.load %arg9[%c0_26, %c0_27] : memref<16x4096xbf16, #tpu.memory_space<vmem>>, vector<16x4096xbf16>
    %cst_28 = arith.constant dense<0.000000e+00> : vector<4x4096xf32>
    %43 = tpu.matmul %41, %42, %cst_28 {dimension_numbers = #tpu.dot_dimension_numbers<[1], [0], [0], [1], [0, 0, 1, 1], [], []>} : vector<4x16xbf16>, vector<16x4096xbf16>, vector<4x4096xf32> -> vector<4x4096xf32>
    %c0_29 = arith.constant 0 : index
    %c0_30 = arith.constant 0 : index
    %44 = vector.load %arg11[%c0_29, %c0_30] : memref<4x4096xf32, #tpu.memory_space<vmem>>, vector<4x4096xf32>
    tpu.vector_store %arg11[%c0_29, %c0_30], %43 {strides = array<i32>} : memref<4x4096xf32, #tpu.memory_space<vmem>>, vector<4x4096xf32>,
    return
  }
}

</mosaic_0001>

<bundles_post_ra>
// kernel: custom-call
= control target key start
LH: loop header
LB: loop body
LE: loop exit
PB: predicated region body
PF: predicated region fallthrough
CT: control target
= control target key end

     0   :  { %2 = vsyncpa [#allocation0], 0  ;;  %s47_s0 = inlined_call_operand.hbm [shape: c64[16,4097], index: 0, kind: input, shape index: {}]   ;;  %s48_s1 = inlined_call_operand.vmem [shape: f32[16,4097], index: 1, kind: output, shape index: {}]  }
   0x1   :  { %s3_s8 = sshll.u32 %s48_s1, 4  ;;  %s4_s8 = int_to_ptr.vmem [resolvable:$true] %s3_s8 }
   0x2   :  { %s17_s9 = scalar_lea.vmem %s4_s8, 8448  ;;  %p22_p1 = scmp.lt.s32.totalorder %s4_s8, %s4_s8 }
   0x3   :  { %p18_p0 = scmp.ne.s32.totalorder %s4_s8, %s17_s9  ;;  %p23_p2 = scmp.lt.s32.totalorder %s17_s9, %s17_s9 }
   0x5   :  { %p24_p3 = por %p23_p2, %p22_p1 }
   0x7   :  { %p25_p4 = pnand %p24_p3, %p18_p0 }
   0x9   :  { %28 = shalt.err (!%p25_p4)  }
   0xa   :  { %6 = dma.hbm_to_vmem [thread:$0]  %s47_s0, 8448, %s4_s8, [#allocation0] }
   0xb   :  { %29 = dma.done.wait [#allocation0], 8448  }
   0xc   :  { %30 = vsyncadd [#allocation0], 4294958848 }
   0xd   :  { %8 = vsyncpa [#allocation0], 1 }

// kernel: custom-call.1
= control target key start
LH: loop header
LB: loop body
LE: loop exit
PB: predicated region body
PF: predicated region fallthrough
CT: control target
= control target key end

     0   :  { %s51_s0 = inlined_call_operand.hbm [shape: c64[16,4097], index: 0, kind: input, shape index: {}]   ;;  %s52_s1 = inlined_call_operand.vmem [shape: f32[16,4097], index: 1, kind: output, shape index: {}]  }
   0x1   :  { %s2_s8 = scalar_lea.hbm %s51_s0, 8448 }
   0x2   :  { %3 = vsyncpa [#allocation0], 0  ;;  %s4_s11 = sshll.u32 %s52_s1, 4  ;;  %s5_s11 = int_to_ptr.vmem [resolvable:$true] %s4_s11 }
   0x3   :  { %s20_s12 = scalar_lea.vmem %s5_s11, 8448  ;;  %p25_p1 = scmp.lt.s32.totalorder %s5_s11, %s5_s11 }
   0x4   :  { %p21_p0 = scmp.ne.s32.totalorder %s5_s11, %s20_s12  ;;  %p26_p2 = scmp.lt.s32.totalorder %s20_s12, %s20_s12 }
   0x6   :  { %p27_p3 = por %p26_p2, %p25_p1 }
   0x8   :  { %p28_p4 = pnand %p27_p3, %p21_p0 }
   0xa   :  { %31 = shalt.err (!%p28_p4)  }
   0xb   :  { %7 = dma.hbm_to_vmem [thread:$0]  %s2_s8, 8448, %s5_s11, [#allocation0] }
   0xc   :  { %33 = dma.done.wait [#allocation0], 8448  }
   0xd   :  { %34 = vsyncadd [#allocation0], 4294958848 }
   0xe   :  { %9 = vsyncpa [#allocation0], 1 }

// kernel: reverse.27
= control target key start
LH: loop header
LB: loop body
LE: loop exit
PB: predicated region body
PF: predicated region fallthrough
CT: control target
= control target key end

     0   :  { %v2_v0 = vlaneseq  ;;  %s386_s0 = inlined_call_operand.vmem [shape: f32[2,16,4096], index: 0, kind: input, shape index: {}]   ;;  %s387_s1 = inlined_call_operand.vmem [shape: f32[2,16,4096], index: 1, kind: output, shape index: {}]  }
   0x2   :  { %v342_v1 = vsub.s32 127, %v2_v0 }
   0x4   :  { %4 = vset.pattern.permute.xlu0 %v342_v1 }
   0x5   :  { %s345_s6 = smov 0   ;;  %s347_s7 = smov 0  }
   0x6   :  { %s349_s8 = smov 0  }
   0x7 LB: > { %s265_s9 = sadd.s32 4294967295, %s330_s8   ;;  %s22_s10 = sadd.s32 1, %s326_s7  ;;  %s330_s8 = sphi %s349_s8, %s10_s8   ;;  %s326_s7 = sphi %s347_s7, %s389_s7   ;;  %s322_s6 = sphi %s345_s6, %s388_s6  }
   0x8   : > { %p23_p0 = scmp.ge.s32.totalorder %s22_s10, 32  ;;  %p267_p1 = scmp.ge.s32.totalorder %s330_s8, 32 }
   0x9   : > { %s45_s11 = sand.u32 (!%p267_p1), 1, %s330_s8   ;;  %s48_s12 = ssub.s32 (!%p267_p1), 31, %s326_s7 }
   0xa   : > { %s391_s10 = smov (%p23_p0, %s22_s10), 0  ;;  %43 = sbr.rel (%p267_p1) target bundleno = 20 (0x14), region = 16 }
   0xb   : > { %s268_s13 = sshll.u32 (!%p267_p1), %s45_s11, 5  ;;  %s269_s14 = sshll.u32 (!%p267_p1), %s48_s12, 3 }
   0xc   : > { %s56_s17 = scalar_lea.vmem (!%p267_p1), %s386_s0, %s269_s14  ;;  %s47_s18 = scalar_lea.vmem (!%p267_p1), [#allocation0], %s268_s13 }
   0xf   : > { %v91_v2 = vld [vmem:[%s56_s17] sm:$0xff] }
  0x10   : > { %v93_v3 = vld [vmem:[%s56_s17 + $0x100] sm:$0xff]  ;;  %92 = vst [vmem:[%s47_s18] sm:$0xff] %v91_v2 }
  0x11   : > { %v95_v4 = vld [vmem:[%s56_s17 + $0x200] sm:$0xff]  ;;  %94 = vst [vmem:[%s47_s18 + $0x8] sm:$0xff] %v93_v3 }
  0x12   : > { %96 = vst [vmem:[%s47_s18 + $0x10] sm:$0xff] %v95_v4  ;;  %v97_v5 = vld [vmem:[%s56_s17 + $0x300] sm:$0xff] }
  0x13   : > { %98 = vst [vmem:[%s47_s18 + $0x18] sm:$0xff] %v97_v5 }
  0x14 PF: > { %p270_p2 = scmp.ge.s32.totalorder %s330_s8, 1  ;;  %p103_p3 = scmp.lt.s32.totalorder %s330_s8, 33 }
  0x16   : > { %p104_p4 = pnand %p270_p2, %p103_p3 }
  0x17   : > { %s110_s19 = sand.u32 (!%p104_p4), 1, %s265_s9   ;;  %s280_s22 = sshll.u32 (!%p104_p4), %s322_s6, 3 }
  0x18   : > { %107 = sbr.rel (%p104_p4) target bundleno = 159 (0x9f), region = 54  ;;  %s271_s20 = sshll.u32 (!%p104_p4), %s110_s19, 5 }
  0x19   : > { %s112_s21 = scalar_lea.vmem (!%p104_p4), [#allocation0], %s271_s20  ;;  %s159_s25 = scalar_lea.vmem (!%p104_p4), %s387_s1, %s280_s22 }
  0x1d   : > { %307 = vset.pattern.permute.xlu1 %v342_v1  ;;  %v275_v6 = vld [vmem:[%s112_s21 + $0x10] sm:$0xff]  ;;  %v126_v7 = vld [vmem:[%s112_s21] sm:$0xff]  ;;  %v277_v8 = vld [vmem:[%s112_s21 + $0x18] sm:$0xff] }
  0x1e   : > { %139 = vperm.xlu1 %307, %v275_v6   ;;  %127 = vperm.xlu0 %4, %v126_v7   ;;  %v273_v9 = vld [vmem:[%s112_s21 + $0x8] sm:$0xff] }
  0x22   : > { %145 = vperm.xlu1 %307, %v277_v8   ;;  %133 = vperm.xlu0 %4, %v273_v9  }
  0x99   : > { %v140_v10 = vpop.permute.xlu1 %139  ;;  %v128_v11 = vpop.permute.xlu0 %127 }
  0x9a   : > { %199 = vst [vmem:[%s159_s25 + $0x200] sm:$0xff] %v140_v10  ;;  %195 = vst [vmem:[%s159_s25] sm:$0xff] %v128_v11 }
  0x9d   : > { %v146_v12 = vpop.permute.xlu1 %145  ;;  %v134_v13 = vpop.permute.xlu0 %133 }
  0x9e   : > { %201 = vst [vmem:[%s159_s25 + $0x300] sm:$0xff] %v146_v12  ;;  %197 = vst [vmem:[%s159_s25 + $0x100] sm:$0xff] %v134_v13 }
  0x9f PF: > { %s10_s8 = sadd.s32 1, %s330_s8   ;;  %s388_s6 = smov %s326_s7 }
  0xa0   : > { %p7_p5 = scmp.ge.s32.totalorder %s10_s8, 34   ;;  %s389_s7 = smov %s391_s10 }
  0xa2   :  { %9 = sbr.rel (!%p7_p5) target bundleno = 7 (0x7), region = 124 }

// kernel: forward.5
= control target key start
LH: loop header
LB: loop body
LE: loop exit
PB: predicated region body
PF: predicated region fallthrough
CT: control target
= control target key end

     0   :  { %s5169_s1 = inlined_call_operand.vmem [shape: f32[4224,128], index: 1, kind: input, shape index: {}]   ;;  %s5170_s0 = inlined_call_operand.vmem [shape: f32[32,4224], index: 0, kind: input, shape index: {}]   ;;  %s5171_s2 = inlined_call_operand.vmem [shape: f32[1,128], index: 2, kind: input, shape index: {}]   ;;  %s5172_s3 = inlined_call_operand.vmem [shape: f32[32,128], index: 3, kind: output, shape index: {}]  }
   0x1   :  { %v177_v0 = vld [vmem:[%s5169_s1 + $0xf8] sm:$0xff]  ;;  %v176_v4 = vld [vmem:[%s5169_s1 + $0xf0] sm:$0xff]  ;;  %v175_v8 = vld [vmem:[%s5169_s1 + $0xe8] sm:$0xff] }
   0x2   :  { %v209_v1 = vld [vmem:[%s5169_s1 + $0x1f8] sm:$0xff]  ;;  %2135 = vmatprep.subr.mxu0 %v177_v0  ;;  %v208_v5 = vld [vmem:[%s5169_s1 + $0x1f0] sm:$0xff]  ;;  %v207_v9 = vld [vmem:[%s5169_s1 + $0x1e8] sm:$0xff] }
   0x3   :  { %v161_v2 = vld [vmem:[%s5169_s1 + $0x78] sm:$0xff]  ;;  %2179 = vmatprep.subr.mxu1 %v209_v1  ;;  %v160_v6 = vld [vmem:[%s5169_s1 + $0x70] sm:$0xff]  ;;  %v159_v10 = vld [vmem:[%s5169_s1 + $0x68] sm:$0xff] }
   0x4   :  { %v193_v3 = vld [vmem:[%s5169_s1 + $0x178] sm:$0xff]  ;;  %2136 = vmatpush3.msra.mxu0 %v161_v2  ;;  %v192_v7 = vld [vmem:[%s5169_s1 + $0x170] sm:$0xff]  ;;  %v191_v11 = vld [vmem:[%s5169_s1 + $0x168] sm:$0xff] }
   0x5   :  { %2180 = vmatpush3.msra.mxu1 %v193_v3  ;;  %2137 = vmatprep.subr.mxu0 %v176_v4  ;;  %v174_v12 = vld [vmem:[%s5169_s1 + $0xe0] sm:$0xff]  ;;  %v173_v16 = vld [vmem:[%s5169_s1 + $0xd8] sm:$0xff]  ;;  %v172_v20 = vld [vmem:[%s5169_s1 + $0xd0] sm:$0xff] }
   0x6   :  { %2181 = vmatprep.subr.mxu1 %v208_v5  ;;  %2138 = vmatpush3.msra.mxu0 %v160_v6  ;;  %v206_v13 = vld [vmem:[%s5169_s1 + $0x1e0] sm:$0xff]  ;;  %v205_v17 = vld [vmem:[%s5169_s1 + $0x1d8] sm:$0xff]  ;;  %v204_v21 = vld [vmem:[%s5169_s1 + $0x1d0] sm:$0xff] }
   0x7   :  { %2182 = vmatpush3.msra.mxu1 %v192_v7  ;;  %2139 = vmatprep.subr.mxu0 %v175_v8  ;;  %v158_v14 = vld [vmem:[%s5169_s1 + $0x60] sm:$0xff]  ;;  %v157_v18 = vld [vmem:[%s5169_s1 + $0x58] sm:$0xff]  ;;  %v156_v22 = vld [vmem:[%s5169_s1 + $0x50] sm:$0xff] }
   0x8   :  { %2183 = vmatprep.subr.mxu1 %v207_v9  ;;  %v190_v15 = vld [vmem:[%s5169_s1 + $0x160] sm:$0xff]  ;;  %2140 = vmatpush3.msra.mxu0 %v159_v10  ;;  %v189_v19 = vld [vmem:[%s5169_s1 + $0x158] sm:$0xff]  ;;  %v188_v23 = vld [vmem:[%s5169_s1 + $0x150] sm:$0xff] }
   0x9   :  { %2184 = vmatpush3.msra.mxu1 %v191_v11  ;;  %2141 = vmatprep.subr.mxu0 %v174_v12  ;;  %v171_v24 = vld [vmem:[%s5169_s1 + $0xc8] sm:$0xff]  ;;  %v170_v28 = vld [vmem:[%s5169_s1 + $0xc0] sm:$0xff]  ;;  %v169_v32 = vld [vmem:[%s5169_s1 + $0xb8] sm:$0xff] }
   0xa   :  { %2185 = vmatprep.subr.mxu1 %v206_v13  ;;  %2142 = vmatpush3.msra.mxu0 %v158_v14  ;;  %v203_v25 = vld [vmem:[%s5169_s1 + $0x1c8] sm:$0xff]  ;;  %v202_v29 = vld [vmem:[%s5169_s1 + $0x1c0] sm:$0xff]  ;;  %v201_v33 = vld [vmem:[%s5169_s1 + $0x1b8] sm:$0xff] }
   0xb   :  { %2186 = vmatpush3.msra.mxu1 %v190_v15  ;;  %2143 = vmatprep.subr.mxu0 %v173_v16  ;;  %v155_v26 = vld [vmem:[%s5169_s1 + $0x48] sm:$0xff]  ;;  %v154_v30 = vld [vmem:[%s5169_s1 + $0x40] sm:$0xff]  ;;  %v153_v34 = vld [vmem:[%s5169_s1 + $0x38] sm:$0xff] }
   0xc   :  { %2187 = vmatprep.subr.mxu1 %v205_v17  ;;  %2144 = vmatpush3.msra.mxu0 %v157_v18  ;;  %v187_v27 = vld [vmem:[%s5169_s1 + $0x148] sm:$0xff]  ;;  %v186_v31 = vld [vmem:[%s5169_s1 + $0x140] sm:$0xff]  ;;  %v185_v35 = vld [vmem:[%s5169_s1 + $0x138] sm:$0xff] }
   0xd   :  { %2188 = vmatpush3.msra.mxu1 %v189_v19  ;;  %2145 = vmatprep.subr.mxu0 %v172_v20  ;;  %v168_v36 = vld [vmem:[%s5169_s1 + $0xb0] sm:$0xff]  ;;  %v167_v40 = vld [vmem:[%s5169_s1 + $0xa8] sm:$0xff]  ;;  %v166_v44 = vld [vmem:[%s5169_s1 + $0xa0] sm:$0xff] }
   0xe   :  { %2189 = vmatprep.subr.mxu1 %v204_v21  ;;  %2146 = vmatpush3.msra.mxu0 %v156_v22  ;;  %v200_v37 = vld [vmem:[%s5169_s1 + $0x1b0] sm:$0xff]  ;;  %v199_v41 = vld [vmem:[%s5169_s1 + $0x1a8] sm:$0xff]  ;;  %v198_v45 = vld [vmem:[%s5169_s1 + $0x1a0] sm:$0xff] }
   0xf   :  { %2190 = vmatpush3.msra.mxu1 %v188_v23  ;;  %2147 = vmatprep.subr.mxu0 %v171_v24  ;;  %v152_v38 = vld [vmem:[%s5169_s1 + $0x30] sm:$0xff]  ;;  %v151_v42 = vld [vmem:[%s5169_s1 + $0x28] sm:$0xff]  ;;  %v150_v46 = vld [vmem:[%s5169_s1 + $0x20] sm:$0xff] }
  0x10   :  { %2191 = vmatprep.subr.mxu1 %v203_v25  ;;  %2148 = vmatpush3.msra.mxu0 %v155_v26  ;;  %v184_v39 = vld [vmem:[%s5169_s1 + $0x130] sm:$0xff]  ;;  %v183_v43 = vld [vmem:[%s5169_s1 + $0x128] sm:$0xff]  ;;  %v182_v47 = vld [vmem:[%s5169_s1 + $0x120] sm:$0xff] }
  0x11   :  { %2192 = vmatpush3.msra.mxu1 %v187_v27  ;;  %2149 = vmatprep.subr.mxu0 %v170_v28  ;;  %v165_v48 = vld [vmem:[%s5169_s1 + $0x98] sm:$0xff]  ;;  %v164_v52 = vld [vmem:[%s5169_s1 + $0x90] sm:$0xff]  ;;  %v163_v56 = vld [vmem:[%s5169_s1 + $0x88] sm:$0xff] }
  0x12   :  { %2193 = vmatprep.subr.mxu1 %v202_v29  ;;  %2150 = vmatpush3.msra.mxu0 %v154_v30  ;;  %v197_v49 = vld [vmem:[%s5169_s1 + $0x198] sm:$0xff]  ;;  %v196_v53 = vld [vmem:[%s5169_s1 + $0x190] sm:$0xff]  ;;  %v195_v57 = vld [vmem:[%s5169_s1 + $0x188] sm:$0xff] }
  0x13   :  { %2194 = vmatpush3.msra.mxu1 %v186_v31  ;;  %2151 = vmatprep.subr.mxu0 %v169_v32  ;;  %v149_v50 = vld [vmem:[%s5169_s1 + $0x18] sm:$0xff]  ;;  %v148_v54 = vld [vmem:[%s5169_s1 + $0x10] sm:$0xff]  ;;  %v147_v58 = vld [vmem:[%s5169_s1 + $0x8] sm:$0xff] }
  0x14   :  { %2195 = vmatprep.subr.mxu1 %v201_v33  ;;  %2152 = vmatpush3.msra.mxu0 %v153_v34  ;;  %v181_v51 = vld [vmem:[%s5169_s1 + $0x118] sm:$0xff]  ;;  %v180_v55 = vld [vmem:[%s5169_s1 + $0x110] sm:$0xff]  ;;  %v179_v59 = vld [vmem:[%s5169_s1 + $0x108] sm:$0xff] }
  0x15   :  { %2196 = vmatpush3.msra.mxu1 %v185_v35  ;;  %2153 = vmatprep.subr.mxu0 %v168_v36  ;;  %v162_v60 = vld [vmem:[%s5169_s1 + $0x80] sm:$0xff]  ;;  %v15_v63 = vld [vmem:[%s5170_s0 + $0x8] sm:$0xff]  ;;  %v17_v1 = vld [vmem:[%s5170_s0 + $0x18] sm:$0xff] }
  0x16   :  { %2197 = vmatprep.subr.mxu1 %v200_v37  ;;  %2154 = vmatpush3.msra.mxu0 %v152_v38  ;;  %v194_v61 = vld [vmem:[%s5169_s1 + $0x180] sm:$0xff]  ;;  %v16_v3 = vld [vmem:[%s5170_s0 + $0x10] sm:$0xff]  ;;  %v241_v4 = vld [vmem:[%s5169_s1 + $0x2f8] sm:$0xff] }
  0x17   :  { %2198 = vmatpush3.msra.mxu1 %v184_v39  ;;  %2155 = vmatprep.subr.mxu0 %v167_v40  ;;  %v146_v62 = vld [vmem:[%s5169_s1] sm:$0xff]  ;;  %v273_v5 = vld [vmem:[%s5169_s1 + $0x3f8] sm:$0xff]  ;;  %v240_v8 = vld [vmem:[%s5169_s1 + $0x2f0] sm:$0xff] }
  0x18   :  { %2199 = vmatprep.subr.mxu1 %v199_v41  ;;  %2156 = vmatpush3.msra.mxu0 %v151_v42  ;;  %v178_v0 = vld [vmem:[%s5169_s1 + $0x100] sm:$0xff]  ;;  %v225_v6 = vld [vmem:[%s5169_s1 + $0x278] sm:$0xff]  ;;  %v272_v9 = vld [vmem:[%s5169_s1 + $0x3f0] sm:$0xff] }
  0x19   :  { %2200 = vmatpush3.msra.mxu1 %v183_v43  ;;  %2157 = vmatprep.subr.mxu0 %v166_v44  ;;  %v14_v2 = vld [vmem:[%s5170_s0] sm:$0xff]  ;;  %v257_v7 = vld [vmem:[%s5169_s1 + $0x378] sm:$0xff]  ;;  %v224_v10 = vld [vmem:[%s5169_s1 + $0x270] sm:$0xff] }
  0x1a   :  { %2201 = vmatprep.subr.mxu1 %v198_v45  ;;  %2158 = vmatpush3.msra.mxu0 %v150_v46  ;;  %v256_v11 = vld [vmem:[%s5169_s1 + $0x370] sm:$0xff]  ;;  %v239_v12 = vld [vmem:[%s5169_s1 + $0x2e8] sm:$0xff]  ;;  %v238_v16 = vld [vmem:[%s5169_s1 + $0x2e0] sm:$0xff] }
  0x1b   :  { %2202 = vmatpush3.msra.mxu1 %v182_v47  ;;  %2159 = vmatprep.subr.mxu0 %v165_v48  ;;  %v271_v13 = vld [vmem:[%s5169_s1 + $0x3e8] sm:$0xff]  ;;  %v270_v17 = vld [vmem:[%s5169_s1 + $0x3e0] sm:$0xff]  ;;  %v237_v20 = vld [vmem:[%s5169_s1 + $0x2d8] sm:$0xff] }
  0x1c   :  { %2203 = vmatprep.subr.mxu1 %v197_v49  ;;  %2160 = vmatpush3.msra.mxu0 %v149_v50  ;;  %v223_v14 = vld [vmem:[%s5169_s1 + $0x268] sm:$0xff]  ;;  %v222_v18 = vld [vmem:[%s5169_s1 + $0x260] sm:$0xff]  ;;  %v269_v21 = vld [vmem:[%s5169_s1 + $0x3d8] sm:$0xff] }
  0x1d   :  { %2204 = vmatpush3.msra.mxu1 %v181_v51  ;;  %2161 = vmatprep.subr.mxu0 %v164_v52  ;;  %v255_v15 = vld [vmem:[%s5169_s1 + $0x368] sm:$0xff]  ;;  %v254_v19 = vld [vmem:[%s5169_s1 + $0x360] sm:$0xff]  ;;  %v221_v22 = vld [vmem:[%s5169_s1 + $0x258] sm:$0xff] }
  0x1e   :  { %2205 = vmatprep.subr.mxu1 %v196_v53  ;;  %2162 = vmatpush3.msra.mxu0 %v148_v54  ;;  %v253_v23 = vld [vmem:[%s5169_s1 + $0x358] sm:$0xff]  ;;  %v236_v24 = vld [vmem:[%s5169_s1 + $0x2d0] sm:$0xff]  ;;  %v235_v28 = vld [vmem:[%s5169_s1 + $0x2c8] sm:$0xff] }
  0x1f   :  { %2206 = vmatpush3.msra.mxu1 %v180_v55  ;;  %2163 = vmatprep.subr.mxu0 %v163_v56  ;;  %v268_v25 = vld [vmem:[%s5169_s1 + $0x3d0] sm:$0xff]  ;;  %v267_v29 = vld [vmem:[%s5169_s1 + $0x3c8] sm:$0xff]  ;;  %v234_v32 = vld [vmem:[%s5169_s1 + $0x2c0] sm:$0xff] }
  0x20   :  { %2207 = vmatprep.subr.mxu1 %v195_v57  ;;  %2164 = vmatpush3.msra.mxu0 %v147_v58  ;;  %v220_v26 = vld [vmem:[%s5169_s1 + $0x250] sm:$0xff]  ;;  %v219_v30 = vld [vmem:[%s5169_s1 + $0x248] sm:$0xff]  ;;  %v266_v33 = vld [vmem:[%s5169_s1 + $0x3c0] sm:$0xff] }
  0x21   :  { %2208 = vmatpush3.msra.mxu1 %v179_v59  ;;  %2165 = vmatprep.subr.mxu0 %v162_v60  ;;  %v252_v27 = vld [vmem:[%s5169_s1 + $0x350] sm:$0xff]  ;;  %v251_v31 = vld [vmem:[%s5169_s1 + $0x348] sm:$0xff]  ;;  %v218_v34 = vld [vmem:[%s5169_s1 + $0x240] sm:$0xff] }
  0x22   :  { %2209 = vmatprep.subr.mxu1 %v194_v61  ;;  %2166 = vmatpush3.msra.mxu0 %v146_v62  ;;  %v250_v35 = vld [vmem:[%s5169_s1 + $0x340] sm:$0xff]  ;;  %v48_v36 = vld [vmem:[%s5170_s0 + $0x110] sm:$0xff]  ;;  %v233_v37 = vld [vmem:[%s5169_s1 + $0x2b8] sm:$0xff] }
  0x23   :  { %745 = vmatprep.mubr.f32.mxu0 %v15_v63  ;;  %2210 = vmatpush3.msra.mxu1 %v178_v0  ;;  %v265_v38 = vld [vmem:[%s5169_s1 + $0x3b8] sm:$0xff]  ;;  %v47_v39 = vld [vmem:[%s5170_s0 + $0x108] sm:$0xff]  ;;  %v50_v42 = vld [vmem:[%s5170_s0 + $0x120] sm:$0xff] }
  0x24   :  { %830 = vmatprep.mubr.f32.mxu1 %v17_v1  ;;  %746 = vmatmul.mubr.f32.vlgmr.msra.gmra.mxu0 %v14_v2  ;;  %v217_v40 = vld [vmem:[%s5169_s1 + $0x238] sm:$0xff]  ;;  %v232_v43 = vld [vmem:[%s5169_s1 + $0x2b0] sm:$0xff]  ;;  %v231_v49 = vld [vmem:[%s5169_s1 + $0x2a8] sm:$0xff] }
  0x25   :  { %831 = vmatmul.mubr.f32.vlgmr.msra.gmra.mxu1 %v16_v3  ;;  %2223 = vmatprep.subr.mxu0 %v241_v4  ;;  %v249_v41 = vld [vmem:[%s5169_s1 + $0x338] sm:$0xff]  ;;  %v264_v44 = vld [vmem:[%s5169_s1 + $0x3b0] sm:$0xff]  ;;  %v263_v50 = vld [vmem:[%s5169_s1 + $0x3a8] sm:$0xff] }
  0x26   :  { %2267 = vmatprep.subr.mxu1 %v273_v5  ;;  %2224 = vmatpush3.msra.mxu0 %v225_v6  ;;  %v49_v45 = vld [vmem:[%s5170_s0 + $0x118] sm:$0xff]  ;;  %v216_v46 = vld [vmem:[%s5169_s1 + $0x230] sm:$0xff]  ;;  %v215_v52 = vld [vmem:[%s5169_s1 + $0x228] sm:$0xff] }
  0x27   :  { %2268 = vmatpush3.msra.mxu1 %v257_v7  ;;  %2225 = vmatprep.subr.mxu0 %v240_v8  ;;  %v248_v47 = vld [vmem:[%s5169_s1 + $0x330] sm:$0xff]  ;;  %v81_v48 = vld [vmem:[%s5170_s0 + $0x218] sm:$0xff]  ;;  %v247_v53 = vld [vmem:[%s5169_s1 + $0x328] sm:$0xff] }
  0x28   :  { %2269 = vmatprep.subr.mxu1 %v272_v9  ;;  %2226 = vmatpush3.msra.mxu0 %v224_v10  ;;  %v80_v51 = vld [vmem:[%s5170_s0 + $0x210] sm:$0xff]  ;;  %v83_v54 = vld [vmem:[%s5170_s0 + $0x228] sm:$0xff]  ;;  %v230_v55 = vld [vmem:[%s5169_s1 + $0x2a0] sm:$0xff] }
  0x29   :  { %2270 = vmatpush3.msra.mxu1 %v256_v11  ;;  %2227 = vmatprep.subr.mxu0 %v239_v12  ;;  %v262_v56 = vld [vmem:[%s5169_s1 + $0x3a0] sm:$0xff]  ;;  %v229_v61 = vld [vmem:[%s5169_s1 + $0x298] sm:$0xff]  ;;  %v116_v2 = vld [vmem:[%s5170_s0 + $0x330] sm:$0xff] }
  0x2a   :  { %2271 = vmatprep.subr.mxu1 %v271_v13  ;;  %2228 = vmatpush3.msra.mxu0 %v223_v14  ;;  %v82_v57 = vld [vmem:[%s5170_s0 + $0x220] sm:$0xff]  ;;  %v261_v62 = vld [vmem:[%s5169_s1 + $0x398] sm:$0xff]  ;;  %v228_v3 = vld [vmem:[%s5169_s1 + $0x290] sm:$0xff] }
  0x2b   :  { %2272 = vmatpush3.msra.mxu1 %v255_v15  ;;  %2229 = vmatprep.subr.mxu0 %v238_v16  ;;  %v214_v58 = vld [vmem:[%s5169_s1 + $0x220] sm:$0xff]  ;;  %v113_v63 = vld [vmem:[%s5170_s0 + $0x318] sm:$0xff]  ;;  %v260_v4 = vld [vmem:[%s5169_s1 + $0x390] sm:$0xff] }
  0x2c   :  { %2273 = vmatprep.subr.mxu1 %v270_v17  ;;  %2230 = vmatpush3.msra.mxu0 %v222_v18  ;;  %v246_v59 = vld [vmem:[%s5169_s1 + $0x320] sm:$0xff]  ;;  %v213_v0 = vld [vmem:[%s5169_s1 + $0x218] sm:$0xff]  ;;  %v115_v5 = vld [vmem:[%s5170_s0 + $0x328] sm:$0xff] }
  0x2d   :  { %2274 = vmatpush3.msra.mxu1 %v254_v19  ;;  %2231 = vmatprep.subr.mxu0 %v237_v20  ;;  %v114_v60 = vld [vmem:[%s5170_s0 + $0x320] sm:$0xff]  ;;  %v245_v1 = vld [vmem:[%s5169_s1 + $0x318] sm:$0xff]  ;;  %v212_v6 = vld [vmem:[%s5169_s1 + $0x210] sm:$0xff] }
  0x2e   :  { %2275 = vmatprep.subr.mxu1 %v269_v21  ;;  %2232 = vmatpush3.msra.mxu0 %v221_v22  ;;  %v244_v7 = vld [vmem:[%s5169_s1 + $0x310] sm:$0xff]  ;;  %v227_v8 = vld [vmem:[%s5169_s1 + $0x288] sm:$0xff]  ;;  %v226_v12 = vld [vmem:[%s5169_s1 + $0x280] sm:$0xff] }
  0x2f   :  { %2276 = vmatpush3.msra.mxu1 %v253_v23  ;;  %2233 = vmatprep.subr.mxu0 %v236_v24  ;;  %v259_v9 = vld [vmem:[%s5169_s1 + $0x388] sm:$0xff]  ;;  %v258_v13 = vld [vmem:[%s5169_s1 + $0x380] sm:$0xff]  ;;  %v21_v17 = vld [vmem:[%s5170_s0 + $0x38] sm:$0xff] }
  0x30   :  { %2277 = vmatprep.subr.mxu1 %v268_v25  ;;  %2234 = vmatpush3.msra.mxu0 %v220_v26  ;;  %v211_v10 = vld [vmem:[%s5169_s1 + $0x208] sm:$0xff]  ;;  %v210_v14 = vld [vmem:[%s5169_s1 + $0x200] sm:$0xff]  ;;  %v20_v19 = vld [vmem:[%s5170_s0 + $0x30] sm:$0xff] }
  0x31   :  { %2278 = vmatpush3.msra.mxu1 %v252_v27  ;;  %2235 = vmatprep.subr.mxu0 %v235_v28  ;;  %v243_v11 = vld [vmem:[%s5169_s1 + $0x308] sm:$0xff]  ;;  %v242_v16 = vld [vmem:[%s5169_s1 + $0x300] sm:$0xff]  ;;  %v305_v20 = vld [vmem:[%s5169_s1 + $0x4f8] sm:$0xff] }
  0x32   :  { %2279 = vmatprep.subr.mxu1 %v267_v29  ;;  %2236 = vmatpush3.msra.mxu0 %v219_v30  ;;  %v19_v15 = vld [vmem:[%s5170_s0 + $0x28] sm:$0xff]  ;;  %v18_v18 = vld [vmem:[%s5170_s0 + $0x20] sm:$0xff]  ;;  %v337_v21 = vld [vmem:[%s5169_s1 + $0x5f8] sm:$0xff] }
  0x33   :  { %2280 = vmatpush3.msra.mxu1 %v251_v31  ;;  %2237 = vmatprep.subr.mxu0 %v234_v32  ;;  %v289_v22 = vld [vmem:[%s5169_s1 + $0x478] sm:$0xff]  ;;  %v304_v24 = vld [vmem:[%s5169_s1 + $0x4f0] sm:$0xff]  ;;  %v51_v29 = vld [vmem:[%s5170_s0 + $0x128] sm:$0xff] }
  0x34   :  { %2281 = vmatprep.subr.mxu1 %v266_v33  ;;  %2238 = vmatpush3.msra.mxu0 %v218_v34  ;;  %v321_v23 = vld [vmem:[%s5169_s1 + $0x578] sm:$0xff]  ;;  %v336_v25 = vld [vmem:[%s5169_s1 + $0x5f0] sm:$0xff]  ;;  %v303_v30 = vld [vmem:[%s5169_s1 + $0x4e8] sm:$0xff] }
  0x35   :  { %2282 = vmatpush3.msra.mxu1 %v250_v35  ;;  %750 = vmatprep.mubr.f32.mxu0 %v48_v36  ;;  %v52_v26 = vld [vmem:[%s5170_s0 + $0x130] sm:$0xff]  ;;  %v335_v31 = vld [vmem:[%s5169_s1 + $0x5e8] sm:$0xff]  ;;  %v54_v32 = vld [vmem:[%s5170_s0 + $0x140] sm:$0xff] }
  0x36   :  { %2239 = vmatprep.subr.mxu0 %v233_v37  ;;  %2283 = vmatprep.subr.mxu1 %v265_v38  ;;  %v288_v27 = vld [vmem:[%s5169_s1 + $0x470] sm:$0xff]  ;;  %v287_v33 = vld [vmem:[%s5169_s1 + $0x468] sm:$0xff]  ;;  %v302_v35 = vld [vmem:[%s5169_s1 + $0x4e0] sm:$0xff] }
  0x37   :  { %751 = vmatmul.mubr.f32.gmra.mxu0 %v47_v39  ;;  %2284 = vmatpush3.msra.mxu1 %v249_v41  ;;  %v320_v28 = vld [vmem:[%s5169_s1 + $0x570] sm:$0xff]  ;;  %v319_v34 = vld [vmem:[%s5169_s1 + $0x568] sm:$0xff]  ;;  %v53_v36 = vld [vmem:[%s5170_s0 + $0x138] sm:$0xff] }
  0x38   :  { %2240 = vmatpush3.msra.mxu0 %v217_v40  ;;  %835 = vmatprep.mubr.f32.mxu1 %v50_v42  ;;  %v334_v37 = vld [vmem:[%s5169_s1 + $0x5e0] sm:$0xff]  ;;  %v85_v38 = vld [vmem:[%s5170_s0 + $0x238] sm:$0xff]  ;;  %v84_v41 = vld [vmem:[%s5170_s0 + $0x230] sm:$0xff] }
  0x39   :  { %2241 = vmatprep.subr.mxu0 %v232_v43  ;;  %2285 = vmatprep.subr.mxu1 %v264_v44  ;;  %v286_v39 = vld [vmem:[%s5169_s1 + $0x460] sm:$0xff]  ;;  %v301_v42 = vld [vmem:[%s5169_s1 + $0x4d8] sm:$0xff]  ;;  %v87_v44 = vld [vmem:[%s5170_s0 + $0x248] sm:$0xff] }
  0x3a   :  { %836 = vmatmul.mubr.f32.gmra.mxu1 %v49_v45  ;;  %2242 = vmatpush3.msra.mxu0 %v216_v46  ;;  %v318_v40 = vld [vmem:[%s5169_s1 + $0x560] sm:$0xff]  ;;  %v333_v43 = vld [vmem:[%s5169_s1 + $0x5d8] sm:$0xff] }
  0x3b   :  { %2286 = vmatpush3.msra.mxu1 %v248_v47  ;;  %755 = vmatprep.mubr.f32.mxu0 %v81_v48  ;;  %v285_v45 = vld [vmem:[%s5169_s1 + $0x458] sm:$0xff]  ;;  %v300_v47 = vld [vmem:[%s5169_s1 + $0x4d0] sm:$0xff]  ;;  %v86_v48 = vld [vmem:[%s5170_s0 + $0x240] sm:$0xff] }
  0x3c   :  { %2243 = vmatprep.subr.mxu0 %v231_v49  ;;  %2287 = vmatprep.subr.mxu1 %v263_v50  ;;  %v317_v46 = vld [vmem:[%s5169_s1 + $0x558] sm:$0xff]  ;;  %v332_v49 = vld [vmem:[%s5169_s1 + $0x5d0] sm:$0xff]  ;;  %v118_v50 = vld [vmem:[%s5170_s0 + $0x340] sm:$0xff] }
  0x3d   :  { %756 = vmatmul.mubr.f32.gmra.mxu0 %v80_v51  ;;  %2288 = vmatpush3.msra.mxu1 %v247_v53  ;;  %v284_v51 = vld [vmem:[%s5169_s1 + $0x450] sm:$0xff]  ;;  %v117_v53 = vld [vmem:[%s5170_s0 + $0x338] sm:$0xff] }
  0x3e   :  { %2244 = vmatpush3.msra.mxu0 %v215_v52  ;;  %840 = vmatprep.mubr.f32.mxu1 %v83_v54  ;;  %v316_v52 = vld [vmem:[%s5169_s1 + $0x550] sm:$0xff]  ;;  %v299_v54 = vld [vmem:[%s5169_s1 + $0x4c8] sm:$0xff] }
  0x3f   :  { %2245 = vmatprep.subr.mxu0 %v230_v55  ;;  %2289 = vmatprep.subr.mxu1 %v262_v56  ;;  %v331_v55 = vld [vmem:[%s5169_s1 + $0x5c8] sm:$0xff]  ;;  %v120_v56 = vld [vmem:[%s5170_s0 + $0x350] sm:$0xff] }
  0x40   :  { %841 = vmatmul.mubr.f32.gmra.mxu1 %v82_v57  ;;  %2246 = vmatpush3.msra.mxu0 %v214_v58  ;;  %v283_v57 = vld [vmem:[%s5169_s1 + $0x448] sm:$0xff] }
  0x41   :  { %2290 = vmatpush3.msra.mxu1 %v246_v59  ;;  %760 = vmatprep.mubr.f32.mxu0 %v114_v60  ;;  %v315_v58 = vld [vmem:[%s5169_s1 + $0x548] sm:$0xff]  ;;  %v298_v59 = vld [vmem:[%s5169_s1 + $0x4c0] sm:$0xff] }
  0x42   :  { %2247 = vmatprep.subr.mxu0 %v229_v61  ;;  %2291 = vmatprep.subr.mxu1 %v261_v62  ;;  %v119_v60 = vld [vmem:[%s5170_s0 + $0x348] sm:$0xff]  ;;  %v330_v61 = vld [vmem:[%s5169_s1 + $0x5c0] sm:$0xff] }
  0x43   :  { %761 = vmatmul.mubr.f32.gmra.mxu0 %v113_v63  ;;  %2292 = vmatpush3.msra.mxu1 %v245_v1  ;;  %v282_v62 = vld [vmem:[%s5169_s1 + $0x440] sm:$0xff]  ;;  %v329_v1 = vld [vmem:[%s5169_s1 + $0x5b8] sm:$0xff] }
  0x44   :  { %2248 = vmatpush3.msra.mxu0 %v213_v0  ;;  %845 = vmatprep.mubr.f32.mxu1 %v116_v2  ;;  %v314_v63 = vld [vmem:[%s5169_s1 + $0x540] sm:$0xff]  ;;  %v297_v0 = vld [vmem:[%s5169_s1 + $0x4b8] sm:$0xff] }
  0x45   :  { %2249 = vmatprep.subr.mxu0 %v228_v3  ;;  %2293 = vmatprep.subr.mxu1 %v260_v4  ;;  %v281_v2 = vld [vmem:[%s5169_s1 + $0x438] sm:$0xff]  ;;  %v296_v4 = vld [vmem:[%s5169_s1 + $0x4b0] sm:$0xff] }
  0x46   :  { %846 = vmatmul.mubr.f32.gmra.mxu1 %v115_v5  ;;  %2250 = vmatpush3.msra.mxu0 %v212_v6  ;;  %v313_v3 = vld [vmem:[%s5169_s1 + $0x538] sm:$0xff]  ;;  %v328_v5 = vld [vmem:[%s5169_s1 + $0x5b0] sm:$0xff] }
  0x47   :  { %2294 = vmatpush3.msra.mxu1 %v244_v7  ;;  %2251 = vmatprep.subr.mxu0 %v227_v8  ;;  %v280_v6 = vld [vmem:[%s5169_s1 + $0x430] sm:$0xff]  ;;  %v295_v8 = vld [vmem:[%s5169_s1 + $0x4a8] sm:$0xff] }
  0x48   :  { %2295 = vmatprep.subr.mxu1 %v259_v9  ;;  %2252 = vmatpush3.msra.mxu0 %v211_v10  ;;  %v312_v7 = vld [vmem:[%s5169_s1 + $0x530] sm:$0xff]  ;;  %v327_v9 = vld [vmem:[%s5169_s1 + $0x5a8] sm:$0xff] }
  0x49   :  { %2296 = vmatpush3.msra.mxu1 %v243_v11  ;;  %2253 = vmatprep.subr.mxu0 %v226_v12  ;;  %v279_v10 = vld [vmem:[%s5169_s1 + $0x428] sm:$0xff]  ;;  %v294_v12 = vld [vmem:[%s5169_s1 + $0x4a0] sm:$0xff] }
  0x4a   :  { %2297 = vmatprep.subr.mxu1 %v258_v13  ;;  %2254 = vmatpush3.msra.mxu0 %v210_v14  ;;  %v311_v11 = vld [vmem:[%s5169_s1 + $0x528] sm:$0xff]  ;;  %v326_v13 = vld [vmem:[%s5169_s1 + $0x5a0] sm:$0xff] }
  0x4b   :  { %915 = vmatprep.mubr.f32.mxu0 %v19_v15  ;;  %2298 = vmatpush3.msra.mxu1 %v242_v16  ;;  %v278_v14 = vld [vmem:[%s5169_s1 + $0x420] sm:$0xff]  ;;  %v293_v16 = vld [vmem:[%s5169_s1 + $0x498] sm:$0xff] }
  0x4c   :  { %1000 = vmatprep.mubr.f32.mxu1 %v21_v17  ;;  %916 = vmatmul.mubr.f32.vlgmr.msra.gmra.mxu0 %v18_v18  ;;  %v310_v15 = vld [vmem:[%s5169_s1 + $0x520] sm:$0xff]  ;;  %v325_v17 = vld [vmem:[%s5169_s1 + $0x598] sm:$0xff] }
  0x4d   :  { %1001 = vmatmul.mubr.f32.vlgmr.msra.gmra.mxu1 %v20_v19  ;;  %2311 = vmatprep.subr.mxu0 %v305_v20  ;;  %v277_v18 = vld [vmem:[%s5169_s1 + $0x418] sm:$0xff]  ;;  %v292_v20 = vld [vmem:[%s5169_s1 + $0x490] sm:$0xff] }
  0x4e   :  { %2355 = vmatprep.subr.mxu1 %v337_v21  ;;  %2312 = vmatpush3.msra.mxu0 %v289_v22  ;;  %v309_v19 = vld [vmem:[%s5169_s1 + $0x518] sm:$0xff]  ;;  %v324_v21 = vld [vmem:[%s5169_s1 + $0x590] sm:$0xff] }
  0x4f   :  { %2356 = vmatpush3.msra.mxu1 %v321_v23  ;;  %2313 = vmatprep.subr.mxu0 %v304_v24  ;;  %v276_v22 = vld [vmem:[%s5169_s1 + $0x410] sm:$0xff]  ;;  %v291_v24 = vld [vmem:[%s5169_s1 + $0x488] sm:$0xff] }
  0x50   :  { %2357 = vmatprep.subr.mxu1 %v336_v25  ;;  %920 = vmatprep.mubr.f32.mxu0 %v52_v26  ;;  %v308_v23 = vld [vmem:[%s5169_s1 + $0x510] sm:$0xff]  ;;  %v323_v25 = vld [vmem:[%s5169_s1 + $0x588] sm:$0xff] }
  0x51   :  { %2314 = vmatpush3.msra.mxu0 %v288_v27  ;;  %2358 = vmatpush3.msra.mxu1 %v320_v28  ;;  %v275_v26 = vld [vmem:[%s5169_s1 + $0x408] sm:$0xff]  ;;  %v290_v28 = vld [vmem:[%s5169_s1 + $0x480] sm:$0xff] }
  0x52   :  { %921 = vmatmul.mubr.f32.gmra.mxu0 %v51_v29  ;;  %2315 = vmatprep.subr.mxu0 %v303_v30  ;;  %v307_v27 = vld [vmem:[%s5169_s1 + $0x508] sm:$0xff]  ;;  %v322_v29 = vld [vmem:[%s5169_s1 + $0x580] sm:$0xff] }
  0x53   :  { %2359 = vmatprep.subr.mxu1 %v335_v31  ;;  %1005 = vmatprep.mubr.f32.mxu1 %v54_v32  ;;  %v274_v30 = vld [vmem:[%s5169_s1 + $0x400] sm:$0xff]  ;;  %v23_v31 = vld [vmem:[%s5170_s0 + $0x48] sm:$0xff] }
  0x54   :  { %2316 = vmatpush3.msra.mxu0 %v287_v33  ;;  %2360 = vmatpush3.msra.mxu1 %v319_v34  ;;  %v306_v32 = vld [vmem:[%s5169_s1 + $0x500] sm:$0xff]  ;;  %v25_v33 = vld [vmem:[%s5170_s0 + $0x58] sm:$0xff] }
  0x55   :  { %2317 = vmatprep.subr.mxu0 %v302_v35  ;;  %1006 = vmatmul.mubr.f32.gmra.mxu1 %v53_v36  ;;  %v22_v34 = vld [vmem:[%s5170_s0 + $0x40] sm:$0xff]  ;;  %v24_v35 = vld [vmem:[%s5170_s0 + $0x50] sm:$0xff]  ;;  %v369_v36 = vld [vmem:[%s5169_s1 + $0x6f8] sm:$0xff] }
  0x56   :  { %2361 = vmatprep.subr.mxu1 %v334_v37  ;;  %925 = vmatprep.mubr.f32.mxu0 %v85_v38  ;;  %v401_v37 = vld [vmem:[%s5169_s1 + $0x7f8] sm:$0xff] }
  0x57   :  { %2318 = vmatpush3.msra.mxu0 %v286_v39  ;;  %2362 = vmatpush3.msra.mxu1 %v318_v40  ;;  %v353_v38 = vld [vmem:[%s5169_s1 + $0x678] sm:$0xff]  ;;  %v368_v40 = vld [vmem:[%s5169_s1 + $0x6f0] sm:$0xff] }
  0x58   :  { %926 = vmatmul.mubr.f32.gmra.mxu0 %v84_v41  ;;  %2319 = vmatprep.subr.mxu0 %v301_v42  ;;  %v385_v39 = vld [vmem:[%s5169_s1 + $0x778] sm:$0xff]  ;;  %v400_v41 = vld [vmem:[%s5169_s1 + $0x7f0] sm:$0xff] }
  0x59   :  { %2363 = vmatprep.subr.mxu1 %v333_v43  ;;  %1010 = vmatprep.mubr.f32.mxu1 %v87_v44  ;;  %v56_v42 = vld [vmem:[%s5170_s0 + $0x150] sm:$0xff] }
  0x5a   :  { %2320 = vmatpush3.msra.mxu0 %v285_v45  ;;  %2364 = vmatpush3.msra.mxu1 %v317_v46  ;;  %v352_v43 = vld [vmem:[%s5169_s1 + $0x670] sm:$0xff]  ;;  %v55_v45 = vld [vmem:[%s5170_s0 + $0x148] sm:$0xff] }
  0x5b   :  { %2321 = vmatprep.subr.mxu0 %v300_v47  ;;  %1011 = vmatmul.mubr.f32.gmra.mxu1 %v86_v48  ;;  %v384_v44 = vld [vmem:[%s5169_s1 + $0x770] sm:$0xff]  ;;  %v367_v46 = vld [vmem:[%s5169_s1 + $0x6e8] sm:$0xff]  ;;  %v58_v48 = vld [vmem:[%s5170_s0 + $0x160] sm:$0xff] }
  0x5c   :  { %2365 = vmatprep.subr.mxu1 %v332_v49  ;;  %930 = vmatprep.mubr.f32.mxu0 %v118_v50  ;;  %v399_v47 = vld [vmem:[%s5169_s1 + $0x7e8] sm:$0xff] }
  0x5d   :  { %2322 = vmatpush3.msra.mxu0 %v284_v51  ;;  %2366 = vmatpush3.msra.mxu1 %v316_v52  ;;  %v351_v49 = vld [vmem:[%s5169_s1 + $0x668] sm:$0xff]  ;;  %v366_v51 = vld [vmem:[%s5169_s1 + $0x6e0] sm:$0xff]  ;;  %v57_v52 = vld [vmem:[%s5170_s0 + $0x158] sm:$0xff] }
  0x5e   :  { %931 = vmatmul.mubr.f32.gmra.mxu0 %v117_v53  ;;  %2323 = vmatprep.subr.mxu0 %v299_v54  ;;  %v383_v50 = vld [vmem:[%s5169_s1 + $0x768] sm:$0xff]  ;;  %v398_v53 = vld [vmem:[%s5169_s1 + $0x7e0] sm:$0xff]  ;;  %v89_v54 = vld [vmem:[%s5170_s0 + $0x258] sm:$0xff] }
  0x5f   :  { %2367 = vmatprep.subr.mxu1 %v331_v55  ;;  %1015 = vmatprep.mubr.f32.mxu1 %v120_v56  ;;  %v350_v55 = vld [vmem:[%s5169_s1 + $0x660] sm:$0xff] }
  0x60   :  { %2324 = vmatpush3.msra.mxu0 %v283_v57  ;;  %2368 = vmatpush3.msra.mxu1 %v315_v58  ;;  %v382_v56 = vld [vmem:[%s5169_s1 + $0x760] sm:$0xff]  ;;  %v88_v57 = vld [vmem:[%s5170_s0 + $0x250] sm:$0xff]  ;;  %v365_v58 = vld [vmem:[%s5169_s1 + $0x6d8] sm:$0xff] }
  0x61   :  { %2325 = vmatprep.subr.mxu0 %v298_v59  ;;  %1016 = vmatmul.mubr.f32.gmra.mxu1 %v119_v60  ;;  %v397_v59 = vld [vmem:[%s5169_s1 + $0x7d8] sm:$0xff]  ;;  %v91_v60 = vld [vmem:[%s5170_s0 + $0x268] sm:$0xff] }
  0x62   :  { %2369 = vmatprep.subr.mxu1 %v330_v61  ;;  %2326 = vmatpush3.msra.mxu0 %v282_v62  ;;  %v349_v61 = vld [vmem:[%s5169_s1 + $0x658] sm:$0xff] }
  0x63   :  { %2370 = vmatpush3.msra.mxu1 %v314_v63  ;;  %2327 = vmatprep.subr.mxu0 %v297_v0  ;;  %v381_v62 = vld [vmem:[%s5169_s1 + $0x758] sm:$0xff]  ;;  %v364_v63 = vld [vmem:[%s5169_s1 + $0x6d0] sm:$0xff]  ;;  %v90_v0 = vld [vmem:[%s5170_s0 + $0x260] sm:$0xff] }
  0x64   :  { %2371 = vmatprep.subr.mxu1 %v329_v1  ;;  %2328 = vmatpush3.msra.mxu0 %v281_v2  ;;  %v396_v1 = vld [vmem:[%s5169_s1 + $0x7d0] sm:$0xff]  ;;  %v122_v2 = vld [vmem:[%s5170_s0 + $0x360] sm:$0xff] }
  0x65   :  { %2372 = vmatpush3.msra.mxu1 %v313_v3  ;;  %2329 = vmatprep.subr.mxu0 %v296_v4  ;;  %v348_v3 = vld [vmem:[%s5169_s1 + $0x650] sm:$0xff] }
  0x66   :  { %2373 = vmatprep.subr.mxu1 %v328_v5  ;;  %2330 = vmatpush3.msra.mxu0 %v280_v6  ;;  %v380_v4 = vld [vmem:[%s5169_s1 + $0x750] sm:$0xff]  ;;  %v121_v5 = vld [vmem:[%s5170_s0 + $0x358] sm:$0xff]  ;;  %v363_v6 = vld [vmem:[%s5169_s1 + $0x6c8] sm:$0xff] }
  0x67   :  { %2374 = vmatpush3.msra.mxu1 %v312_v7  ;;  %2331 = vmatprep.subr.mxu0 %v295_v8  ;;  %v395_v7 = vld [vmem:[%s5169_s1 + $0x7c8] sm:$0xff]  ;;  %v124_v8 = vld [vmem:[%s5170_s0 + $0x370] sm:$0xff] }
  0x68   :  { %2375 = vmatprep.subr.mxu1 %v327_v9  ;;  %2332 = vmatpush3.msra.mxu0 %v279_v10  ;;  %v347_v9 = vld [vmem:[%s5169_s1 + $0x648] sm:$0xff] }
  0x69   :  { %2376 = vmatpush3.msra.mxu1 %v311_v11  ;;  %2333 = vmatprep.subr.mxu0 %v294_v12  ;;  %v379_v10 = vld [vmem:[%s5169_s1 + $0x748] sm:$0xff]  ;;  %v362_v11 = vld [vmem:[%s5169_s1 + $0x6c0] sm:$0xff] }
  0x6a   :  { %2377 = vmatprep.subr.mxu1 %v326_v13  ;;  %2334 = vmatpush3.msra.mxu0 %v278_v14  ;;  %v123_v12 = vld [vmem:[%s5170_s0 + $0x368] sm:$0xff]  ;;  %v394_v13 = vld [vmem:[%s5169_s1 + $0x7c0] sm:$0xff] }
  0x6b   :  { %2378 = vmatpush3.msra.mxu1 %v310_v15  ;;  %2335 = vmatprep.subr.mxu0 %v293_v16  ;;  %v346_v14 = vld [vmem:[%s5169_s1 + $0x640] sm:$0xff]  ;;  %v361_v16 = vld [vmem:[%s5169_s1 + $0x6b8] sm:$0xff] }
  0x6c   :  { %2379 = vmatprep.subr.mxu1 %v325_v17  ;;  %2336 = vmatpush3.msra.mxu0 %v277_v18  ;;  %v378_v15 = vld [vmem:[%s5169_s1 + $0x740] sm:$0xff]  ;;  %v393_v17 = vld [vmem:[%s5169_s1 + $0x7b8] sm:$0xff] }
  0x6d   :  { %2380 = vmatpush3.msra.mxu1 %v309_v19  ;;  %2337 = vmatprep.subr.mxu0 %v292_v20  ;;  %v345_v18 = vld [vmem:[%s5169_s1 + $0x638] sm:$0xff]  ;;  %v360_v20 = vld [vmem:[%s5169_s1 + $0x6b0] sm:$0xff] }
  0x6e   :  { %2381 = vmatprep.subr.mxu1 %v324_v21  ;;  %2338 = vmatpush3.msra.mxu0 %v276_v22  ;;  %v377_v19 = vld [vmem:[%s5169_s1 + $0x738] sm:$0xff]  ;;  %v392_v21 = vld [vmem:[%s5169_s1 + $0x7b0] sm:$0xff] }
  0x6f   :  { %2382 = vmatpush3.msra.mxu1 %v308_v23  ;;  %2339 = vmatprep.subr.mxu0 %v291_v24  ;;  %v344_v22 = vld [vmem:[%s5169_s1 + $0x630] sm:$0xff]  ;;  %v359_v24 = vld [vmem:[%s5169_s1 + $0x6a8] sm:$0xff] }
  0x70   :  { %2383 = vmatprep.subr.mxu1 %v323_v25  ;;  %2340 = vmatpush3.msra.mxu0 %v275_v26  ;;  %v376_v23 = vld [vmem:[%s5169_s1 + $0x730] sm:$0xff]  ;;  %v391_v25 = vld [vmem:[%s5169_s1 + $0x7a8] sm:$0xff] }
  0x71   :  { %2384 = vmatpush3.msra.mxu1 %v307_v27  ;;  %2341 = vmatprep.subr.mxu0 %v290_v28  ;;  %v343_v26 = vld [vmem:[%s5169_s1 + $0x628] sm:$0xff]  ;;  %v358_v28 = vld [vmem:[%s5169_s1 + $0x6a0] sm:$0xff] }
  0x72   :  { %2385 = vmatprep.subr.mxu1 %v322_v29  ;;  %2342 = vmatpush3.msra.mxu0 %v274_v30  ;;  %v375_v27 = vld [vmem:[%s5169_s1 + $0x728] sm:$0xff]  ;;  %v390_v29 = vld [vmem:[%s5169_s1 + $0x7a0] sm:$0xff] }
  0x73   :  { %1085 = vmatprep.mubr.f32.mxu0 %v23_v31  ;;  %2386 = vmatpush3.msra.mxu1 %v306_v32  ;;  %v342_v30 = vld [vmem:[%s5169_s1 + $0x620] sm:$0xff]  ;;  %v357_v32 = vld [vmem:[%s5169_s1 + $0x698] sm:$0xff] }
  0x74   :  { %1170 = vmatprep.mubr.f32.mxu1 %v25_v33  ;;  %1086 = vmatmul.mubr.f32.vlgmr.msra.gmra.mxu0 %v22_v34  ;;  %v374_v31 = vld [vmem:[%s5169_s1 + $0x720] sm:$0xff]  ;;  %v389_v33 = vld [vmem:[%s5169_s1 + $0x798] sm:$0xff] }
  0x75   :  { %1171 = vmatmul.mubr.f32.vlgmr.msra.gmra.mxu1 %v24_v35  ;;  %2399 = vmatprep.subr.mxu0 %v369_v36  ;;  %v341_v34 = vld [vmem:[%s5169_s1 + $0x618] sm:$0xff]  ;;  %v356_v36 = vld [vmem:[%s5169_s1 + $0x690] sm:$0xff] }
  0x76   :  { %2443 = vmatprep.subr.mxu1 %v401_v37  ;;  %2400 = vmatpush3.msra.mxu0 %v353_v38  ;;  %v373_v35 = vld [vmem:[%s5169_s1 + $0x718] sm:$0xff]  ;;  %v388_v37 = vld [vmem:[%s5169_s1 + $0x790] sm:$0xff] }
  0x77   :  { %2444 = vmatpush3.msra.mxu1 %v385_v39  ;;  %2401 = vmatprep.subr.mxu0 %v368_v40  ;;  %v340_v38 = vld [vmem:[%s5169_s1 + $0x610] sm:$0xff]  ;;  %v355_v40 = vld [vmem:[%s5169_s1 + $0x688] sm:$0xff] }
  0x78   :  { %2445 = vmatprep.subr.mxu1 %v400_v41  ;;  %1090 = vmatprep.mubr.f32.mxu0 %v56_v42  ;;  %v372_v39 = vld [vmem:[%s5169_s1 + $0x710] sm:$0xff]  ;;  %v387_v41 = vld [vmem:[%s5169_s1 + $0x788] sm:$0xff] }
  0x79   :  { %2402 = vmatpush3.msra.mxu0 %v352_v43  ;;  %2446 = vmatpush3.msra.mxu1 %v384_v44  ;;  %v339_v42 = vld [vmem:[%s5169_s1 + $0x608] sm:$0xff]  ;;  %v354_v44 = vld [vmem:[%s5169_s1 + $0x680] sm:$0xff] }
  0x7a   :  { %1091 = vmatmul.mubr.f32.gmra.mxu0 %v55_v45  ;;  %2403 = vmatprep.subr.mxu0 %v367_v46  ;;  %v371_v43 = vld [vmem:[%s5169_s1 + $0x708] sm:$0xff]  ;;  %v386_v45 = vld [vmem:[%s5169_s1 + $0x780] sm:$0xff] }
  0x7b   :  { %2447 = vmatprep.subr.mxu1 %v399_v47  ;;  %1175 = vmatprep.mubr.f32.mxu1 %v58_v48  ;;  %v338_v46 = vld [vmem:[%s5169_s1 + $0x600] sm:$0xff]  ;;  %v27_v47 = vld [vmem:[%s5170_s0 + $0x68] sm:$0xff] }
  0x7c   :  { %2404 = vmatpush3.msra.mxu0 %v351_v49  ;;  %2448 = vmatpush3.msra.mxu1 %v383_v50  ;;  %v370_v48 = vld [vmem:[%s5169_s1 + $0x700] sm:$0xff]  ;;  %v29_v49 = vld [vmem:[%s5170_s0 + $0x78] sm:$0xff] }
  0x7d   :  { %2405 = vmatprep.subr.mxu0 %v366_v51  ;;  %1176 = vmatmul.mubr.f32.gmra.mxu1 %v57_v52  ;;  %v26_v50 = vld [vmem:[%s5170_s0 + $0x60] sm:$0xff]  ;;  %v28_v51 = vld [vmem:[%s5170_s0 + $0x70] sm:$0xff]  ;;  %v433_v52 = vld [vmem:[%s5169_s1 + $0x8f8] sm:$0xff] }
  0x7e   :  { %2449 = vmatprep.subr.mxu1 %v398_v53  ;;  %1095 = vmatprep.mubr.f32.mxu0 %v89_v54  ;;  %v465_v53 = vld [vmem:[%s5169_s1 + $0x9f8] sm:$0xff] }
  0x7f   :  { %2406 = vmatpush3.msra.mxu0 %v350_v55  ;;  %2450 = vmatpush3.msra.mxu1 %v382_v56  ;;  %v417_v54 = vld [vmem:[%s5169_s1 + $0x878] sm:$0xff]  ;;  %v432_v56 = vld [vmem:[%s5169_s1 + $0x8f0] sm:$0xff] }
  0x80   :  { %1096 = vmatmul.mubr.f32.gmra.mxu0 %v88_v57  ;;  %2407 = vmatprep.subr.mxu0 %v365_v58  ;;  %v449_v55 = vld [vmem:[%s5169_s1 + $0x978] sm:$0xff]  ;;  %v464_v57 = vld [vmem:[%s5169_s1 + $0x9f0] sm:$0xff] }
  0x81   :  { %2451 = vmatprep.subr.mxu1 %v397_v59  ;;  %1180 = vmatprep.mubr.f32.mxu1 %v91_v60  ;;  %v60_v58 = vld [vmem:[%s5170_s0 + $0x170] sm:$0xff] }
  0x82   :  { %2408 = vmatpush3.msra.mxu0 %v349_v61  ;;  %2452 = vmatpush3.msra.mxu1 %v381_v62  ;;  %v416_v59 = vld [vmem:[%s5169_s1 + $0x870] sm:$0xff]  ;;  %v59_v61 = vld [vmem:[%s5170_s0 + $0x168] sm:$0xff] }
  0x83   :  { %2409 = vmatprep.subr.mxu0 %v364_v63  ;;  %1181 = vmatmul.mubr.f32.gmra.mxu1 %v90_v0  ;;  %v448_v60 = vld [vmem:[%s5169_s1 + $0x970] sm:$0xff]  ;;  %v431_v62 = vld [vmem:[%s5169_s1 + $0x8e8] sm:$0xff]  ;;  %v62_v0 = vld [vmem:[%s5170_s0 + $0x180] sm:$0xff] }
  0x84   :  { %2453 = vmatprep.subr.mxu1 %v396_v1  ;;  %1100 = vmatprep.mubr.f32.mxu0 %v122_v2  ;;  %v463_v63 = vld [vmem:[%s5169_s1 + $0x9e8] sm:$0xff] }
  0x85   :  { %2410 = vmatpush3.msra.mxu0 %v348_v3  ;;  %2454 = vmatpush3.msra.mxu1 %v380_v4  ;;  %v415_v1 = vld [vmem:[%s5169_s1 + $0x868] sm:$0xff]  ;;  %v430_v3 = vld [vmem:[%s5169_s1 + $0x8e0] sm:$0xff]  ;;  %v61_v4 = vld [vmem:[%s5170_s0 + $0x178] sm:$0xff] }
  0x86   :  { %1101 = vmatmul.mubr.f32.gmra.mxu0 %v121_v5  ;;  %2411 = vmatprep.subr.mxu0 %v363_v6  ;;  %v447_v2 = vld [vmem:[%s5169_s1 + $0x968] sm:$0xff]  ;;  %v462_v5 = vld [vmem:[%s5169_s1 + $0x9e0] sm:$0xff]  ;;  %v93_v6 = vld [vmem:[%s5170_s0 + $0x278] sm:$0xff] }
  0x87   :  { %2455 = vmatprep.subr.mxu1 %v395_v7  ;;  %1185 = vmatprep.mubr.f32.mxu1 %v124_v8  ;;  %v414_v7 = vld [vmem:[%s5169_s1 + $0x860] sm:$0xff] }
  0x88   :  { %2412 = vmatpush3.msra.mxu0 %v347_v9  ;;  %2456 = vmatpush3.msra.mxu1 %v379_v10  ;;  %v446_v8 = vld [vmem:[%s5169_s1 + $0x960] sm:$0xff]  ;;  %v92_v9 = vld [vmem:[%s5170_s0 + $0x270] sm:$0xff]  ;;  %v429_v10 = vld [vmem:[%s5169_s1 + $0x8d8] sm:$0xff] }
  0x89   :  { %2413 = vmatprep.subr.mxu0 %v362_v11  ;;  %1186 = vmatmul.mubr.f32.gmra.mxu1 %v123_v12  ;;  %v461_v11 = vld [vmem:[%s5169_s1 + $0x9d8] sm:$0xff]  ;;  %v95_v12 = vld [vmem:[%s5170_s0 + $0x288] sm:$0xff] }
  0x8a   :  { %2457 = vmatprep.subr.mxu1 %v394_v13  ;;  %2414 = vmatpush3.msra.mxu0 %v346_v14  ;;  %v413_v13 = vld [vmem:[%s5169_s1 + $0x858] sm:$0xff] }
  0x8b   :  { %2458 = vmatpush3.msra.mxu1 %v378_v15  ;;  %2415 = vmatprep.subr.mxu0 %v361_v16  ;;  %v445_v14 = vld [vmem:[%s5169_s1 + $0x958] sm:$0xff]  ;;  %v428_v15 = vld [vmem:[%s5169_s1 + $0x8d0] sm:$0xff]  ;;  %v94_v16 = vld [vmem:[%s5170_s0 + $0x280] sm:$0xff] }
  0x8c   :  { %2459 = vmatprep.subr.mxu1 %v393_v17  ;;  %2416 = vmatpush3.msra.mxu0 %v345_v18  ;;  %v460_v17 = vld [vmem:[%s5169_s1 + $0x9d0] sm:$0xff]  ;;  %v126_v18 = vld [vmem:[%s5170_s0 + $0x380] sm:$0xff] }
  0x8d   :  { %2460 = vmatpush3.msra.mxu1 %v377_v19  ;;  %2417 = vmatprep.subr.mxu0 %v360_v20  ;;  %v412_v19 = vld [vmem:[%s5169_s1 + $0x850] sm:$0xff] }
  0x8e   :  { %2461 = vmatprep.subr.mxu1 %v392_v21  ;;  %2418 = vmatpush3.msra.mxu0 %v344_v22  ;;  %v444_v20 = vld [vmem:[%s5169_s1 + $0x950] sm:$0xff]  ;;  %v125_v21 = vld [vmem:[%s5170_s0 + $0x378] sm:$0xff]  ;;  %v427_v22 = vld [vmem:[%s5169_s1 + $0x8c8] sm:$0xff] }
  0x8f   :  { %2462 = vmatpush3.msra.mxu1 %v376_v23  ;;  %2419 = vmatprep.subr.mxu0 %v359_v24  ;;  %v459_v23 = vld [vmem:[%s5169_s1 + $0x9c8] sm:$0xff]  ;;  %v128_v24 = vld [vmem:[%s5170_s0 + $0x390] sm:$0xff] }
  0x90   :  { %2463 = vmatprep.subr.mxu1 %v391_v25  ;;  %2420 = vmatpush3.msra.mxu0 %v343_v26  ;;  %v411_v25 = vld [vmem:[%s5169_s1 + $0x848] sm:$0xff] }
  0x91   :  { %2464 = vmatpush3.msra.mxu1 %v375_v27  ;;  %2421 = vmatprep.subr.mxu0 %v358_v28  ;;  %v443_v26 = vld [vmem:[%s5169_s1 + $0x948] sm:$0xff]  ;;  %v426_v27 = vld [vmem:[%s5169_s1 + $0x8c0] sm:$0xff] }
  0x92   :  { %2465 = vmatprep.subr.mxu1 %v390_v29  ;;  %2422 = vmatpush3.msra.mxu0 %v342_v30  ;;  %v127_v28 = vld [vmem:[%s5170_s0 + $0x388] sm:$0xff]  ;;  %v458_v29 = vld [vmem:[%s5169_s1 + $0x9c0] sm:$0xff] }
  0x93   :  { %2466 = vmatpush3.msra.mxu1 %v374_v31  ;;  %2423 = vmatprep.subr.mxu0 %v357_v32  ;;  %v410_v30 = vld [vmem:[%s5169_s1 + $0x840] sm:$0xff]  ;;  %v425_v32 = vld [vmem:[%s5169_s1 + $0x8b8] sm:$0xff] }
  0x94   :  { %2467 = vmatprep.subr.mxu1 %v389_v33  ;;  %2424 = vmatpush3.msra.mxu0 %v341_v34  ;;  %v442_v31 = vld [vmem:[%s5169_s1 + $0x940] sm:$0xff]  ;;  %v457_v33 = vld [vmem:[%s5169_s1 + $0x9b8] sm:$0xff] }
  0x95   :  { %2468 = vmatpush3.msra.mxu1 %v373_v35  ;;  %2425 = vmatprep.subr.mxu0 %v356_v36  ;;  %v409_v34 = vld [vmem:[%s5169_s1 + $0x838] sm:$0xff]  ;;  %v424_v36 = vld [vmem:[%s5169_s1 + $0x8b0] sm:$0xff] }
  0x96   :  { %2469 = vmatprep.subr.mxu1 %v388_v37  ;;  %2426 = vmatpush3.msra.mxu0 %v340_v38  ;;  %v441_v35 = vld [vmem:[%s5169_s1 + $0x938] sm:$0xff]  ;;  %v456_v37 = vld [vmem:[%s5169_s1 + $0x9b0] sm:$0xff] }
  0x97   :  { %2470 = vmatpush3.msra.mxu1 %v372_v39  ;;  %2427 = vmatprep.subr.mxu0 %v355_v40  ;;  %v408_v38 = vld [vmem:[%s5169_s1 + $0x830] sm:$0xff]  ;;  %v423_v40 = vld [vmem:[%s5169_s1 + $0x8a8] sm:$0xff] }
  0x98   :  { %2471 = vmatprep.subr.mxu1 %v387_v41  ;;  %2428 = vmatpush3.msra.mxu0 %v339_v42  ;;  %v440_v39 = vld [vmem:[%s5169_s1 + $0x930] sm:$0xff]  ;;  %v455_v41 = vld [vmem:[%s5169_s1 + $0x9a8] sm:$0xff] }
  0x99   :  { %2472 = vmatpush3.msra.mxu1 %v371_v43  ;;  %2429 = vmatprep.subr.mxu0 %v354_v44  ;;  %v407_v42 = vld [vmem:[%s5169_s1 + $0x828] sm:$0xff]  ;;  %v422_v44 = vld [vmem:[%s5169_s1 + $0x8a0] sm:$0xff] }
  0x9a   :  { %2473 = vmatprep.subr.mxu1 %v386_v45  ;;  %2430 = vmatpush3.msra.mxu0 %v338_v46  ;;  %v439_v43 = vld [vmem:[%s5169_s1 + $0x928] sm:$0xff]  ;;  %v454_v45 = vld [vmem:[%s5169_s1 + $0x9a0] sm:$0xff] }
  0x9b   :  { %1255 = vmatprep.mubr.f32.mxu0 %v27_v47  ;;  %2474 = vmatpush3.msra.mxu1 %v370_v48  ;;  %v406_v46 = vld [vmem:[%s5169_s1 + $0x820] sm:$0xff]  ;;  %v421_v48 = vld [vmem:[%s5169_s1 + $0x898] sm:$0xff] }
  0x9c   :  { %1340 = vmatprep.mubr.f32.mxu1 %v29_v49  ;;  %1256 = vmatmul.mubr.f32.vlgmr.msra.gmra.mxu0 %v26_v50  ;;  %v438_v47 = vld [vmem:[%s5169_s1 + $0x920] sm:$0xff]  ;;  %v453_v49 = vld [vmem:[%s5169_s1 + $0x998] sm:$0xff] }
  0x9d   :  { %1341 = vmatmul.mubr.f32.vlgmr.msra.gmra.mxu1 %v28_v51  ;;  %2487 = vmatprep.subr.mxu0 %v433_v52  ;;  %v405_v50 = vld [vmem:[%s5169_s1 + $0x818] sm:$0xff]  ;;  %v420_v52 = vld [vmem:[%s5169_s1 + $0x890] sm:$0xff] }
  0x9e   :  { %2531 = vmatprep.subr.mxu1 %v465_v53  ;;  %2488 = vmatpush3.msra.mxu0 %v417_v54  ;;  %v437_v51 = vld [vmem:[%s5169_s1 + $0x918] sm:$0xff]  ;;  %v452_v53 = vld [vmem:[%s5169_s1 + $0x990] sm:$0xff] }
  0x9f   :  { %2532 = vmatpush3.msra.mxu1 %v449_v55  ;;  %2489 = vmatprep.subr.mxu0 %v432_v56  ;;  %v404_v54 = vld [vmem:[%s5169_s1 + $0x810] sm:$0xff]  ;;  %v419_v56 = vld [vmem:[%s5169_s1 + $0x888] sm:$0xff] }
  0xa0   :  { %2533 = vmatprep.subr.mxu1 %v464_v57  ;;  %1260 = vmatprep.mubr.f32.mxu0 %v60_v58  ;;  %v436_v55 = vld [vmem:[%s5169_s1 + $0x910] sm:$0xff]  ;;  %v451_v57 = vld [vmem:[%s5169_s1 + $0x988] sm:$0xff] }
  0xa1   :  { %2490 = vmatpush3.msra.mxu0 %v416_v59  ;;  %2534 = vmatpush3.msra.mxu1 %v448_v60  ;;  %v403_v58 = vld [vmem:[%s5169_s1 + $0x808] sm:$0xff]  ;;  %v418_v60 = vld [vmem:[%s5169_s1 + $0x880] sm:$0xff] }
  0xa2   :  { %1261 = vmatmul.mubr.f32.gmra.mxu0 %v59_v61  ;;  %2491 = vmatprep.subr.mxu0 %v431_v62  ;;  %v435_v59 = vld [vmem:[%s5169_s1 + $0x908] sm:$0xff]  ;;  %v450_v61 = vld [vmem:[%s5169_s1 + $0x980] sm:$0xff] }
  0xa3   :  { %2535 = vmatprep.subr.mxu1 %v463_v63  ;;  %1345 = vmatprep.mubr.f32.mxu1 %v62_v0  ;;  %v402_v62 = vld [vmem:[%s5169_s1 + $0x800] sm:$0xff]  ;;  %v31_v63 = vld [vmem:[%s5170_s0 + $0x88] sm:$0xff] }
  0xa4   :  { %2492 = vmatpush3.msra.mxu0 %v415_v1  ;;  %2536 = vmatpush3.msra.mxu1 %v447_v2  ;;  %v434_v0 = vld [vmem:[%s5169_s1 + $0x900] sm:$0xff]  ;;  %v33_v1 = vld [vmem:[%s5170_s0 + $0x98] sm:$0xff] }
  0xa5   :  { %2493 = vmatprep.subr.mxu0 %v430_v3  ;;  %1346 = vmatmul.mubr.f32.gmra.mxu1 %v61_v4  ;;  %v30_v2 = vld [vmem:[%s5170_s0 + $0x80] sm:$0xff]  ;;  %v32_v3 = vld [vmem:[%s5170_s0 + $0x90] sm:$0xff]  ;;  %v497_v4 = vld [vmem:[%s5169_s1 + $0xaf8] sm:$0xff] }
  0xa6   :  { %2537 = vmatprep.subr.mxu1 %v462_v5  ;;  %1265 = vmatprep.mubr.f32.mxu0 %v93_v6  ;;  %v529_v5 = vld [vmem:[%s5169_s1 + $0xbf8] sm:$0xff] }
  0xa7   :  { %2494 = vmatpush3.msra.mxu0 %v414_v7  ;;  %2538 = vmatpush3.msra.mxu1 %v446_v8  ;;  %v481_v6 = vld [vmem:[%s5169_s1 + $0xa78] sm:$0xff]  ;;  %v496_v8 = vld [vmem:[%s5169_s1 + $0xaf0] sm:$0xff] }
  0xa8   :  { %1266 = vmatmul.mubr.f32.gmra.mxu0 %v92_v9  ;;  %2495 = vmatprep.subr.mxu0 %v429_v10  ;;  %v513_v7 = vld [vmem:[%s5169_s1 + $0xb78] sm:$0xff]  ;;  %v528_v9 = vld [vmem:[%s5169_s1 + $0xbf0] sm:$0xff] }
  0xa9   :  { %2539 = vmatprep.subr.mxu1 %v461_v11  ;;  %1350 = vmatprep.mubr.f32.mxu1 %v95_v12  ;;  %v64_v10 = vld [vmem:[%s5170_s0 + $0x190] sm:$0xff] }
  0xaa   :  { %2496 = vmatpush3.msra.mxu0 %v413_v13  ;;  %2540 = vmatpush3.msra.mxu1 %v445_v14  ;;  %v480_v11 = vld [vmem:[%s5169_s1 + $0xa70] sm:$0xff]  ;;  %v63_v13 = vld [vmem:[%s5170_s0 + $0x188] sm:$0xff] }
  0xab   :  { %2497 = vmatprep.subr.mxu0 %v428_v15  ;;  %1351 = vmatmul.mubr.f32.gmra.mxu1 %v94_v16  ;;  %v512_v12 = vld [vmem:[%s5169_s1 + $0xb70] sm:$0xff]  ;;  %v495_v14 = vld [vmem:[%s5169_s1 + $0xae8] sm:$0xff]  ;;  %v66_v16 = vld [vmem:[%s5170_s0 + $0x1a0] sm:$0xff] }
  0xac   :  { %2541 = vmatprep.subr.mxu1 %v460_v17  ;;  %1270 = vmatprep.mubr.f32.mxu0 %v126_v18  ;;  %v527_v15 = vld [vmem:[%s5169_s1 + $0xbe8] sm:$0xff] }
  0xad   :  { %2498 = vmatpush3.msra.mxu0 %v412_v19  ;;  %2542 = vmatpush3.msra.mxu1 %v444_v20  ;;  %v479_v17 = vld [vmem:[%s5169_s1 + $0xa68] sm:$0xff]  ;;  %v494_v19 = vld [vmem:[%s5169_s1 + $0xae0] sm:$0xff]  ;;  %v65_v20 = vld [vmem:[%s5170_s0 + $0x198] sm:$0xff] }
  0xae   :  { %1271 = vmatmul.mubr.f32.gmra.mxu0 %v125_v21  ;;  %2499 = vmatprep.subr.mxu0 %v427_v22  ;;  %v511_v18 = vld [vmem:[%s5169_s1 + $0xb68] sm:$0xff]  ;;  %v526_v21 = vld [vmem:[%s5169_s1 + $0xbe0] sm:$0xff]  ;;  %v97_v22 = vld [vmem:[%s5170_s0 + $0x298] sm:$0xff] }
  0xaf   :  { %2543 = vmatprep.subr.mxu1 %v459_v23  ;;  %1355 = vmatprep.mubr.f32.mxu1 %v128_v24  ;;  %v478_v23 = vld [vmem:[%s5169_s1 + $0xa60] sm:$0xff] }
  0xb0   :  { %2500 = vmatpush3.msra.mxu0 %v411_v25  ;;  %2544 = vmatpush3.msra.mxu1 %v443_v26  ;;  %v510_v24 = vld [vmem:[%s5169_s1 + $0xb60] sm:$0xff]  ;;  %v96_v25 = vld [vmem:[%s5170_s0 + $0x290] sm:$0xff]  ;;  %v493_v26 = vld [vmem:[%s5169_s1 + $0xad8] sm:$0xff] }
  0xb1   :  { %2501 = vmatprep.subr.mxu0 %v426_v27  ;;  %1356 = vmatmul.mubr.f32.gmra.mxu1 %v127_v28  ;;  %v525_v27 = vld [vmem:[%s5169_s1 + $0xbd8] sm:$0xff]  ;;  %v99_v28 = vld [vmem:[%s5170_s0 + $0x2a8] sm:$0xff] }
  0xb2   :  { %2545 = vmatprep.subr.mxu1 %v458_v29  ;;  %2502 = vmatpush3.msra.mxu0 %v410_v30  ;;  %v477_v29 = vld [vmem:[%s5169_s1 + $0xa58] sm:$0xff] }
  0xb3   :  { %2546 = vmatpush3.msra.mxu1 %v442_v31  ;;  %2503 = vmatprep.subr.mxu0 %v425_v32  ;;  %v509_v30 = vld [vmem:[%s5169_s1 + $0xb58] sm:$0xff]  ;;  %v492_v31 = vld [vmem:[%s5169_s1 + $0xad0] sm:$0xff]  ;;  %v98_v32 = vld [vmem:[%s5170_s0 + $0x2a0] sm:$0xff] }
  0xb4   :  { %2547 = vmatprep.subr.mxu1 %v457_v33  ;;  %2504 = vmatpush3.msra.mxu0 %v409_v34  ;;  %v524_v33 = vld [vmem:[%s5169_s1 + $0xbd0] sm:$0xff]  ;;  %v130_v34 = vld [vmem:[%s5170_s0 + $0x3a0] sm:$0xff] }
  0xb5   :  { %2548 = vmatpush3.msra.mxu1 %v441_v35  ;;  %2505 = vmatprep.subr.mxu0 %v424_v36  ;;  %v476_v35 = vld [vmem:[%s5169_s1 + $0xa50] sm:$0xff] }
  0xb6   :  { %2549 = vmatprep.subr.mxu1 %v456_v37  ;;  %2506 = vmatpush3.msra.mxu0 %v408_v38  ;;  %v508_v36 = vld [vmem:[%s5169_s1 + $0xb50] sm:$0xff]  ;;  %v129_v37 = vld [vmem:[%s5170_s0 + $0x398] sm:$0xff]  ;;  %v491_v38 = vld [vmem:[%s5169_s1 + $0xac8] sm:$0xff] }
  0xb7   :  { %2550 = vmatpush3.msra.mxu1 %v440_v39  ;;  %2507 = vmatprep.subr.mxu0 %v423_v40  ;;  %v523_v39 = vld [vmem:[%s5169_s1 + $0xbc8] sm:$0xff]  ;;  %v132_v40 = vld [vmem:[%s5170_s0 + $0x3b0] sm:$0xff] }
  0xb8   :  { %2551 = vmatprep.subr.mxu1 %v455_v41  ;;  %2508 = vmatpush3.msra.mxu0 %v407_v42  ;;  %v475_v41 = vld [vmem:[%s5169_s1 + $0xa48] sm:$0xff] }
  0xb9   :  { %2552 = vmatpush3.msra.mxu1 %v439_v43  ;;  %2509 = vmatprep.subr.mxu0 %v422_v44  ;;  %v507_v42 = vld [vmem:[%s5169_s1 + $0xb48] sm:$0xff]  ;;  %v490_v43 = vld [vmem:[%s5169_s1 + $0xac0] sm:$0xff] }
  0xba   :  { %2553 = vmatprep.subr.mxu1 %v454_v45  ;;  %2510 = vmatpush3.msra.mxu0 %v406_v46  ;;  %v131_v44 = vld [vmem:[%s5170_s0 + $0x3a8] sm:$0xff]  ;;  %v522_v45 = vld [vmem:[%s5169_s1 + $0xbc0] sm:$0xff] }
  0xbb   :  { %2554 = vmatpush3.msra.mxu1 %v438_v47  ;;  %2511 = vmatprep.subr.mxu0 %v421_v48  ;;  %v474_v46 = vld [vmem:[%s5169_s1 + $0xa40] sm:$0xff]  ;;  %v489_v48 = vld [vmem:[%s5169_s1 + $0xab8] sm:$0xff] }
  0xbc   :  { %2555 = vmatprep.subr.mxu1 %v453_v49  ;;  %2512 = vmatpush3.msra.mxu0 %v405_v50  ;;  %v506_v47 = vld [vmem:[%s5169_s1 + $0xb40] sm:$0xff]  ;;  %v521_v49 = vld [vmem:[%s5169_s1 + $0xbb8] sm:$0xff] }
  0xbd   :  { %2556 = vmatpush3.msra.mxu1 %v437_v51  ;;  %2513 = vmatprep.subr.mxu0 %v420_v52  ;;  %v473_v50 = vld [vmem:[%s5169_s1 + $0xa38] sm:$0xff]  ;;  %v488_v52 = vld [vmem:[%s5169_s1 + $0xab0] sm:$0xff] }
  0xbe   :  { %2557 = vmatprep.subr.mxu1 %v452_v53  ;;  %2514 = vmatpush3.msra.mxu0 %v404_v54  ;;  %v505_v51 = vld [vmem:[%s5169_s1 + $0xb38] sm:$0xff]  ;;  %v520_v53 = vld [vmem:[%s5169_s1 + $0xbb0] sm:$0xff] }
  0xbf   :  { %2558 = vmatpush3.msra.mxu1 %v436_v55  ;;  %2515 = vmatprep.subr.mxu0 %v419_v56  ;;  %v472_v54 = vld [vmem:[%s5169_s1 + $0xa30] sm:$0xff]  ;;  %v487_v56 = vld [vmem:[%s5169_s1 + $0xaa8] sm:$0xff] }
  0xc0   :  { %2559 = vmatprep.subr.mxu1 %v451_v57  ;;  %2516 = vmatpush3.msra.mxu0 %v403_v58  ;;  %v504_v55 = vld [vmem:[%s5169_s1 + $0xb30] sm:$0xff]  ;;  %v519_v57 = vld [vmem:[%s5169_s1 + $0xba8] sm:$0xff] }
  0xc1   :  { %2560 = vmatpush3.msra.mxu1 %v435_v59  ;;  %2517 = vmatprep.subr.mxu0 %v418_v60  ;;  %v471_v58 = vld [vmem:[%s5169_s1 + $0xa28] sm:$0xff]  ;;  %v486_v60 = vld [vmem:[%s5169_s1 + $0xaa0] sm:$0xff] }
  0xc2   :  { %2561 = vmatprep.subr.mxu1 %v450_v61  ;;  %2518 = vmatpush3.msra.mxu0 %v402_v62  ;;  %v503_v59 = vld [vmem:[%s5169_s1 + $0xb28] sm:$0xff]  ;;  %v518_v61 = vld [vmem:[%s5169_s1 + $0xba0] sm:$0xff] }
  0xc3   :  { %1425 = vmatprep.mubr.f32.mxu0 %v31_v63  ;;  %2562 = vmatpush3.msra.mxu1 %v434_v0  ;;  %v470_v62 = vld [vmem:[%s5169_s1 + $0xa20] sm:$0xff]  ;;  %v485_v0 = vld [vmem:[%s5169_s1 + $0xa98] sm:$0xff] }
  0xc4   :  { %1510 = vmatprep.mubr.f32.mxu1 %v33_v1  ;;  %1426 = vmatmul.mubr.f32.vlgmr.msra.gmra.mxu0 %v30_v2  ;;  %v502_v63 = vld [vmem:[%s5169_s1 + $0xb20] sm:$0xff]  ;;  %v517_v1 = vld [vmem:[%s5169_s1 + $0xb98] sm:$0xff] }
  0xc5   :  { %1511 = vmatmul.mubr.f32.vlgmr.msra.gmra.mxu1 %v32_v3  ;;  %2575 = vmatprep.subr.mxu0 %v497_v4  ;;  %v469_v2 = vld [vmem:[%s5169_s1 + $0xa18] sm:$0xff]  ;;  %v484_v4 = vld [vmem:[%s5169_s1 + $0xa90] sm:$0xff] }
  0xc6   :  { %2619 = vmatprep.subr.mxu1 %v529_v5  ;;  %2576 = vmatpush3.msra.mxu0 %v481_v6  ;;  %v501_v3 = vld [vmem:[%s5169_s1 + $0xb18] sm:$0xff]  ;;  %v516_v5 = vld [vmem:[%s5169_s1 + $0xb90] sm:$0xff] }
  0xc7   :  { %2620 = vmatpush3.msra.mxu1 %v513_v7  ;;  %2577 = vmatprep.subr.mxu0 %v496_v8  ;;  %v468_v6 = vld [vmem:[%s5169_s1 + $0xa10] sm:$0xff]  ;;  %v483_v8 = vld [vmem:[%s5169_s1 + $0xa88] sm:$0xff] }
  0xc8   :  { %2621 = vmatprep.subr.mxu1 %v528_v9  ;;  %1430 = vmatprep.mubr.f32.mxu0 %v64_v10  ;;  %v500_v7 = vld [vmem:[%s5169_s1 + $0xb10] sm:$0xff]  ;;  %v515_v9 = vld [vmem:[%s5169_s1 + $0xb88] sm:$0xff] }
  0xc9   :  { %2578 = vmatpush3.msra.mxu0 %v480_v11  ;;  %2622 = vmatpush3.msra.mxu1 %v512_v12  ;;  %v467_v12 = vld [vmem:[%s5169_s1 + $0xa08] sm:$0xff] }
  0xca   :  { %1431 = vmatmul.mubr.f32.gmra.mxu0 %v63_v13  ;;  %2579 = vmatprep.subr.mxu0 %v495_v14  ;;  %v499_v13 = vld [vmem:[%s5169_s1 + $0xb08] sm:$0xff]  ;;  %v482_v14 = vld [vmem:[%s5169_s1 + $0xa80] sm:$0xff] }
  0xcb   :  { %2623 = vmatprep.subr.mxu1 %v527_v15  ;;  %1515 = vmatprep.mubr.f32.mxu1 %v66_v16  ;;  %v514_v15 = vld [vmem:[%s5169_s1 + $0xb80] sm:$0xff] }
  0xcc   :  { %2580 = vmatpush3.msra.mxu0 %v479_v17  ;;  %2624 = vmatpush3.msra.mxu1 %v511_v18  ;;  %v4338_v16 = vld [vmem:[%s5171_s2] ss:$0 sm:$0xff] }
  0xcd   :  { %2581 = vmatprep.subr.mxu0 %v494_v19  ;;  %1516 = vmatmul.mubr.f32.gmra.mxu1 %v65_v20  ;;  %v466_v19 = vld [vmem:[%s5169_s1 + $0xa00] sm:$0xff]  ;;  %v35_v20 = vld [vmem:[%s5170_s0 + $0xa8] sm:$0xff] }
  0xce   :  { %2625 = vmatprep.subr.mxu1 %v526_v21  ;;  %1435 = vmatprep.mubr.f32.mxu0 %v97_v22 }
  0xcf   :  { %2582 = vmatpush3.msra.mxu0 %v478_v23  ;;  %2626 = vmatpush3.msra.mxu1 %v510_v24  ;;  %v498_v23 = vld [vmem:[%s5169_s1 + $0xb00] sm:$0xff]  ;;  %v37_v24 = vld [vmem:[%s5170_s0 + $0xb8] sm:$0xff] }
  0xd0   :  { %1436 = vmatmul.mubr.f32.gmra.mxu0 %v96_v25  ;;  %2583 = vmatprep.subr.mxu0 %v493_v26  ;;  %v34_v25 = vld [vmem:[%s5170_s0 + $0xa0] sm:$0xff]  ;;  %v36_v26 = vld [vmem:[%s5170_s0 + $0xb0] sm:$0xff] }
  0xd1   :  { %2627 = vmatprep.subr.mxu1 %v525_v27  ;;  %1520 = vmatprep.mubr.f32.mxu1 %v99_v28  ;;  %v561_v28 = vld [vmem:[%s5169_s1 + $0xcf8] sm:$0xff] }
  0xd2   :  { %2584 = vmatpush3.msra.mxu0 %v477_v29  ;;  %2628 = vmatpush3.msra.mxu1 %v509_v30  ;;  %v593_v29 = vld [vmem:[%s5169_s1 + $0xdf8] sm:$0xff] }
  0xd3   :  { %2585 = vmatprep.subr.mxu0 %v492_v31  ;;  %1521 = vmatmul.mubr.f32.gmra.mxu1 %v98_v32  ;;  %v545_v30 = vld [vmem:[%s5169_s1 + $0xc78] sm:$0xff] }
  0xd4   :  { %2629 = vmatprep.subr.mxu1 %v524_v33  ;;  %1440 = vmatprep.mubr.f32.mxu0 %v130_v34  ;;  %v577_v31 = vld [vmem:[%s5169_s1 + $0xd78] sm:$0xff]  ;;  %v560_v33 = vld [vmem:[%s5169_s1 + $0xcf0] sm:$0xff] }
  0xd5   :  { %2586 = vmatpush3.msra.mxu0 %v476_v35  ;;  %2630 = vmatpush3.msra.mxu1 %v508_v36  ;;  %v592_v34 = vld [vmem:[%s5169_s1 + $0xdf0] sm:$0xff] }
  0xd6   :  { %1441 = vmatmul.mubr.f32.gmra.mxu0 %v129_v37  ;;  %2587 = vmatprep.subr.mxu0 %v491_v38  ;;  %v68_v35 = vld [vmem:[%s5170_s0 + $0x1b0] sm:$0xff]  ;;  %v67_v38 = vld [vmem:[%s5170_s0 + $0x1a8] sm:$0xff] }
  0xd7   :  { %2631 = vmatprep.subr.mxu1 %v523_v39  ;;  %1525 = vmatprep.mubr.f32.mxu1 %v132_v40  ;;  %v544_v36 = vld [vmem:[%s5169_s1 + $0xc70] sm:$0xff]  ;;  %v559_v39 = vld [vmem:[%s5169_s1 + $0xce8] sm:$0xff] }
  0xd8   :  { %2588 = vmatpush3.msra.mxu0 %v475_v41  ;;  %2632 = vmatpush3.msra.mxu1 %v507_v42  ;;  %v576_v37 = vld [vmem:[%s5169_s1 + $0xd70] sm:$0xff]  ;;  %v591_v40 = vld [vmem:[%s5169_s1 + $0xde8] sm:$0xff]  ;;  %v70_v41 = vld [vmem:[%s5170_s0 + $0x1c0] sm:$0xff] }
  0xd9   :  { %2589 = vmatprep.subr.mxu0 %v490_v43  ;;  %1526 = vmatmul.mubr.f32.gmra.mxu1 %v131_v44  ;;  %v543_v42 = vld [vmem:[%s5169_s1 + $0xc68] sm:$0xff]  ;;  %v558_v44 = vld [vmem:[%s5169_s1 + $0xce0] sm:$0xff] }
  0xda   :  { %2633 = vmatprep.subr.mxu1 %v522_v45  ;;  %2590 = vmatpush3.msra.mxu0 %v474_v46  ;;  %v575_v43 = vld [vmem:[%s5169_s1 + $0xd68] sm:$0xff]  ;;  %v69_v45 = vld [vmem:[%s5170_s0 + $0x1b8] sm:$0xff]  ;;  %v590_v46 = vld [vmem:[%s5169_s1 + $0xde0] sm:$0xff] }
  0xdb   :  { %2634 = vmatpush3.msra.mxu1 %v506_v47  ;;  %2591 = vmatprep.subr.mxu0 %v489_v48  ;;  %v101_v47 = vld [vmem:[%s5170_s0 + $0x2b8] sm:$0xff]  ;;  %v542_v48 = vld [vmem:[%s5169_s1 + $0xc60] sm:$0xff] }
  0xdc   :  { %2635 = vmatprep.subr.mxu1 %v521_v49  ;;  %2592 = vmatpush3.msra.mxu0 %v473_v50  ;;  %v574_v49 = vld [vmem:[%s5169_s1 + $0xd60] sm:$0xff]  ;;  %v100_v50 = vld [vmem:[%s5170_s0 + $0x2b0] sm:$0xff] }
  0xdd   :  { %2636 = vmatpush3.msra.mxu1 %v505_v51  ;;  %2593 = vmatprep.subr.mxu0 %v488_v52  ;;  %v557_v51 = vld [vmem:[%s5169_s1 + $0xcd8] sm:$0xff] }
  0xde   :  { %2637 = vmatprep.subr.mxu1 %v520_v53  ;;  %2594 = vmatpush3.msra.mxu0 %v472_v54  ;;  %v589_v52 = vld [vmem:[%s5169_s1 + $0xdd8] sm:$0xff]  ;;  %v103_v53 = vld [vmem:[%s5170_s0 + $0x2c8] sm:$0xff] }
  0xdf   :  { %2638 = vmatpush3.msra.mxu1 %v504_v55  ;;  %2595 = vmatprep.subr.mxu0 %v487_v56  ;;  %v541_v54 = vld [vmem:[%s5169_s1 + $0xc58] sm:$0xff] }
  0xe0   :  { %2639 = vmatprep.subr.mxu1 %v519_v57  ;;  %2596 = vmatpush3.msra.mxu0 %v471_v58  ;;  %v573_v56 = vld [vmem:[%s5169_s1 + $0xd58] sm:$0xff]  ;;  %v556_v57 = vld [vmem:[%s5169_s1 + $0xcd0] sm:$0xff]  ;;  %v102_v58 = vld [vmem:[%s5170_s0 + $0x2c0] sm:$0xff] }
  0xe1   :  { %2640 = vmatpush3.msra.mxu1 %v503_v59  ;;  %2597 = vmatprep.subr.mxu0 %v486_v60  ;;  %v588_v59 = vld [vmem:[%s5169_s1 + $0xdd0] sm:$0xff] }
  0xe2   :  { %2641 = vmatprep.subr.mxu1 %v518_v61  ;;  %2598 = vmatpush3.msra.mxu0 %v470_v62  ;;  %v134_v61 = vld [vmem:[%s5170_s0 + $0x3c0] sm:$0xff]  ;;  %v540_v62 = vld [vmem:[%s5169_s1 + $0xc50] sm:$0xff] }
  0xe3   :  { %2642 = vmatpush3.msra.mxu1 %v502_v63  ;;  %2599 = vmatprep.subr.mxu0 %v485_v0 }
  0xe4   :  { %2643 = vmatprep.subr.mxu1 %v517_v1  ;;  %2600 = vmatpush3.msra.mxu0 %v469_v2  ;;  %v2167_v10 = vpop.f32.mrf.mxu0  ;;  %v572_v1 = vld [vmem:[%s5169_s1 + $0xd50] sm:$0xff]  ;;  %v133_v2 = vld [vmem:[%s5170_s0 + $0x3b8] sm:$0xff] }
  0xe5   :  { %2644 = vmatpush3.msra.mxu1 %v501_v3  ;;  %v2211_v11 = vpop.f32.mrf.mxu1  ;;  %2601 = vmatprep.subr.mxu0 %v484_v4  ;;  %v555_v3 = vld [vmem:[%s5169_s1 + $0xcc8] sm:$0xff] }
  0xe6   :  { %2645 = vmatprep.subr.mxu1 %v516_v5  ;;  %2602 = vmatpush3.msra.mxu0 %v468_v6  ;;  %v2168_v17 = vpop.f32.mrf.mxu0  ;;  %v587_v4 = vld [vmem:[%s5169_s1 + $0xdc8] sm:$0xff] }
  0xe7   :  { %2646 = vmatpush3.msra.mxu1 %v500_v7  ;;  %v2212_v18 = vpop.f32.mrf.mxu1  ;;  %2603 = vmatprep.subr.mxu0 %v483_v8  ;;  %v2169_v21 = vadd.f32 %v2168_v17, %v2167_v10  ;;  %v136_v7 = vld [vmem:[%s5170_s0 + $0x3d0] sm:$0xff]  ;;  %v539_v8 = vld [vmem:[%s5169_s1 + $0xc48] sm:$0xff] }
  0xe8   :  { %2647 = vmatprep.subr.mxu1 %v515_v9  ;;  %v2213_v22 = vadd.f32 %v2212_v18, %v2211_v11  ;;  %2604 = vmatpush3.msra.mxu0 %v467_v12  ;;  %v571_v11 = vld [vmem:[%s5169_s1 + $0xd48] sm:$0xff]  ;;  %v554_v12 = vld [vmem:[%s5169_s1 + $0xcc0] sm:$0xff] }
  0xe9   :  { %2648 = vmatpush3.msra.mxu1 %v499_v13  ;;  %2605 = vmatprep.subr.mxu0 %v482_v14  ;;  %v748_v27 = vadd.f32 %v2169_v21, %v4338_v16  ;;  %v135_v13 = vld [vmem:[%s5170_s0 + $0x3c8] sm:$0xff]  ;;  %v586_v14 = vld [vmem:[%s5169_s1 + $0xdc0] sm:$0xff] }
  0xea   :  { %2649 = vmatprep.subr.mxu1 %v514_v15  ;;  %2606 = vmatpush3.msra.mxu0 %v466_v19  ;;  %v538_v18 = vld [vmem:[%s5169_s1 + $0xc40] sm:$0xff] }
  0xeb   :  { %1595 = vmatprep.mubr.f32.mxu0 %v35_v20  ;;  %2650 = vmatpush3.msra.mxu1 %v498_v23  ;;  %v4371_v32 = vadd.f32 %v2213_v22, %v748_v27  ;;  %v570_v19 = vld [vmem:[%s5169_s1 + $0xd40] sm:$0xff]  ;;  %v553_v22 = vld [vmem:[%s5169_s1 + $0xcb8] sm:$0xff] }
  0xec   :  { %1680 = vmatprep.mubr.f32.mxu1 %v37_v24  ;;  %1596 = vmatmul.mubr.f32.vlgmr.msra.gmra.mxu0 %v34_v25  ;;  %v585_v23 = vld [vmem:[%s5169_s1 + $0xdb8] sm:$0xff] }
  0xed   :  { %1681 = vmatmul.mubr.f32.vlgmr.msra.gmra.mxu1 %v36_v26  ;;  %2663 = vmatprep.subr.mxu0 %v561_v28  ;;  %v537_v24 = vld [vmem:[%s5169_s1 + $0xc38] sm:$0xff]  ;;  %v552_v28 = vld [vmem:[%s5169_s1 + $0xcb0] sm:$0xff] }
  0xee   :  { %2707 = vmatprep.subr.mxu1 %v593_v29  ;;  %2664 = vmatpush3.msra.mxu0 %v545_v30  ;;  %v569_v25 = vld [vmem:[%s5169_s1 + $0xd38] sm:$0xff]  ;;  %v584_v29 = vld [vmem:[%s5169_s1 + $0xdb0] sm:$0xff] }
  0xef   :  { %2708 = vmatpush3.msra.mxu1 %v577_v31  ;;  %2665 = vmatprep.subr.mxu0 %v560_v33  ;;  %v536_v33 = vld [vmem:[%s5169_s1 + $0xc30] sm:$0xff] }
  0xf0   :  { %2709 = vmatprep.subr.mxu1 %v592_v34  ;;  %1600 = vmatprep.mubr.f32.mxu0 %v68_v35  ;;  %v568_v34 = vld [vmem:[%s5169_s1 + $0xd30] sm:$0xff]  ;;  %v551_v35 = vld [vmem:[%s5169_s1 + $0xca8] sm:$0xff] }
  0xf1   :  { %2666 = vmatpush3.msra.mxu0 %v544_v36  ;;  %2710 = vmatpush3.msra.mxu1 %v576_v37  ;;  %v583_v36 = vld [vmem:[%s5169_s1 + $0xda8] sm:$0xff] }
  0xf2   :  { %1601 = vmatmul.mubr.f32.gmra.mxu0 %v67_v38  ;;  %2667 = vmatprep.subr.mxu0 %v559_v39  ;;  %v535_v39 = vld [vmem:[%s5169_s1 + $0xc28] sm:$0xff] }
  0xf3   :  { %2711 = vmatprep.subr.mxu1 %v591_v40  ;;  %1685 = vmatprep.mubr.f32.mxu1 %v70_v41  ;;  %v567_v40 = vld [vmem:[%s5169_s1 + $0xd28] sm:$0xff] }
  0xf4   :  { %2668 = vmatpush3.msra.mxu0 %v543_v42  ;;  %2712 = vmatpush3.msra.mxu1 %v575_v43  ;;  %v550_v43 = vld [vmem:[%s5169_s1 + $0xca0] sm:$0xff] }
  0xf5   :  { %2669 = vmatprep.subr.mxu0 %v558_v44  ;;  %1686 = vmatmul.mubr.f32.gmra.mxu1 %v69_v45  ;;  %v582_v44 = vld [vmem:[%s5169_s1 + $0xda0] sm:$0xff] }
  0xf6   :  { %2713 = vmatprep.subr.mxu1 %v590_v46  ;;  %1605 = vmatprep.mubr.f32.mxu0 %v101_v47  ;;  %v534_v45 = vld [vmem:[%s5169_s1 + $0xc20] sm:$0xff] }
  0xf7   :  { %2670 = vmatpush3.msra.mxu0 %v542_v48  ;;  %v2170_v55 = vpop.f32.mrf.mxu0  ;;  %2714 = vmatpush3.msra.mxu1 %v574_v49  ;;  %v566_v46 = vld [vmem:[%s5169_s1 + $0xd20] sm:$0xff]  ;;  %v549_v49 = vld [vmem:[%s5169_s1 + $0xc98] sm:$0xff] }
  0xf8   :  { %1606 = vmatmul.mubr.f32.gmra.mxu0 %v100_v50  ;;  %2671 = vmatprep.subr.mxu0 %v557_v51  ;;  %v581_v50 = vld [vmem:[%s5169_s1 + $0xd98] sm:$0xff] }
  0xf9   :  { %2715 = vmatprep.subr.mxu1 %v589_v52  ;;  %v2171_v60 = vpop.f32.mrf.mxu0  ;;  %1690 = vmatprep.mubr.f32.mxu1 %v103_v53  ;;  %v533_v52 = vld [vmem:[%s5169_s1 + $0xc18] sm:$0xff]  ;;  %v548_v53 = vld [vmem:[%s5169_s1 + $0xc90] sm:$0xff] }
  0xfa   :  { %2672 = vmatpush3.msra.mxu0 %v541_v54  ;;  %v2172_v63 = vadd.f32 %v2171_v60, %v2170_v55  ;;  %v2214_v0 = vpop.f32.mrf.mxu1  ;;  %2716 = vmatpush3.msra.mxu1 %v573_v56  ;;  %v580_v54 = vld [vmem:[%s5169_s1 + $0xd90] sm:$0xff] }
  0xfb   :  { %2673 = vmatprep.subr.mxu0 %v556_v57  ;;  %1691 = vmatmul.mubr.f32.gmra.mxu1 %v102_v58  ;;  %v532_v56 = vld [vmem:[%s5169_s1 + $0xc10] sm:$0xff]  ;;  %v547_v58 = vld [vmem:[%s5169_s1 + $0xc88] sm:$0xff] }
  0xfc   :  { %2717 = vmatprep.subr.mxu1 %v588_v59  ;;  %v753_v5 = vadd.f32 %v2172_v63, %v4338_v16  ;;  %v2215_v6 = vpop.f32.mrf.mxu1  ;;  %1610 = vmatprep.mubr.f32.mxu0 %v134_v61  ;;  %v564_v57 = vld [vmem:[%s5169_s1 + $0xd10] sm:$0xff]  ;;  %v579_v59 = vld [vmem:[%s5169_s1 + $0xd88] sm:$0xff] }
  0xfd   :  { %2674 = vmatpush3.msra.mxu0 %v540_v62  ;;  %v2173_v9 = vpop.f32.mrf.mxu0  ;;  %v2216_v10 = vadd.f32 %v2215_v6, %v2214_v0  ;;  %2718 = vmatpush3.msra.mxu1 %v572_v1  ;;  %v531_v62 = vld [vmem:[%s5169_s1 + $0xc08] sm:$0xff]  ;;  %v546_v0 = vld [vmem:[%s5169_s1 + $0xc80] sm:$0xff] }
  0xfe   :  { %1611 = vmatmul.mubr.f32.gmra.mxu0 %v133_v2  ;;  %2675 = vmatprep.subr.mxu0 %v555_v3  ;;  %v563_v63 = vld [vmem:[%s5169_s1 + $0xd08] sm:$0xff]  ;;  %v578_v1 = vld [vmem:[%s5169_s1 + $0xd80] sm:$0xff] }
  0xff   :  { %2719 = vmatprep.subr.mxu1 %v587_v4  ;;  %v4488_v15 = vadd.f32 %v2216_v10, %v753_v5  ;;  %v2174_v17 = vpop.f32.mrf.mxu0  ;;  %1695 = vmatprep.mubr.f32.mxu1 %v136_v7  ;;  %v530_v4 = vld [vmem:[%s5169_s1 + $0xc00] sm:$0xff]  ;;  %v39_v5 = vld [vmem:[%s5170_s0 + $0xc8] sm:$0xff] }
 0x100   :  { %2676 = vmatpush3.msra.mxu0 %v539_v8  ;;  %v2175_v20 = vadd.f32 %v2174_v17, %v2173_v9  ;;  %v2217_v21 = vpop.f32.mrf.mxu1  ;;  %2720 = vmatpush3.msra.mxu1 %v571_v11  ;;  %v562_v8 = vld [vmem:[%s5169_s1 + $0xd00] sm:$0xff]  ;;  %v41_v9 = vld [vmem:[%s5170_s0 + $0xd8] sm:$0xff]  ;;  %v40_v11 = vld [vmem:[%s5170_s0 + $0xd0] sm:$0xff] }
 0x101   :  { %2677 = vmatprep.subr.mxu0 %v554_v12  ;;  %1696 = vmatmul.mubr.f32.gmra.mxu1 %v135_v13  ;;  %v38_v10 = vld [vmem:[%s5170_s0 + $0xc0] sm:$0xff]  ;;  %v657_v17 = vld [vmem:[%s5169_s1 + $0xff8] sm:$0xff] }
 0x102   :  { %2721 = vmatprep.subr.mxu1 %v586_v14  ;;  %v758_v26 = vadd.f32 %v2175_v20, %v4338_v16  ;;  %v2218_v27 = vpop.f32.mrf.mxu1  ;;  %2678 = vmatpush3.msra.mxu0 %v538_v18  ;;  %v625_v14 = vld [vmem:[%s5169_s1 + $0xef8] sm:$0xff] }
 0x103   :  { %2722 = vmatpush3.msra.mxu1 %v570_v19  ;;  %v2176_v30 = vpop.f32.mrf.mxu0  ;;  %v2219_v31 = vadd.f32 %v2218_v27, %v2217_v21  ;;  %2679 = vmatprep.subr.mxu0 %v553_v22  ;;  %v609_v18 = vld [vmem:[%s5169_s1 + $0xe78] sm:$0xff]  ;;  %v624_v21 = vld [vmem:[%s5169_s1 + $0xef0] sm:$0xff] }
 0x104   :  { %2723 = vmatprep.subr.mxu1 %v585_v23  ;;  %2680 = vmatpush3.msra.mxu0 %v537_v24  ;;  %v656_v22 = vld [vmem:[%s5169_s1 + $0xff0] sm:$0xff] }
 0x105   :  { %2724 = vmatpush3.msra.mxu1 %v569_v25  ;;  %v4527_v37 = vadd.f32 %v2219_v31, %v758_v26  ;;  %v2177_v38 = vpop.f32.mrf.mxu0  ;;  %2681 = vmatprep.subr.mxu0 %v552_v28  ;;  %v72_v24 = vld [vmem:[%s5170_s0 + $0x1d0] sm:$0xff]  ;;  %v71_v28 = vld [vmem:[%s5170_s0 + $0x1c8] sm:$0xff] }
 0x106   :  { %2725 = vmatprep.subr.mxu1 %v584_v29  ;;  %v2178_v41 = vadd.f32 %v2177_v38, %v2176_v30  ;;  %v2220_v42 = vpop.f32.mrf.mxu1  ;;  %2682 = vmatpush3.msra.mxu0 %v536_v33  ;;  %v608_v25 = vld [vmem:[%s5169_s1 + $0xe70] sm:$0xff]  ;;  %v623_v30 = vld [vmem:[%s5169_s1 + $0xee8] sm:$0xff] }
 0x107   :  { %2726 = vmatpush3.msra.mxu1 %v568_v34  ;;  %2683 = vmatprep.subr.mxu0 %v551_v35  ;;  %v640_v27 = vld [vmem:[%s5169_s1 + $0xf70] sm:$0xff]  ;;  %v655_v31 = vld [vmem:[%s5169_s1 + $0xfe8] sm:$0xff]  ;;  %v74_v35 = vld [vmem:[%s5170_s0 + $0x1e0] sm:$0xff] }
 0x108   :  { %2727 = vmatprep.subr.mxu1 %v583_v36  ;;  %v763_v47 = vadd.f32 %v2178_v41, %v4338_v16  ;;  %v2221_v48 = vpop.f32.mrf.mxu1  ;;  %2684 = vmatpush3.msra.mxu0 %v535_v39  ;;  %v565_v16 = vld [vmem:[%s5169_s1 + $0xd18] sm:$0xff]  ;;  %v639_v38 = vld [vmem:[%s5169_s1 + $0xf68] sm:$0xff]  ;;  %v622_v39 = vld [vmem:[%s5169_s1 + $0xee0] sm:$0xff] }
 0x109   :  { %2728 = vmatpush3.msra.mxu1 %v567_v40  ;;  %v2222_v51 = vadd.f32 %v2221_v48, %v2220_v42  ;;  %2685 = vmatprep.subr.mxu0 %v550_v43  ;;  %v73_v41 = vld [vmem:[%s5170_s0 + $0x1d8] sm:$0xff]  ;;  %v654_v42 = vld [vmem:[%s5169_s1 + $0xfe0] sm:$0xff] }
 0x10a   :  { %2729 = vmatprep.subr.mxu1 %v582_v44  ;;  %2686 = vmatpush3.msra.mxu0 %v534_v45  ;;  %v105_v45 = vld [vmem:[%s5170_s0 + $0x2d8] sm:$0xff]  ;;  %v638_v48 = vld [vmem:[%s5169_s1 + $0xf60] sm:$0xff] }
 0x10b   :  { %2730 = vmatpush3.msra.mxu1 %v566_v46  ;;  %v4566_v55 = vadd.f32 %v2222_v51, %v763_v47  ;;  %2687 = vmatprep.subr.mxu0 %v549_v49  ;;  %v606_v46 = vld [vmem:[%s5169_s1 + $0xe60] sm:$0xff]  ;;  %v104_v49 = vld [vmem:[%s5170_s0 + $0x2d0] sm:$0xff]  ;;  %v621_v51 = vld [vmem:[%s5169_s1 + $0xed8] sm:$0xff] }
 0x10c   :  { %2731 = vmatprep.subr.mxu1 %v581_v50  ;;  %2688 = vmatpush3.msra.mxu0 %v533_v52  ;;  %v2255_v60 = vpop.f32.mrf.mxu0  ;;  %v653_v52 = vld [vmem:[%s5169_s1 + $0xfd8] sm:$0xff] }
 0x10d   :  { %2732 = vmatpush3.msra.mxu1 %v565_v16  ;;  %v2299_v61 = vpop.f32.mrf.mxu1  ;;  %2689 = vmatprep.subr.mxu0 %v548_v53 }
 0x10e   :  { %2733 = vmatprep.subr.mxu1 %v580_v54  ;;  %2690 = vmatpush3.msra.mxu0 %v532_v56  ;;  %v2256_v2 = vpop.f32.mrf.mxu0  ;;  %v107_v54 = vld [vmem:[%s5170_s0 + $0x2e8] sm:$0xff] }
 0x10f   :  { %2734 = vmatpush3.msra.mxu1 %v564_v57  ;;  %v2300_v3 = vpop.f32.mrf.mxu1  ;;  %2691 = vmatprep.subr.mxu0 %v547_v58  ;;  %v2257_v6 = vadd.f32 %v2256_v2, %v2255_v60  ;;  %v637_v57 = vld [vmem:[%s5169_s1 + $0xf58] sm:$0xff]  ;;  %v620_v58 = vld [vmem:[%s5169_s1 + $0xed0] sm:$0xff]  ;;  %v106_v60 = vld [vmem:[%s5170_s0 + $0x2e0] sm:$0xff] }
 0x110   :  { %2735 = vmatprep.subr.mxu1 %v579_v59  ;;  %v2301_v7 = vadd.f32 %v2300_v3, %v2299_v61  ;;  %2692 = vmatpush3.msra.mxu0 %v531_v62  ;;  %v652_v61 = vld [vmem:[%s5169_s1 + $0xfd0] sm:$0xff] }
 0x111   :  { %2736 = vmatpush3.msra.mxu1 %v563_v63  ;;  %2693 = vmatprep.subr.mxu0 %v546_v0  ;;  %v918_v12 = vadd.f32 %v2257_v6, %v4371_v32  ;;  %v641_v32 = vld [vmem:[%s5169_s1 + $0xf78] sm:$0xff]  ;;  %v138_v0 = vld [vmem:[%s5170_s0 + $0x3e0] sm:$0xff]  ;;  %v636_v3 = vld [vmem:[%s5169_s1 + $0xf50] sm:$0xff] }
 0x112   :  { %2737 = vmatprep.subr.mxu1 %v578_v1  ;;  %v2258_v13 = vpop.f32.mrf.mxu0  ;;  %2694 = vmatpush3.msra.mxu0 %v530_v4  ;;  %v604_v1 = vld [vmem:[%s5169_s1 + $0xe50] sm:$0xff]  ;;  %v137_v4 = vld [vmem:[%s5170_s0 + $0x3d8] sm:$0xff]  ;;  %v619_v6 = vld [vmem:[%s5169_s1 + $0xec8] sm:$0xff] }
 0x113   :  { %1765 = vmatprep.mubr.f32.mxu0 %v39_v5  ;;  %2738 = vmatpush3.msra.mxu1 %v562_v8  ;;  %v4623_v19 = vadd.f32 %v2301_v7, %v918_v12  ;;  %v651_v7 = vld [vmem:[%s5169_s1 + $0xfc8] sm:$0xff]  ;;  %v618_v12 = vld [vmem:[%s5169_s1 + $0xec0] sm:$0xff] }
 0x114   :  { %1850 = vmatprep.mubr.f32.mxu1 %v41_v9  ;;  %v2259_v20 = vpop.f32.mrf.mxu0  ;;  %1766 = vmatmul.mubr.f32.vlgmr.msra.gmra.mxu0 %v38_v10  ;;  %v140_v9 = vld [vmem:[%s5170_s0 + $0x3f0] sm:$0xff] }
 0x115   :  { %1851 = vmatmul.mubr.f32.vlgmr.msra.gmra.mxu1 %v40_v11  ;;  %v2260_v23 = vadd.f32 %v2259_v20, %v2258_v13  ;;  %2751 = vmatprep.subr.mxu0 %v625_v14  ;;  %v2302_v26 = vpop.f32.mrf.mxu1  ;;  %v635_v11 = vld [vmem:[%s5169_s1 + $0xf48] sm:$0xff]  ;;  %v650_v14 = vld [vmem:[%s5169_s1 + $0xfc0] sm:$0xff]  ;;  %v617_v20 = vld [vmem:[%s5169_s1 + $0xeb8] sm:$0xff] }
 0x116   :  { %2795 = vmatprep.subr.mxu1 %v657_v17  ;;  %2752 = vmatpush3.msra.mxu0 %v609_v18  ;;  %v139_v13 = vld [vmem:[%s5170_s0 + $0x3e8] sm:$0xff]  ;;  %v602_v18 = vld [vmem:[%s5169_s1 + $0xe40] sm:$0xff] }
 0x117   :  { %2796 = vmatpush3.msra.mxu1 %v641_v32  ;;  %v923_v29 = vadd.f32 %v2260_v23, %v4488_v15  ;;  %2753 = vmatprep.subr.mxu0 %v624_v21  ;;  %v2303_v34 = vpop.f32.mrf.mxu1  ;;  %v607_v15 = vld [vmem:[%s5169_s1 + $0xe68] sm:$0xff]  ;;  %v634_v32 = vld [vmem:[%s5169_s1 + $0xf40] sm:$0xff]  ;;  %v649_v21 = vld [vmem:[%s5169_s1 + $0xfb8] sm:$0xff] }
 0x118   :  { %2797 = vmatprep.subr.mxu1 %v656_v22  ;;  %v2261_v33 = vpop.f32.mrf.mxu0  ;;  %1770 = vmatprep.mubr.f32.mxu0 %v72_v24  ;;  %v2304_v36 = vadd.f32 %v2303_v34, %v2302_v26  ;;  %v601_v22 = vld [vmem:[%s5169_s1 + $0xe38] sm:$0xff]  ;;  %v616_v24 = vld [vmem:[%s5169_s1 + $0xeb0] sm:$0xff]  ;;  %v646_v34 = vld [vmem:[%s5169_s1 + $0xfa0] sm:$0xff] }
 0x119   :  { %2754 = vmatpush3.msra.mxu0 %v608_v25  ;;  %2798 = vmatpush3.msra.mxu1 %v640_v27  ;;  %v633_v23 = vld [vmem:[%s5169_s1 + $0xf38] sm:$0xff]  ;;  %v648_v25 = vld [vmem:[%s5169_s1 + $0xfb0] sm:$0xff] }
 0x11a   :  { %1771 = vmatmul.mubr.f32.gmra.mxu0 %v71_v28  ;;  %v2262_v40 = vpop.f32.mrf.mxu0  ;;  %2755 = vmatprep.subr.mxu0 %v623_v30  ;;  %v4668_v43 = vadd.f32 %v2304_v36, %v923_v29  ;;  %v600_v26 = vld [vmem:[%s5169_s1 + $0xe30] sm:$0xff]  ;;  %v615_v28 = vld [vmem:[%s5169_s1 + $0xea8] sm:$0xff]  ;;  %v613_v36 = vld [vmem:[%s5169_s1 + $0xe98] sm:$0xff] }
 0x11b   :  { %2799 = vmatprep.subr.mxu1 %v655_v31  ;;  %v2263_v44 = vadd.f32 %v2262_v40, %v2261_v33  ;;  %1855 = vmatprep.mubr.f32.mxu1 %v74_v35  ;;  %v2305_v47 = vpop.f32.mrf.mxu1  ;;  %v632_v27 = vld [vmem:[%s5169_s1 + $0xf30] sm:$0xff]  ;;  %v647_v29 = vld [vmem:[%s5169_s1 + $0xfa8] sm:$0xff]  ;;  %v614_v33 = vld [vmem:[%s5169_s1 + $0xea0] sm:$0xff] }
 0x11c   :  { %2756 = vmatpush3.msra.mxu0 %v607_v15  ;;  %2800 = vmatpush3.msra.mxu1 %v639_v38  ;;  %v599_v30 = vld [vmem:[%s5169_s1 + $0xe28] sm:$0xff]  ;;  %v598_v35 = vld [vmem:[%s5169_s1 + $0xe20] sm:$0xff]  ;;  %v645_v38 = vld [vmem:[%s5169_s1 + $0xf98] sm:$0xff] }
 0x11d   :  { %2757 = vmatprep.subr.mxu0 %v622_v39  ;;  %v928_v50 = vadd.f32 %v2263_v44, %v4527_v37  ;;  %1856 = vmatmul.mubr.f32.gmra.mxu1 %v73_v41  ;;  %v2306_v53 = vpop.f32.mrf.mxu1  ;;  %v605_v37 = vld [vmem:[%s5169_s1 + $0xe58] sm:$0xff]  ;;  %v631_v31 = vld [vmem:[%s5169_s1 + $0xf28] sm:$0xff]  ;;  %v630_v15 = vld [vmem:[%s5169_s1 + $0xf20] sm:$0xff] }
 0x11e   :  { %2801 = vmatprep.subr.mxu1 %v654_v42  ;;  %v2264_v16 = vpop.f32.mrf.mxu0  ;;  %1775 = vmatprep.mubr.f32.mxu0 %v105_v45  ;;  %v2307_v56 = vadd.f32 %v2306_v53, %v2305_v47  ;;  %v597_v39 = vld [vmem:[%s5169_s1 + $0xe18] sm:$0xff]  ;;  %v612_v41 = vld [vmem:[%s5169_s1 + $0xe90] sm:$0xff]  ;;  %v643_v47 = vld [vmem:[%s5169_s1 + $0xf88] sm:$0xff] }
 0x11f   :  { %2758 = vmatpush3.msra.mxu0 %v606_v46  ;;  %2802 = vmatpush3.msra.mxu1 %v638_v48  ;;  %v629_v40 = vld [vmem:[%s5169_s1 + $0xf18] sm:$0xff]  ;;  %v644_v42 = vld [vmem:[%s5169_s1 + $0xf90] sm:$0xff]  ;;  %v611_v46 = vld [vmem:[%s5169_s1 + $0xe88] sm:$0xff] }
 0x120   :  { %1776 = vmatmul.mubr.f32.gmra.mxu0 %v104_v49  ;;  %v2265_v59 = vpop.f32.mrf.mxu0  ;;  %2759 = vmatprep.subr.mxu0 %v621_v51  ;;  %v4707_v62 = vadd.f32 %v2307_v56, %v928_v50  ;;  %v596_v44 = vld [vmem:[%s5169_s1 + $0xe10] sm:$0xff]  ;;  %v595_v50 = vld [vmem:[%s5169_s1 + $0xe08] sm:$0xff] }
 0x121   :  { %2803 = vmatprep.subr.mxu1 %v653_v52  ;;  %v2266_v63 = vadd.f32 %v2265_v59, %v2264_v16  ;;  %1860 = vmatprep.mubr.f32.mxu1 %v107_v54  ;;  %v2308_v2 = vpop.f32.mrf.mxu1  ;;  %v628_v45 = vld [vmem:[%s5169_s1 + $0xf10] sm:$0xff]  ;;  %v627_v51 = vld [vmem:[%s5169_s1 + $0xf08] sm:$0xff]  ;;  %v610_v52 = vld [vmem:[%s5169_s1 + $0xe80] sm:$0xff] }
 0x122   :  { %2760 = vmatpush3.msra.mxu0 %v605_v37  ;;  %2804 = vmatpush3.msra.mxu1 %v637_v57  ;;  %v642_v16 = vld [vmem:[%s5169_s1 + $0xf80] sm:$0xff]  ;;  %v43_v56 = vld [vmem:[%s5170_s0 + $0xe8] sm:$0xff] }
 0x123   :  { %2761 = vmatprep.subr.mxu0 %v620_v58  ;;  %v933_v5 = vadd.f32 %v2266_v63, %v4566_v55  ;;  %1861 = vmatmul.mubr.f32.gmra.mxu1 %v106_v60  ;;  %v2309_v8 = vpop.f32.mrf.mxu1  ;;  %v603_v55 = vld [vmem:[%s5169_s1 + $0xe48] sm:$0xff]  ;;  %v594_v37 = vld [vmem:[%s5169_s1 + $0xe00] sm:$0xff]  ;;  %v45_v60 = vld [vmem:[%s5170_s0 + $0xf8] sm:$0xff] }
 0x124   :  { %2805 = vmatprep.subr.mxu1 %v652_v61  ;;  %1780 = vmatprep.mubr.f32.mxu0 %v138_v0  ;;  %v2310_v10 = vadd.f32 %v2309_v8, %v2308_v2  ;;  %v626_v59 = vld [vmem:[%s5169_s1 + $0xf00] sm:$0xff]  ;;  %v44_v63 = vld [vmem:[%s5170_s0 + $0xf0] sm:$0xff]  ;;  %v673_v2 = vld [vmem:[%s5169_s1 + $0x1078] sm:$0xff] }
 0x125   :  { %2762 = vmatpush3.msra.mxu0 %v604_v1  ;;  %2806 = vmatpush3.msra.mxu1 %v636_v3  ;;  %v42_v61 = vld [vmem:[%s5170_s0 + $0xe0] sm:$0xff]  ;;  %v75_v8 = vld [vmem:[%s5170_s0 + $0x1e8] sm:$0xff] }
 0x126   :  { %1781 = vmatmul.mubr.f32.gmra.mxu0 %v137_v4  ;;  %2763 = vmatprep.subr.mxu0 %v619_v6  ;;  %v4746_v17 = vadd.f32 %v2310_v10, %v933_v5  ;;  %v672_v5 = vld [vmem:[%s5169_s1 + $0x1070] sm:$0xff] }
 0x127   :  { %2807 = vmatprep.subr.mxu1 %v651_v7  ;;  %1865 = vmatprep.mubr.f32.mxu1 %v140_v9 }
 0x128   :  { %2764 = vmatpush3.msra.mxu0 %v603_v55  ;;  %2808 = vmatpush3.msra.mxu1 %v635_v11  ;;  %v671_v55 = vld [vmem:[%s5169_s1 + $0x1068] sm:$0xff] }
 0x129   :  { %2765 = vmatprep.subr.mxu0 %v618_v12  ;;  %1866 = vmatmul.mubr.f32.gmra.mxu1 %v139_v13  ;;  %v78_v12 = vld [vmem:[%s5170_s0 + $0x200] sm:$0xff] }
 0x12a   :  { %2809 = vmatprep.subr.mxu1 %v650_v14  ;;  %2766 = vmatpush3.msra.mxu0 %v602_v18  ;;  %v77_v18 = vld [vmem:[%s5170_s0 + $0x1f8] sm:$0xff] }
 0x12b   :  { %2810 = vmatpush3.msra.mxu1 %v634_v32  ;;  %2767 = vmatprep.subr.mxu0 %v617_v20 }
 0x12c   :  { %2811 = vmatprep.subr.mxu1 %v649_v21  ;;  %2768 = vmatpush3.msra.mxu0 %v601_v22  ;;  %v109_v21 = vld [vmem:[%s5170_s0 + $0x2f8] sm:$0xff] }
 0x12d   :  { %2812 = vmatpush3.msra.mxu1 %v633_v23  ;;  %2769 = vmatprep.subr.mxu0 %v616_v24  ;;  %v108_v23 = vld [vmem:[%s5170_s0 + $0x2f0] sm:$0xff] }
 0x12e   :  { %2813 = vmatprep.subr.mxu1 %v648_v25  ;;  %2770 = vmatpush3.msra.mxu0 %v600_v26  ;;  %v669_v25 = vld [vmem:[%s5169_s1 + $0x1058] sm:$0xff] }
 0x12f   :  { %2814 = vmatpush3.msra.mxu1 %v632_v27  ;;  %2771 = vmatprep.subr.mxu0 %v615_v28  ;;  %v111_v27 = vld [vmem:[%s5170_s0 + $0x308] sm:$0xff] }
 0x130   :  { %2815 = vmatprep.subr.mxu1 %v647_v29  ;;  %2772 = vmatpush3.msra.mxu0 %v599_v30  ;;  %v110_v29 = vld [vmem:[%s5170_s0 + $0x300] sm:$0xff] }
 0x131   :  { %2816 = vmatpush3.msra.mxu1 %v631_v31  ;;  %2773 = vmatprep.subr.mxu0 %v614_v33  ;;  %v142_v31 = vld [vmem:[%s5170_s0 + $0x400] sm:$0xff]  ;;  %v141_v33 = vld [vmem:[%s5170_s0 + $0x3f8] sm:$0xff] }
 0x132   :  { %2817 = vmatprep.subr.mxu1 %v646_v34  ;;  %2774 = vmatpush3.msra.mxu0 %v598_v35  ;;  %v667_v34 = vld [vmem:[%s5169_s1 + $0x1048] sm:$0xff]  ;;  %v144_v35 = vld [vmem:[%s5170_s0 + $0x410] sm:$0xff] }
 0x133   :  { %2818 = vmatpush3.msra.mxu1 %v630_v15  ;;  %2775 = vmatprep.subr.mxu0 %v613_v36  ;;  %v666_v15 = vld [vmem:[%s5169_s1 + $0x1040] sm:$0xff]  ;;  %v143_v36 = vld [vmem:[%s5170_s0 + $0x408] sm:$0xff] }
 0x134   :  { %2819 = vmatprep.subr.mxu1 %v645_v38  ;;  %2776 = vmatpush3.msra.mxu0 %v597_v39  ;;  %v2343_v48 = vpop.f32.mrf.mxu0  ;;  %v665_v38 = vld [vmem:[%s5169_s1 + $0x1038] sm:$0xff]  ;;  %v664_v39 = vld [vmem:[%s5169_s1 + $0x1030] sm:$0xff] }
 0x135   :  { %2820 = vmatpush3.msra.mxu1 %v629_v40  ;;  %v2387_v49 = vpop.f32.mrf.mxu1  ;;  %2777 = vmatprep.subr.mxu0 %v612_v41  ;;  %v663_v40 = vld [vmem:[%s5169_s1 + $0x1028] sm:$0xff]  ;;  %v662_v41 = vld [vmem:[%s5169_s1 + $0x1020] sm:$0xff] }
 0x136   :  { %2821 = vmatprep.subr.mxu1 %v644_v42  ;;  %2778 = vmatpush3.msra.mxu0 %v596_v44  ;;  %v2344_v53 = vpop.f32.mrf.mxu0 }
 0x137   :  { %2822 = vmatpush3.msra.mxu1 %v628_v45  ;;  %v2388_v54 = vpop.f32.mrf.mxu1  ;;  %2779 = vmatprep.subr.mxu0 %v611_v46  ;;  %v2345_v57 = vadd.f32 %v2344_v53, %v2343_v48  ;;  %v661_v45 = vld [vmem:[%s5169_s1 + $0x1018] sm:$0xff]  ;;  %v660_v46 = vld [vmem:[%s5169_s1 + $0x1010] sm:$0xff] }
 0x138   :  { %2823 = vmatprep.subr.mxu1 %v643_v47  ;;  %v2389_v58 = vadd.f32 %v2388_v54, %v2387_v49  ;;  %2780 = vmatpush3.msra.mxu0 %v595_v50  ;;  %v659_v49 = vld [vmem:[%s5169_s1 + $0x1008] sm:$0xff] }
 0x139   :  { %2824 = vmatpush3.msra.mxu1 %v627_v51  ;;  %2781 = vmatprep.subr.mxu0 %v610_v52  ;;  %v1088_v0 = vadd.f32 %v2345_v57, %v4623_v19  ;;  %v76_v19 = vld [vmem:[%s5170_s0 + $0x1f0] sm:$0xff]  ;;  %v658_v52 = vld [vmem:[%s5169_s1 + $0x1000] sm:$0xff]  ;;  %v79_v57 = vld [vmem:[%s5170_s0 + $0x208] sm:$0xff] }
 0x13a   :  { %2825 = vmatprep.subr.mxu1 %v642_v16  ;;  %v2346_v1 = vpop.f32.mrf.mxu0  ;;  %2782 = vmatpush3.msra.mxu0 %v594_v37  ;;  %v46_v37 = vld [vmem:[%s5170_s0 + $0x100] sm:$0xff] }
 0x13b   :  { %1935 = vmatprep.mubr.f32.mxu0 %v43_v56  ;;  %2826 = vmatpush3.msra.mxu1 %v626_v59  ;;  %v4866_v3 = vadd.f32 %v2389_v58, %v1088_v0  ;;  %v112_v56 = vld [vmem:[%s5170_s0 + $0x310] sm:$0xff]  ;;  %v145_v58 = vld [vmem:[%s5170_s0 + $0x418] sm:$0xff] }
 0x13c   :  { %2020 = vmatprep.mubr.f32.mxu1 %v45_v60  ;;  %v2347_v4 = vpop.f32.mrf.mxu0  ;;  %1936 = vmatmul.mubr.f32.vlgmr.msra.gmra.mxu0 %v42_v61 }
 0x13d   :  { %2021 = vmatmul.mubr.f32.vlgmr.msra.gmra.mxu1 %v44_v63  ;;  %v2348_v6 = vadd.f32 %v2347_v4, %v2346_v1  ;;  %2859 = vmatprep.subr.mxu0 %v673_v2  ;;  %v2390_v7 = vpop.f32.mrf.mxu1 }
 0x13e   :  { %2897 = vmatprep.subr.mxu1 %v673_v2  ;;  %2860 = vmatpush3.msra.mxu0 %v673_v2 }
 0x13f   :  { %2913 = vmatpush3.msra.mxu1 %v673_v2  ;;  %v1093_v9 = vadd.f32 %v2348_v6, %v4668_v43  ;;  %2861 = vmatprep.subr.mxu0 %v672_v5  ;;  %v2391_v11 = vpop.f32.mrf.mxu1  ;;  %v670_v43 = vld [vmem:[%s5169_s1 + $0x1060] sm:$0xff] }
 0x140   :  { %2898 = vmatprep.subr.mxu1 %v672_v5  ;;  %v2349_v10 = vpop.f32.mrf.mxu0  ;;  %1940 = vmatprep.mubr.f32.mxu0 %v76_v19  ;;  %v2392_v13 = vadd.f32 %v2391_v11, %v2390_v7 }
 0x141   :  { %2862 = vmatpush3.msra.mxu0 %v672_v5  ;;  %2914 = vmatpush3.msra.mxu1 %v672_v5 }
 0x142   :  { %1941 = vmatmul.mubr.f32.gmra.mxu0 %v75_v8  ;;  %v2350_v14 = vpop.f32.mrf.mxu0  ;;  %2863 = vmatprep.subr.mxu0 %v671_v55  ;;  %v4890_v32 = vadd.f32 %v2392_v13, %v1093_v9 }
 0x143   :  { %2899 = vmatprep.subr.mxu1 %v671_v55  ;;  %v2351_v20 = vadd.f32 %v2350_v14, %v2349_v10  ;;  %2025 = vmatprep.mubr.f32.mxu1 %v78_v12  ;;  %v2393_v22 = vpop.f32.mrf.mxu1 }
 0x144   :  { %2864 = vmatpush3.msra.mxu0 %v671_v55  ;;  %2915 = vmatpush3.msra.mxu1 %v671_v55 }
 0x145   :  { %2865 = vmatprep.subr.mxu0 %v670_v43  ;;  %v1098_v24 = vadd.f32 %v2351_v20, %v4707_v62  ;;  %2026 = vmatmul.mubr.f32.gmra.mxu1 %v77_v18  ;;  %v2394_v26 = vpop.f32.mrf.mxu1  ;;  %v668_v62 = vld [vmem:[%s5169_s1 + $0x1050] sm:$0xff] }
 0x146   :  { %2900 = vmatprep.subr.mxu1 %v670_v43  ;;  %1945 = vmatprep.mubr.f32.mxu0 %v109_v21  ;;  %v2395_v28 = vadd.f32 %v2394_v26, %v2393_v22  ;;  %v4943_v42 = vpop.f32.mrf.mxu0 }
 0x147   :  { %2866 = vmatpush3.msra.mxu0 %v670_v43  ;;  %2916 = vmatpush3.msra.mxu1 %v670_v43 }
 0x148   :  { %1946 = vmatmul.mubr.f32.gmra.mxu0 %v108_v23  ;;  %2867 = vmatprep.subr.mxu0 %v669_v25  ;;  %v4911_v30 = vadd.f32 %v2395_v28, %v1098_v24  ;;  %v4953_v47 = vpop.f32.mrf.mxu0 }
 0x149   :  { %2901 = vmatprep.subr.mxu1 %v669_v25  ;;  %2030 = vmatprep.mubr.f32.mxu1 %v111_v27  ;;  %v4945_v44 = vpop.f32.mrf.mxu1 }
 0x14a   :  { %2868 = vmatpush3.msra.mxu0 %v669_v25  ;;  %2917 = vmatpush3.msra.mxu1 %v669_v25 }
 0x14b   :  { %2869 = vmatprep.subr.mxu0 %v668_v62  ;;  %2031 = vmatmul.mubr.f32.gmra.mxu1 %v110_v29  ;;  %v4955_v48 = vpop.f32.mrf.mxu1 }
 0x14c   :  { %2902 = vmatprep.subr.mxu1 %v668_v62  ;;  %1950 = vmatprep.mubr.f32.mxu0 %v142_v31 }
 0x14d   :  { %2870 = vmatpush3.msra.mxu0 %v668_v62  ;;  %2918 = vmatpush3.msra.mxu1 %v668_v62 }
 0x14e   :  { %1951 = vmatmul.mubr.f32.gmra.mxu0 %v141_v33  ;;  %2871 = vmatprep.subr.mxu0 %v667_v34 }
 0x14f   :  { %2903 = vmatprep.subr.mxu1 %v667_v34  ;;  %2035 = vmatprep.mubr.f32.mxu1 %v144_v35 }
 0x150   :  { %2872 = vmatpush3.msra.mxu0 %v667_v34  ;;  %2919 = vmatpush3.msra.mxu1 %v667_v34 }
 0x151   :  { %2873 = vmatprep.subr.mxu0 %v666_v15  ;;  %2036 = vmatmul.mubr.f32.gmra.mxu1 %v143_v36 }
 0x152   :  { %2904 = vmatprep.subr.mxu1 %v666_v15  ;;  %2874 = vmatpush3.msra.mxu0 %v666_v15 }
 0x153   :  { %2920 = vmatpush3.msra.mxu1 %v666_v15  ;;  %2875 = vmatprep.subr.mxu0 %v665_v38 }
 0x154   :  { %2905 = vmatprep.subr.mxu1 %v665_v38  ;;  %2876 = vmatpush3.msra.mxu0 %v665_v38 }
 0x155   :  { %2921 = vmatpush3.msra.mxu1 %v665_v38  ;;  %2877 = vmatprep.subr.mxu0 %v664_v39 }
 0x156   :  { %2906 = vmatprep.subr.mxu1 %v664_v39  ;;  %2878 = vmatpush3.msra.mxu0 %v664_v39 }
 0x157   :  { %2922 = vmatpush3.msra.mxu1 %v664_v39  ;;  %2879 = vmatprep.subr.mxu0 %v663_v40 }
 0x158   :  { %2907 = vmatprep.subr.mxu1 %v663_v40  ;;  %2880 = vmatpush3.msra.mxu0 %v663_v40 }
 0x159   :  { %2923 = vmatpush3.msra.mxu1 %v663_v40  ;;  %2881 = vmatprep.subr.mxu0 %v662_v41 }
 0x15a   :  { %2908 = vmatprep.subr.mxu1 %v662_v41  ;;  %2882 = vmatpush3.msra.mxu0 %v662_v41 }
 0x15b   :  { %2924 = vmatpush3.msra.mxu1 %v662_v41  ;;  %2883 = vmatprep.subr.mxu0 %v661_v45 }
 0x15c   :  { %2909 = vmatprep.subr.mxu1 %v661_v45  ;;  %2884 = vmatpush3.msra.mxu0 %v661_v45  ;;  %v2431_v50 = vpop.f32.mrf.mxu0 }
 0x15d   :  { %2925 = vmatpush3.msra.mxu1 %v661_v45  ;;  %v2475_v51 = vpop.f32.mrf.mxu1  ;;  %2885 = vmatprep.subr.mxu0 %v660_v46 }
 0x15e   :  { %2910 = vmatprep.subr.mxu1 %v660_v46  ;;  %2886 = vmatpush3.msra.mxu0 %v660_v46  ;;  %v2432_v16 = vpop.f32.mrf.mxu0 }
 0x15f   :  { %2926 = vmatpush3.msra.mxu1 %v660_v46  ;;  %v2476_v53 = vpop.f32.mrf.mxu1  ;;  %2887 = vmatprep.subr.mxu0 %v659_v49  ;;  %v2433_v54 = vadd.f32 %v2432_v16, %v2431_v50 }
 0x160   :  { %2911 = vmatprep.subr.mxu1 %v659_v49  ;;  %2888 = vmatpush3.msra.mxu0 %v659_v49  ;;  %v2477_v60 = vadd.f32 %v2476_v53, %v2475_v51 }
 0x161   :  { %2927 = vmatpush3.msra.mxu1 %v659_v49  ;;  %2889 = vmatprep.subr.mxu0 %v658_v52  ;;  %v1258_v59 = vadd.f32 %v2433_v54, %v4866_v3 }
 0x162   :  { %2912 = vmatprep.subr.mxu1 %v658_v52  ;;  %2890 = vmatpush3.msra.mxu0 %v658_v52  ;;  %v4978_v63 = vpop.f32.mrf.mxu0 }
 0x163   :  { %2928 = vmatpush3.msra.mxu1 %v658_v52  ;;  %2891 = vmatprep.mubr.f32.mxu0 %v46_v37  ;;  %v4976_v61 = vadd.f32 %v2477_v60, %v1258_v59 }
 0x164   :  { %2894 = vmatprep.mubr.f32.mxu1 %v112_v56  ;;  %2892 = vmatmul.mubr.f32.vlgmr.msra.gmra.mxu0 %v79_v57  ;;  %v4980_v0 = vpop.f32.mrf.mxu0 }
 0x165   :  { %2895 = vmatmul.mubr.f32.vlgmr.msra.gmra.mxu1 %v145_v58  ;;  %v4984_v2 = vpop.f32.mrf.mxu1 }
 0x167   :  { %v4988_v3 = vpop.f32.mrf.mxu1 }
 0x168   :  { %v4982_v1 = vpop.f32.mrf.mxu0 }
 0x16a   :  { %v4986_v4 = vpop.f32.mrf.mxu0 }
 0x16b   :  { %v4990_v6 = vpop.f32.mrf.mxu1 }
 0x16d   :  { %v4994_v8 = vpop.f32.mrf.mxu1 }
 0x16e   :  { %v2440_v5 = vpop.f32.mrf.mxu0 }
 0x170   :  { %v2441_v19 = vpop.f32.mrf.mxu0 }
 0x171   :  { %v4998_v55 = vpop.f32.mrf.mxu1 }
 0x173   :  { %v2485_v11 = vpop.f32.mrf.mxu1 }
 0x184   :  { %v4992_v7 = vpop.f32.mrf.mxu0 }
 0x185   :  { %v5002_v12 = vpop.f32.mrf.mxu1 }
 0x186   :  { %v4996_v9 = vpop.f32.mrf.mxu0 }
 0x187   :  { %v5006_v43 = vpop.f32.mrf.mxu1 }
 0x18a   :  { %v5000_v10 = vpop.f32.mrf.mxu0 }
 0x18c   :  { %v5004_v13 = vpop.f32.mrf.mxu0 }
 0x18d   :  { %v5010_v18 = vpop.f32.mrf.mxu1 }
 0x18f   :  { %v5014_v21 = vpop.f32.mrf.mxu1 }
 0x190   :  { %v5008_v14 = vpop.f32.mrf.mxu0 }
 0x192   :  { %v5012_v20 = vpop.f32.mrf.mxu0 }
 0x193   :  { %v5016_v23 = vpop.f32.mrf.mxu1 }
 0x195   :  { %v5018_v25 = vpop.f32.mrf.mxu1 }
 0x196   :  { %v2528_v22 = vpop.f32.mrf.mxu0 }
 0x198   :  { %v2529_v24 = vpop.f32.mrf.mxu0 }
 0x199   :  { %v5022_v27 = vpop.f32.mrf.mxu1 }
 0x19b   :  { %v5026_v62 = vpop.f32.mrf.mxu1 }
 0x1ac   :  { %v5020_v26 = vpop.f32.mrf.mxu0 }
 0x1ad   :  { %v5030_v31 = vpop.f32.mrf.mxu1 }
 0x1ae   :  { %v5024_v28 = vpop.f32.mrf.mxu0  ;;  %5173 = vst [vmem:[#allocation2_spill] sm:$0xff] %v5030_v31 }
 0x1af   :  { %v5034_v34 = vpop.f32.mrf.mxu1 }
 0x1b0   :  { %5174 = vst [vmem:[#allocation3_spill] sm:$0xff] %v5034_v34 }
 0x1b2   :  { %v5028_v29 = vpop.f32.mrf.mxu0 }
 0x1b4   :  { %v5032_v33 = vpop.f32.mrf.mxu0 }
 0x1b5   :  { %v5036_v35 = vpop.f32.mrf.mxu1 }
 0x1b7   :  { %v5040_v36 = vpop.f32.mrf.mxu1 }
 0x1b8   :  { %v5038_v15 = vpop.f32.mrf.mxu0 }
 0x1ba   :  { %v5042_v38 = vpop.f32.mrf.mxu0 }
 0x1bb   :  { %v5044_v39 = vpop.f32.mrf.mxu1 }
 0x1bd   :  { %v5046_v41 = vpop.f32.mrf.mxu1 }
 0x1be   :  { %v2616_v40 = vpop.f32.mrf.mxu0 }
 0x1c0   :  { %v2617_v45 = vpop.f32.mrf.mxu0 }
 0x1c1   :  { %v5050_v49 = vpop.f32.mrf.mxu1 }
 0x1c3   :  { %v5054_v51 = vpop.f32.mrf.mxu1 }
 0x1d4   :  { %v5048_v46 = vpop.f32.mrf.mxu0 }
 0x1d5   :  { %5175 = vst [vmem:[#allocation4_spill] sm:$0xff] %v5048_v46  ;;  %v5056_v52 = vpop.f32.mrf.mxu1 }
 0x1d6   :  { %v5052_v50 = vpop.f32.mrf.mxu0  ;;  %5177 = vst [vmem:[#allocation6_spill] sm:$0xff] %v5056_v52 }
 0x1d7   :  { %5176 = vst [vmem:[#allocation5_spill] sm:$0xff] %v5052_v50  ;;  %v5060_v53 = vpop.f32.mrf.mxu1 }
 0x1d8   :  { %5178 = vst [vmem:[#allocation7_spill] sm:$0xff] %v5060_v53  ;;  %v2354_v53 = vadd.f32 %v4953_v47, %v4943_v42 }
 0x1da   :  { %v5058_v16 = vpop.f32.mrf.mxu0 }
 0x1dc   :  { %v5062_v54 = vpop.f32.mrf.mxu0 }
 0x1dd   :  { %v5064_v37 = vpop.f32.mrf.mxu1 }
 0x1de   :  { %5179 = vst [vmem:[#allocation8_spill] sm:$0xff] %v5064_v37 }
 0x1df   :  { %v5068_v57 = vpop.f32.mrf.mxu1 }
 0x1e0   :  { %v5066_v56 = vpop.f32.mrf.mxu0  ;;  %5181 = vst [vmem:[#allocation10_spill] sm:$0xff] %v5068_v57  ;;  %v1103_v57 = vadd.f32 %v2354_v53, %v4746_v17  ;;  %v2480_v17 = vadd.f32 %v4988_v3, %v4984_v2  ;;  %v2527_v2 = vadd.f32 %v5012_v20, %v5008_v14  ;;  %v2618_v14 = vadd.f32 %v2617_v45, %v2616_v40  ;;  %v5188_v45 = vld [vmem:[#allocation2_spill] sm:$0xff] }
 0x1e1   :  { %5180 = vst [vmem:[#allocation9_spill] sm:$0xff] %v5066_v56  ;;  %v2565_v20 = vadd.f32 %v5006_v43, %v5002_v12  ;;  %v2662_v12 = vadd.f32 %v5054_v51, %v5050_v49 }
 0x1e2   :  { %v5070_v58 = vpop.f32.mrf.mxu0 }
 0x1e3   :  { %5182 = vst [vmem:[#allocation11_spill] sm:$0xff] %v5070_v58  ;;  %v5072_v59 = vpop.f32.mrf.mxu1 }
 0x1e4   :  { %5183 = vst [vmem:[#allocation12_spill] sm:$0xff] %v5072_v59  ;;  %v2398_v59 = vadd.f32 %v4955_v48, %v4945_v44  ;;  %v2486_v48 = vadd.f32 %v2485_v11, %v4998_v55 }
 0x1e5   :  { %v5074_v50 = vpop.f32.mrf.mxu1 }
 0x1e6   :  { %v2704_v60 = vpop.f32.mrf.mxu0  ;;  %5184 = vst [vmem:[#allocation13_spill] sm:$0xff] %v5074_v50  ;;  %v2436_v50 = vadd.f32 %v4980_v0, %v4978_v63  ;;  %v1188_v42 = vadd.f32 %v2398_v59, %v1103_v57  ;;  %v2483_v63 = vadd.f32 %v4994_v8, %v4990_v6  ;;  %v2568_v6 = vadd.f32 %v5014_v21, %v5010_v18  ;;  %v5190_v59 = vld [vmem:[#allocation4_spill] sm:$0xff] }
 0x1e7   :  { %v2609_v18 = vadd.f32 %v5024_v28, %v5020_v26  ;;  %v2615_v21 = vadd.f32 %v5042_v38, %v5038_v15  ;;  %v2659_v26 = vadd.f32 %v5046_v41, %v5044_v39  ;;  %v2700_v38 = vadd.f32 %v5062_v54, %v5058_v16 }
 0x1e8   :  { %v2705_v52 = vpop.f32.mrf.mxu0 }
 0x1e9   :  { %v5076_v46 = vpop.f32.mrf.mxu1  ;;  %v2706_v40 = vadd.f32 %v2705_v52, %v2704_v60 }
 0x1ea   :  { %5185 = vst [vmem:[#allocation14_spill] sm:$0xff] %v5076_v46  ;;  %v2442_v46 = vadd.f32 %v2441_v19, %v2440_v5  ;;  %v2530_v5 = vadd.f32 %v2529_v24, %v2528_v22 }
 0x1eb   :  { %v5082_v37 = vpop.f32.mrf.mxu1 }
 0x1ec   :  { %v1273_v44 = vadd.f32 %v2442_v46, %v1188_v42  ;;  %v5192_v42 = vld [vmem:[#allocation9_spill] sm:$0xff] }
 0x1ee   :  { %v1358_v19 = vadd.f32 %v2486_v48, %v1273_v44 }
 0x1f0   :  { %v1443_v8 = vadd.f32 %v2530_v5, %v1358_v19  ;;  %v5195_v5 = vld [vmem:[#allocation10_spill] sm:$0xff]  ;;  %v5198_v19 = vld [vmem:[#allocation13_spill] sm:$0xff] }
 0x1f1   :  { %v5196_v54 = vld [vmem:[#allocation14_spill] sm:$0xff] }
 0x1f2   :  { %v2750_v60 = vadd.f32 %v5082_v37, %v5196_v54 }
 0x1fc   :  { %v5078_v34 = vpop.f32.mrf.mxu0 }
 0x1fd   :  { %5186 = vst [vmem:[#allocation15_spill] sm:$0xff] %v5078_v34  ;;  %v5089_v58 = vpop.f32.mrf.mxu1  ;;  %v2439_v34 = vadd.f32 %v4986_v4, %v4982_v1  ;;  %v2524_v4 = vadd.f32 %v5004_v13, %v5000_v10  ;;  %v2574_v10 = vadd.f32 %v5026_v62, %v5022_v27 }
 0x1fe   :  { %v5084_v56 = vpop.f32.mrf.mxu0 }
 0x1ff   :  { %5187 = vst [vmem:[#allocation16_spill] sm:$0xff] %v5084_v56  ;;  %v5097_v47 = vpop.f32.mrf.mxu1  ;;  %v1263_v56 = vadd.f32 %v2436_v50, %v4890_v32  ;;  %v1268_v53 = vadd.f32 %v2439_v34, %v4911_v30  ;;  %v2521_v32 = vadd.f32 %v4996_v9, %v4992_v7  ;;  %v2571_v7 = vadd.f32 %v5018_v25, %v5016_v23 }
 0x200   :  { %v2612_v9 = vadd.f32 %v5032_v33, %v5028_v29  ;;  %v1528_v62 = vadd.f32 %v2574_v10, %v1443_v8  ;;  %v2656_v25 = vadd.f32 %v5040_v36, %v5036_v35  ;;  %v5191_v35 = vld [vmem:[#allocation5_spill] sm:$0xff]  ;;  %v5199_v8 = vld [vmem:[#allocation6_spill] sm:$0xff]  ;;  %v5200_v10 = vld [vmem:[#allocation7_spill] sm:$0xff] }
 0x201   :  { %v1348_v3 = vadd.f32 %v2480_v17, %v1263_v56  ;;  %v1353_v55 = vadd.f32 %v2483_v63, %v1268_v53  ;;  %v1428_v13 = vadd.f32 %v2521_v32, %v4976_v61  ;;  %v5189_v56 = vld [vmem:[#allocation3_spill] sm:$0xff]  ;;  %v2697_v36 = vadd.f32 %v5191_v35, %v5190_v59 }
 0x202   :  { %v5095_v31 = vpop.f32.mrf.mxu0  ;;  %v1613_v29 = vadd.f32 %v2618_v14, %v1528_v62  ;;  %v2653_v57 = vadd.f32 %v5189_v56, %v5188_v45  ;;  %v5193_v17 = vld [vmem:[#allocation11_spill] sm:$0xff] }
 0x203   :  { %v1433_v34 = vadd.f32 %v2524_v4, %v1348_v3  ;;  %v1438_v22 = vadd.f32 %v2527_v2, %v1353_v55  ;;  %v1513_v46 = vadd.f32 %v2565_v20, %v1428_v13  ;;  %v2703_v49 = vadd.f32 %v5193_v17, %v5192_v42  ;;  %v5194_v4 = vld [vmem:[#allocation8_spill] sm:$0xff] }
 0x204   :  { %v2787_v0 = vpop.f32.mrf.mxu0  ;;  %v1698_v44 = vadd.f32 %v2662_v12, %v1613_v29  ;;  %v2744_v16 = vadd.f32 %v5195_v5, %v5194_v4  ;;  %v5197_v3 = vld [vmem:[#allocation12_spill] sm:$0xff]  ;;  %v2741_v13 = vadd.f32 %v5200_v10, %v5199_v8  ;;  %v5201_v14 = vld [vmem:[#allocation15_spill] sm:$0xff]  ;;  %v2829_v29 = vadd.f32 %v5097_v47, %v5089_v58 }
 0x205   :  { %v5106_v1 = vpop.f32.mrf.mxu1  ;;  %v1518_v61 = vadd.f32 %v2568_v6, %v1433_v34  ;;  %v1523_v50 = vadd.f32 %v2571_v7, %v1438_v22  ;;  %v1598_v43 = vadd.f32 %v2609_v18, %v1513_v46  ;;  %v2747_v55 = vadd.f32 %v5198_v19, %v5197_v3 }
 0x206   :  { %v1783_v52 = vadd.f32 %v2706_v40, %v1698_v44  ;;  %v2788_v34 = vadd.f32 %v2787_v0, %v5095_v31  ;;  %v5202_v20 = vld [vmem:[#allocation16_spill] sm:$0xff] }
 0x207   :  { %v2831_v11 = vpop.f32.mrf.mxu1  ;;  %v1603_v23 = vadd.f32 %v2612_v9, %v1518_v61  ;;  %v1608_v33 = vadd.f32 %v2615_v21, %v1523_v50  ;;  %v1683_v48 = vadd.f32 %v2653_v57, %v1598_v43  ;;  %v2785_v18 = vadd.f32 %v5202_v20, %v5201_v14 }
 0x208   :  { %v2789_v30 = vpop.f32.mrf.mxu0  ;;  %v1868_v9 = vadd.f32 %v2750_v60, %v1783_v52  ;;  %v2832_v46 = vadd.f32 %v2831_v11, %v5106_v1 }
 0x209   :  { %v1688_v51 = vadd.f32 %v2656_v25, %v1603_v23  ;;  %v1693_v53 = vadd.f32 %v2659_v26, %v1608_v33  ;;  %v1768_v32 = vadd.f32 %v2697_v36, %v1683_v48 }
 0x20a   :  { %v2790_v24 = vpop.f32.mrf.mxu0 }
 0x20b   :  { %v2833_v27 = vpop.f32.mrf.mxu1  ;;  %v1773_v63 = vadd.f32 %v2700_v38, %v1688_v51  ;;  %v1778_v2 = vadd.f32 %v2703_v49, %v1693_v53  ;;  %v2791_v21 = vadd.f32 %v2790_v24, %v2789_v30  ;;  %v1853_v61 = vadd.f32 %v2741_v13, %v1768_v32 }
 0x20d   :  { %v2834_v15 = vpop.f32.mrf.mxu1  ;;  %v1858_v7 = vadd.f32 %v2744_v16, %v1773_v63  ;;  %v1863_v37 = vadd.f32 %v2747_v55, %v1778_v2  ;;  %v1938_v25 = vadd.f32 %v2785_v18, %v1853_v61 }
 0x20e   :  { %v2792_v28 = vpop.f32.mrf.mxu0  ;;  %v2835_v0 = vadd.f32 %v2834_v15, %v2833_v27 }
 0x20f   :  { %v1943_v62 = vadd.f32 %v2788_v34, %v1858_v7  ;;  %v1948_v31 = vadd.f32 %v2791_v21, %v1863_v37  ;;  %v2023_v30 = vadd.f32 %v2829_v29, %v1938_v25 }
 0x210   :  { %v2793_v39 = vpop.f32.mrf.mxu0 }
 0x211   :  { %v2836_v41 = vpop.f32.mrf.mxu1  ;;  %v2794_v6 = vadd.f32 %v2793_v39, %v2792_v28  ;;  %v2028_v12 = vadd.f32 %v2832_v46, %v1943_v62  ;;  %v2033_v24 = vadd.f32 %v2835_v0, %v1948_v31 }
 0x213   :  { %v2837_v22 = vpop.f32.mrf.mxu1  ;;  %v1953_v50 = vadd.f32 %v2794_v6, %v1868_v9 }
 0x214   :  { %v2838_v23 = vadd.f32 %v2837_v22, %v2836_v41 }
 0x216   :  { %v2038_v43 = vadd.f32 %v2838_v23, %v1953_v50 }
 0x224   :  { %v2893_v33 = vpop.f32.mrf.mxu0 }
 0x225   :  { %v2896_v26 = vpop.f32.mrf.mxu1  ;;  %v2113_v28 = vadd.f32 %v2893_v33, %v2028_v12 }
 0x226   :  { %v2123_v38 = vadd.f32 %v2896_v26, %v2038_v43  ;;  %v2107_v40 = vpop.f32.mrf.mxu0 }
 0x227   :  { %v2117_v45 = vpop.f32.mrf.mxu1  ;;  %2127 = vst [vmem:[%s5172_s3 + $0x8] sm:$0xff] %v2113_v28  ;;  %v2108_v1 = vadd.f32 %v2107_v40, %v2023_v30 }
 0x228   :  { %2129 = vst [vmem:[%s5172_s3 + $0x18] sm:$0xff] %v2123_v38  ;;  %v2118_v58 = vadd.f32 %v2117_v45, %v2033_v24 }
 0x229   :  { %2126 = vst [vmem:[%s5172_s3] sm:$0xff] %v2108_v1 }
 0x22a   :  { %2128 = vst [vmem:[%s5172_s3 + $0x10] sm:$0xff] %v2118_v58 }

// kernel: forward.6
= control target key start
LH: loop header
LB: loop body
LE: loop exit
PB: predicated region body
PF: predicated region fallthrough
CT: control target
= control target key end

     0   :  { %v2000_v3 = vmov 0.0   ;;  %vm55_vm0 = vcmask 130048   ;;  %vm377_vm1 = vcmask 1043456   ;;  %vm349_vm2 = vcmask 123904   ;;  %s2601_s1 = inlined_call_operand.vmem [shape: f32[16,256], index: 1, kind: input, shape index: {}]   ;;  %s2602_s0 = inlined_call_operand.vmem [shape: f32[2,16], index: 0, kind: input, shape index: {}]   ;;  %s2603_s3 = inlined_call_operand.vmem [shape: f32[256,4], index: 3, kind: input, shape index: {}]   ;;  %s2604_s5 = inlined_call_operand.vmem [shape: f32[256,16], index: 5, kind: input, shape index: {}]   ;;  %s2605_s2 = inlined_call_operand.vmem [shape: f32[1,256], index: 2, kind: input, shape index: {}]   ;;  %s2606_s7 = inlined_call_operand.vmem [shape: f32[4,1024], index: 7, kind: input, shape index: {}]   ;;  %s2607_s4 = inlined_call_operand.vmem [shape: f32[1,4], index: 4, kind: input, shape index: {}]   ;;  %s2608_s6 = inlined_call_operand.vmem [shape: f32[1,16], index: 6, kind: input, shape index: {}]   ;;  %s2609_s9 = inlined_call_operand.vmem [shape: bf16[16,4096], index: 9, kind: input, shape index: {}]   ;;  %s2610_s8 = inlined_call_operand.vmem [shape: f32[1,1024], index: 8, kind: input, shape index: {}]   ;;  %s2611_s10 = inlined_call_operand.vmem [shape: f32[2,1024], index: 10, kind: output, shape index: {0}]   ;;  %s2612_s11 = inlined_call_operand.vmem [shape: f32[2,4096], index: 11, kind: output, shape index: {1}]  }
   0x1   :  { %v42_v0 = vld [vmem:[%s2601_s1 + $0x18] sm:$0xff]  ;;  %v41_v1 = vld [vmem:[%s2601_s1 + $0x10] sm:$0xff]  ;;  %v40_v2 = vld [vmem:[%s2601_s1 + $0x8] sm:$0xff]  ;;  %123 = vmatprep.mubr.f32.mxu0 %v2000_v3  ;;  %vm373_vm3 = vcmask 31744   ;;  %vm736_vm4 = vcmask 1041408  }
   0x2   :  { %87 = vmatprep.subr.mxu0 %v42_v0  ;;  %v39_v4 = vld [vmem:[%s2601_s1] sm:$0xff]  ;;  %v161_v5 = vld [vmem:[%s2603_s3 + $0xf8] sm:$0xff]  ;;  %v160_v10 = vld [vmem:[%s2603_s3 + $0xf0] sm:$0xff] }
   0x3   :  { %88 = vmatpush1.msra.mxu0 %v41_v1  ;;  %v38_v6 = vld [vmem:[%s2602_s0] sm:$0x3]  ;;  %1917 = vmatprep.subr.mxu1 %v161_v5  ;;  %v271_v7 = vld [vmem:[%s2604_s5 + $0xf8] sm:$0xff]  ;;  %v144_v11 = vld [vmem:[%s2603_s3 + $0x70] sm:$0xff] }
   0x4   :  { %v145_v8 = vld [vmem:[%s2603_s3 + $0x78] sm:$0xff]  ;;  %89 = vmatprep.subr.mxu0 %v40_v2  ;;  %v270_v12 = vld [vmem:[%s2604_s5 + $0xf0] sm:$0xff]  ;;  %v159_v13 = vld [vmem:[%s2603_s3 + $0xe8] sm:$0xff] }
   0x5   :  { %1918 = vmatpush3.msra.mxu1 %v145_v8  ;;  %v255_v9 = vld [vmem:[%s2604_s5 + $0x78] sm:$0xff]  ;;  %90 = vmatpush1.msra.mxu0 %v39_v4  ;;  %v254_v14 = vld [vmem:[%s2604_s5 + $0x70] sm:$0xff]  ;;  %v143_v15 = vld [vmem:[%s2603_s3 + $0x68] sm:$0xff] }
   0x6   :  { %1919 = vmatprep.subr.mxu1 %v160_v10  ;;  %1854 = vmatmul.mubr.msk.f32.vlgmr.msra.gmra.mxu0 %vm55_vm0, %v38_v6  ;;  %v269_v16 = vld [vmem:[%s2604_s5 + $0xe8] sm:$0xff]  ;;  %v158_v17 = vld [vmem:[%s2603_s3 + $0xe0] sm:$0xff]  ;;  %v157_v21 = vld [vmem:[%s2603_s3 + $0xd8] sm:$0xff] }
   0x7   :  { %1952 = vmatprep.subr.mxu0 %v271_v7  ;;  %1920 = vmatpush3.msra.mxu1 %v144_v11  ;;  %v253_v18 = vld [vmem:[%s2604_s5 + $0x68] sm:$0xff]  ;;  %v142_v19 = vld [vmem:[%s2603_s3 + $0x60] sm:$0xff]  ;;  %v141_v23 = vld [vmem:[%s2603_s3 + $0x58] sm:$0xff]  ;;  %v45_v7 = vlaneseq }
   0x8   :  { %1953 = vmatpush3.msra.mxu0 %v255_v9  ;;  %1921 = vmatprep.subr.mxu1 %v159_v13  ;;  %v268_v20 = vld [vmem:[%s2604_s5 + $0xe0] sm:$0xff]  ;;  %v267_v24 = vld [vmem:[%s2604_s5 + $0xd8] sm:$0xff]  ;;  %v156_v25 = vld [vmem:[%s2603_s3 + $0xd0] sm:$0xff] }
   0x9   :  { %1954 = vmatprep.subr.mxu0 %v270_v12  ;;  %1922 = vmatpush3.msra.mxu1 %v143_v15  ;;  %v252_v22 = vld [vmem:[%s2604_s5 + $0x60] sm:$0xff]  ;;  %v251_v26 = vld [vmem:[%s2604_s5 + $0x58] sm:$0xff]  ;;  %v140_v27 = vld [vmem:[%s2603_s3 + $0x50] sm:$0xff]  ;;  %v2272_v8 = vshrl.u32 %v45_v7, 7 }
   0xa   :  { %1955 = vmatpush3.msra.mxu0 %v254_v14  ;;  %1923 = vmatprep.subr.mxu1 %v158_v17  ;;  %v266_v28 = vld [vmem:[%s2604_s5 + $0xd0] sm:$0xff]  ;;  %v155_v29 = vld [vmem:[%s2603_s3 + $0xc8] sm:$0xff]  ;;  %v154_v33 = vld [vmem:[%s2603_s3 + $0xc0] sm:$0xff] }
   0xb   :  { %1956 = vmatprep.subr.mxu0 %v269_v16  ;;  %1924 = vmatpush3.msra.mxu1 %v142_v19  ;;  %v250_v30 = vld [vmem:[%s2604_s5 + $0x50] sm:$0xff]  ;;  %v139_v31 = vld [vmem:[%s2603_s3 + $0x48] sm:$0xff]  ;;  %v138_v35 = vld [vmem:[%s2603_s3 + $0x40] sm:$0xff]  ;;  %v51_v9 = vsub.s32 1, %v2272_v8  ;;  %v47_v10 = vsub.s32 0, %v2272_v8 }
   0xc   :  { %1957 = vmatpush3.msra.mxu0 %v253_v18  ;;  %1925 = vmatprep.subr.mxu1 %v157_v21  ;;  %v265_v32 = vld [vmem:[%s2604_s5 + $0xc8] sm:$0xff]  ;;  %v264_v36 = vld [vmem:[%s2604_s5 + $0xc0] sm:$0xff]  ;;  %v153_v37 = vld [vmem:[%s2603_s3 + $0xb8] sm:$0xff] }
   0xd   :  { %1958 = vmatprep.subr.mxu0 %v268_v20  ;;  %1926 = vmatpush3.msra.mxu1 %v141_v23  ;;  %v249_v34 = vld [vmem:[%s2604_s5 + $0x48] sm:$0xff]  ;;  %v248_v38 = vld [vmem:[%s2604_s5 + $0x40] sm:$0xff]  ;;  %v137_v39 = vld [vmem:[%s2603_s3 + $0x38] sm:$0xff] }
   0xe   :  { %1959 = vmatpush3.msra.mxu0 %v252_v22  ;;  %1927 = vmatprep.subr.mxu1 %v156_v25  ;;  %v263_v40 = vld [vmem:[%s2604_s5 + $0xb8] sm:$0xff]  ;;  %v152_v41 = vld [vmem:[%s2603_s3 + $0xb0] sm:$0xff]  ;;  %v151_v45 = vld [vmem:[%s2603_s3 + $0xa8] sm:$0xff] }
   0xf   :  { %1960 = vmatprep.subr.mxu0 %v267_v24  ;;  %1928 = vmatpush3.msra.mxu1 %v140_v27  ;;  %v247_v42 = vld [vmem:[%s2604_s5 + $0x38] sm:$0xff]  ;;  %v136_v43 = vld [vmem:[%s2603_s3 + $0x30] sm:$0xff]  ;;  %v135_v47 = vld [vmem:[%s2603_s3 + $0x28] sm:$0xff] }
  0x10   :  { %1961 = vmatpush3.msra.mxu0 %v251_v26  ;;  %1929 = vmatprep.subr.mxu1 %v155_v29  ;;  %v262_v44 = vld [vmem:[%s2604_s5 + $0xb0] sm:$0xff]  ;;  %v261_v48 = vld [vmem:[%s2604_s5 + $0xa8] sm:$0xff]  ;;  %v150_v49 = vld [vmem:[%s2603_s3 + $0xa0] sm:$0xff] }
  0x11   :  { %1962 = vmatprep.subr.mxu0 %v266_v28  ;;  %1930 = vmatpush3.msra.mxu1 %v139_v31  ;;  %v246_v46 = vld [vmem:[%s2604_s5 + $0x30] sm:$0xff]  ;;  %v245_v50 = vld [vmem:[%s2604_s5 + $0x28] sm:$0xff]  ;;  %v134_v51 = vld [vmem:[%s2603_s3 + $0x20] sm:$0xff] }
  0x12   :  { %1963 = vmatpush3.msra.mxu0 %v250_v30  ;;  %1931 = vmatprep.subr.mxu1 %v154_v33  ;;  %v260_v52 = vld [vmem:[%s2604_s5 + $0xa0] sm:$0xff]  ;;  %v149_v53 = vld [vmem:[%s2603_s3 + $0x98] sm:$0xff]  ;;  %v148_v58 = vld [vmem:[%s2603_s3 + $0x90] sm:$0xff] }
  0x13   :  { %1964 = vmatprep.subr.mxu0 %v265_v32  ;;  %1932 = vmatpush3.msra.mxu1 %v138_v35  ;;  %v244_v54 = vld [vmem:[%s2604_s5 + $0x20] sm:$0xff]  ;;  %v133_v55 = vld [vmem:[%s2603_s3 + $0x18] sm:$0xff]  ;;  %v258_v59 = vld [vmem:[%s2604_s5 + $0x90] sm:$0xff] }
  0x14   :  { %1965 = vmatpush3.msra.mxu0 %v249_v34  ;;  %1933 = vmatprep.subr.mxu1 %v153_v37  ;;  %v259_v56 = vld [vmem:[%s2604_s5 + $0x98] sm:$0xff]  ;;  %v132_v60 = vld [vmem:[%s2603_s3 + $0x10] sm:$0xff]  ;;  %v147_v62 = vld [vmem:[%s2603_s3 + $0x88] sm:$0xff] }
  0x15   :  { %1966 = vmatprep.subr.mxu0 %v264_v36  ;;  %1934 = vmatpush3.msra.mxu1 %v137_v39  ;;  %v243_v57 = vld [vmem:[%s2604_s5 + $0x18] sm:$0xff]  ;;  %v242_v61 = vld [vmem:[%s2604_s5 + $0x10] sm:$0xff]  ;;  %v257_v63 = vld [vmem:[%s2604_s5 + $0x88] sm:$0xff] }
  0x16   :  { %1967 = vmatpush3.msra.mxu0 %v248_v38  ;;  %1935 = vmatprep.subr.mxu1 %v152_v41  ;;  %v131_v0 = vld [vmem:[%s2603_s3 + $0x8] sm:$0xff]  ;;  %v146_v2 = vld [vmem:[%s2603_s3 + $0x80] sm:$0xff]  ;;  %v363_v22 = vld [vmem:[%s2606_s7 + $0x10] sm:$0xff] }
  0x17   :  { %1968 = vmatprep.subr.mxu0 %v263_v40  ;;  %1936 = vmatpush3.msra.mxu1 %v136_v43  ;;  %v241_v1 = vld [vmem:[%s2604_s5 + $0x8] sm:$0xff]  ;;  %v256_v4 = vld [vmem:[%s2604_s5 + $0x80] sm:$0xff]  ;;  %v364_v23 = vld [vmem:[%s2606_s7 + $0x18] sm:$0xff]  ;;  %v371_v24 = vcombine.high %v363_v22, %v363_v22 }
  0x18   :  { %1969 = vmatpush3.msra.mxu0 %v247_v42  ;;  %1937 = vmatprep.subr.mxu1 %v151_v45  ;;  %v130_v5 = vld [vmem:[%s2603_s3] sm:$0xff]  ;;  %v362_v19 = vld [vmem:[%s2606_s7 + $0x8] sm:$0xff]  ;;  %v372_v25 = vcombine.high %v364_v23, %v364_v23 }
  0x19   :  { %1970 = vmatprep.subr.mxu0 %v262_v44  ;;  %1938 = vmatpush3.msra.mxu1 %v135_v47  ;;  %v240_v6 = vld [vmem:[%s2604_s5] sm:$0xff]  ;;  %v370_v21 = vcombine.high %v362_v19, %v362_v19  ;;  %v812_v44 = vld [vmem:[%s2609_s9 + $0x8] sm:$0xff] }
  0x1a   :  { %1971 = vmatpush3.msra.mxu0 %v246_v46  ;;  %1939 = vmatprep.subr.mxu1 %v150_v49  ;;  %v43_v11 = vld [vmem:[%s2605_s2] sm:$0x3]  ;;  %v828_v46 = vld [vmem:[%s2609_s9 + $0x88] sm:$0xff] }
  0x1b   :  { %1972 = vmatprep.subr.mxu0 %v261_v48  ;;  %1940 = vmatpush3.msra.mxu1 %v134_v51  ;;  %v52_v12 = vrot.slane %v43_v11, %v51_v9  ;;  %v48_v13 = vrot.slane %v43_v11, %v47_v10  ;;  %v361_v18 = vld [vmem:[%s2606_s7] sm:$0xff]  ;;  %v1871_v48 = vcombine.low %v812_v44, %v828_v46  ;;  %v2338_v51 = vld [vmem:[%s2609_s9 + $0x90] sm:$0xff] }
  0x1c   :  { %1973 = vmatpush3.msra.mxu0 %v245_v50  ;;  %1941 = vmatprep.subr.mxu1 %v149_v53  ;;  %v369_v20 = vcombine.high %v361_v18, %v361_v18  ;;  %v1855_v28 = vld [vmem:[%s2607_s4] ss:$0 sm:$0xff]  ;;  %v1872_v49 = vcombine.high %v812_v44, %v828_v46  ;;  %v2333_v50 = vld [vmem:[%s2609_s9 + $0x10] sm:$0xff]  ;;  %v2001_v53 = vmov 0  }
  0x1d   :  { %1974 = vmatprep.subr.mxu0 %v260_v52  ;;  %1942 = vmatpush3.msra.mxu1 %v133_v55  ;;  %v1856_v31 = vld [vmem:[%s2608_s6] ss:$0 sm:$0xff]  ;;  %v2343_v52 = vld [vmem:[%s2609_s9 + $0x18] sm:$0xff]  ;;  %v1874_v55 = vcombine.high %v2333_v50, %v2338_v51 }
  0x1e   :  { %1975 = vmatpush3.msra.mxu0 %v244_v54  ;;  %1943 = vmatprep.subr.mxu1 %v148_v58  ;;  %v811_v43 = vld [vmem:[%s2609_s9] sm:$0xff]  ;;  %v1873_v54 = vcombine.low %v2333_v50, %v2338_v51  ;;  %v818_v50 = vld [vmem:[%s2609_s9 + $0x38] sm:$0xff] }
  0x1f   :  { %1976 = vmatprep.subr.mxu0 %v259_v56  ;;  %1944 = vmatpush3.msra.mxu1 %v132_v60  ;;  %v2353_v56 = vld [vmem:[%s2609_s9 + $0x98] sm:$0xff]  ;;  %v678_v60 = vld [vmem:[%s2610_s8] sm:$0xff] }
  0x20   :  { %1977 = vmatpush3.msra.mxu0 %v243_v57  ;;  %1945 = vmatprep.subr.mxu1 %v147_v62  ;;  %v1875_v57 = vcombine.low %v2343_v52, %v2353_v56  ;;  %v1876_v58 = vcombine.high %v2343_v52, %v2353_v56  ;;  %v683_v62 = vrot.slane %v678_v60, %v47_v10  ;;  %v834_v51 = vld [vmem:[%s2609_s9 + $0xb8] sm:$0xff] }
  0x21   :  { %1978 = vmatprep.subr.mxu0 %v258_v59  ;;  %1946 = vmatpush3.msra.mxu1 %v131_v0  ;;  %v690_v59 = vsub.s32 2, %v2272_v8  ;;  %v698_v0 = vsub.s32 4, %v2272_v8 }
  0x22   :  { %1979 = vmatpush3.msra.mxu0 %v242_v61  ;;  %1947 = vmatprep.subr.mxu1 %v146_v2  ;;  %v694_v61 = vsub.s32 3, %v2272_v8 }
  0x23   :  { %1980 = vmatprep.subr.mxu0 %v257_v63  ;;  %1948 = vmatpush3.msra.mxu1 %v130_v5  ;;  %v691_v63 = vrot.slane %v678_v60, %v690_v59  ;;  %v699_v10 = vrot.slane %v678_v60, %v698_v0  ;;  %v832_v0 = vld [vmem:[%s2609_s9 + $0xa8] sm:$0xff] }
  0x24   :  { %1981 = vmatpush3.msra.mxu0 %v241_v1  ;;  %1857 = vmatprep.subr.msk.mxu1 %vm377_vm1, %v369_v20  ;;  %v687_v1 = vrot.slane %v678_v60, %v51_v9  ;;  %v695_v2 = vrot.slane %v678_v60, %v694_v61 }
  0x25   :  { %1982 = vmatprep.subr.mxu0 %v256_v4  ;;  %v702_v4 = vsub.s32 5, %v2272_v8 }
  0x26   :  { %1983 = vmatpush3.msra.mxu0 %v240_v6 }
  0x27   :  { %1860 = vmatprep.subr.msk.mxu0 %vm377_vm1, %v370_v21 }
  0xc6   :  { %v125_v14 = vpop.f32.mrf.mxu0 }
  0xc7   :  { %v126_v17 = vadd.f32 %v125_v14, %v48_v13 }
  0xc8   :  { %v127_v15 = vpop.f32.mrf.mxu0 }
  0xc9   :  { %v128_v16 = vadd.f32 %v127_v15, %v52_v12  ;;  %v706_v12 = vsub.s32 6, %v2272_v8  ;;  %v710_v15 = vsub.s32 7, %v2272_v8 }
  0xcb   :  { %233 = vmatprep.mubr.f32.mxu1 %v128_v16  ;;  %343 = vmatprep.mubr.f32.mxu0 %v128_v16 }
  0xcc   :  { %234 = vmatmul.mubr.f32.vlgmr.msra.gmra.mxu1 %v126_v17  ;;  %344 = vmatmul.mubr.f32.vlgmr.msra.gmra.mxu0 %v126_v17 }
  0xcd   :  { %529 = vmatprep.mubr.f32.mxu0 %v2000_v3  ;;  %458 = vmatprep.mubr.f32.mxu1 %v2000_v3 }
  0xce   :  { %1861 = vmatpush1.msk.msra.mxu0 %vm377_vm1, %v362_v19  ;;  %1858 = vmatpush1.msk.msra.mxu1 %vm377_vm1, %v361_v18  ;;  %v703_v18 = vrot.slane %v678_v60, %v702_v4 }
  0xcf   :  { %1863 = vmatprep.subr.msk.mxu1 %vm377_vm1, %v371_v24  ;;  %1866 = vmatprep.subr.msk.mxu0 %vm377_vm1, %v372_v25 }
 0x18c   :  { %v1949_v26 = vpop.f32.mrf.mxu1  ;;  %v1984_v27 = vpop.f32.mrf.mxu0 }
 0x18e   :  { %v1950_v29 = vpop.f32.mrf.mxu1  ;;  %v1985_v30 = vpop.f32.mrf.mxu0 }
 0x18f   :  { %v1951_v32 = vadd.f32 %v1950_v29, %v1949_v26  ;;  %v1986_v33 = vadd.f32 %v1985_v30, %v1984_v27  ;;  %v711_v26 = vrot.slane %v678_v60, %v710_v15  ;;  %v1883_v15 = vcombine.low %v818_v50, %v834_v51 }
 0x191   :  { %v236_v34 = vadd.f32 %v1951_v32, %v1855_v28  ;;  %v346_v35 = vadd.f32 %v1986_v33, %v1856_v31 }
 0x193   :  { %v239_v36 = vmul.f32 %v236_v34, %v236_v34  ;;  %v350_v37 = vsel %vm349_vm2, %v346_v35, -inf }
 0x194   :  { %351 = vmax.xlane.f32.xlu0 %v350_v37 }
 0x195   :  { %1859 = vmatmul.mubr.msk.f32.vlgmr.msra.gmra.mxu1 %vm373_vm3, %v239_v36  ;;  %1862 = vmatmul.mubr.msk.f32.vlgmr.msra.gmra.mxu0 %vm373_vm3, %v239_v36 }
 0x196   :  { %1864 = vmatpush1.msk.msra.mxu1 %vm377_vm1, %v363_v22  ;;  %600 = vmatprep.mubr.f32.mxu1 %v2000_v3 }
 0x197   :  { %1867 = vmatpush1.msk.msra.mxu0 %vm377_vm1, %v364_v23  ;;  %671 = vmatprep.mubr.f32.mxu0 %v2000_v3  ;;  %v827_v3 = vld [vmem:[%s2609_s9 + $0x80] sm:$0xff]  ;;  %v707_v23 = vrot.slane %v678_v60, %v706_v12 }
 0x198   :  { %v1870_v45 = vcombine.high %v811_v43, %v827_v3  ;;  %v1869_v47 = vcombine.low %v811_v43, %v827_v3  ;;  %1061 = vmatprep.subr.bf16.mxu0 %v1872_v49  ;;  %v815_v60 = vld [vmem:[%s2609_s9 + $0x20] sm:$0xff] }
 0x199   :  { %1865 = vmatmul.mubr.msk.f32.vlgmr.msra.gmra.mxu1 %vm373_vm3, %v239_v36  ;;  %1868 = vmatmul.mubr.msk.f32.vlgmr.msra.gmra.mxu0 %vm373_vm3, %v239_v36  ;;  %v835_v12 = vld [vmem:[%s2609_s9 + $0xc0] sm:$0xff] }
 0x19a   :  { %1020 = vmatprep.subr.bf16.mxu1 %v1870_v45  ;;  %1062 = vmatpush1.bf16.msra.mxu0 %v1871_v48 }
 0x19b   :  { %1021 = vmatpush1.bf16.msra.mxu1 %v1869_v47  ;;  %1038 = vmatprep.mubr.bf16.mxu1 %v2001_v53 }
 0x19c   :  { %1079 = vmatprep.mubr.bf16.mxu0 %v2001_v53  ;;  %1102 = vmatprep.subr.bf16.mxu1 %v1874_v55 }
 0x19d   :  { %1143 = vmatprep.subr.bf16.mxu0 %v1876_v58 }
 0x21d   :  { %v352_v38 = vpop.xlane.xlu0 %351 }
 0x21e   :  { %v353_v39 = vsub.f32 %v346_v35, %v352_v38 }
 0x220   :  { %v354_v40 = vmul.f32 1.442695, %v353_v39 }
 0x222   :  { %1994 = vpow2.f32 %v354_v40 }
 0x22f   :  { %v2314_v41 = vpop.eup %1994 }
 0x230   :  { %v356_v42 = vsel %vm349_vm2, %v2314_v41, 0.0 }
 0x231   :  { %357 = vadd.xlane.f32.xlu0 %v356_v42 }
 0x255   :  { %v460_v5 = vpop.f32.mrf.mxu1  ;;  %v531_v6 = vpop.f32.mrf.mxu0 }
 0x256   :  { %v2371_v7 = vmul.f32 %v683_v62, %v460_v5  ;;  %v2373_v11 = vmul.f32 %v691_v63, %v531_v6  ;;  %v831_v62 = vld [vmem:[%s2609_s9 + $0xa0] sm:$0xff]  ;;  %v816_v63 = vld [vmem:[%s2609_s9 + $0x28] sm:$0xff]  ;;  %v833_v5 = vld [vmem:[%s2609_s9 + $0xb0] sm:$0xff] }
 0x257   :  { %v462_v13 = vpop.f32.mrf.mxu1  ;;  %v533_v14 = vpop.f32.mrf.mxu0  ;;  %v1880_v4 = vcombine.high %v816_v63, %v832_v0  ;;  %v1877_v52 = vcombine.low %v815_v60, %v831_v62  ;;  %v819_v6 = vld [vmem:[%s2609_s9 + $0x40] sm:$0xff] }
 0x258   :  { %v728_v16 = vmul.f32 %v2371_v7, %v2371_v7  ;;  %v2379_v9 = vmul.f32 %v687_v1, %v462_v13  ;;  %v2381_v17 = vmul.f32 %v695_v2, %v533_v14  ;;  %v730_v21 = vmul.f32 %v2373_v11, %v2373_v11  ;;  %v820_v13 = vld [vmem:[%s2609_s9 + $0x48] sm:$0xff] }
 0x259   :  { %v602_v19 = vpop.f32.mrf.mxu1  ;;  %v673_v20 = vpop.f32.mrf.mxu0  ;;  %v1878_v2 = vcombine.high %v815_v60, %v831_v62  ;;  %v836_v14 = vld [vmem:[%s2609_s9 + $0xc8] sm:$0xff] }
 0x25a   :  { %v729_v22 = vmul.f32 %v2379_v9, %v2379_v9  ;;  %v2387_v24 = vmul.f32 %v699_v10, %v602_v19  ;;  %v737_v27 = vsel %vm736_vm4, %v728_v16, 0.0  ;;  %v731_v29 = vmul.f32 %v2381_v17, %v2381_v17  ;;  %v821_v19 = vld [vmem:[%s2609_s9 + $0x50] sm:$0xff] }
 0x25b   :  { %v604_v25 = vpop.f32.mrf.mxu1  ;;  %v675_v32 = vpop.f32.mrf.mxu0  ;;  %v740_v33 = vsel %vm736_vm4, %v730_v21, 0.0  ;;  %v2398_v35 = vmul.f32 %v707_v23, %v673_v20  ;;  %v1886_v16 = vcombine.high %v819_v6, %v835_v12  ;;  %v837_v20 = vld [vmem:[%s2609_s9 + $0xd0] sm:$0xff]  ;;  %v822_v21 = vld [vmem:[%s2609_s9 + $0x58] sm:$0xff]  ;;  %v1885_v23 = vcombine.low %v819_v6, %v835_v12 }
 0x25c   :  { %v738_v28 = vsel %vm736_vm4, %v729_v22, 0.0  ;;  %v2393_v30 = vmul.f32 %v703_v18, %v604_v25  ;;  %v732_v34 = vmul.f32 %v2387_v24, %v2387_v24  ;;  %v742_v37 = vsel %vm736_vm4, %v731_v29, 0.0  ;;  %v838_v22 = vld [vmem:[%s2609_s9 + $0xd8] sm:$0xff]  ;;  %v839_v29 = vld [vmem:[%s2609_s9 + $0xe0] sm:$0xff] }
 0x25d   :  { %v739_v31 = vadd.f32 %v738_v28, %v737_v27  ;;  %v2403_v39 = vmul.f32 %v711_v26, %v675_v32  ;;  %v734_v43 = vmul.f32 %v2398_v35, %v2398_v35  ;;  %v1888_v18 = vcombine.high %v820_v13, %v836_v14  ;;  %v823_v28 = vld [vmem:[%s2609_s9 + $0x60] sm:$0xff]  ;;  %v840_v32 = vld [vmem:[%s2609_s9 + $0xe8] sm:$0xff] }
 0x25e   :  { %v733_v38 = vmul.f32 %v2393_v30, %v2393_v30  ;;  %v744_v42 = vsel %vm736_vm4, %v732_v34, 0.0  ;;  %v1887_v25 = vcombine.low %v820_v13, %v836_v14  ;;  %v1890_v26 = vcombine.high %v821_v19, %v837_v20 }
 0x25f   :  { %v741_v36 = vadd.f32 %v740_v33, %v739_v31  ;;  %v735_v45 = vmul.f32 %v2403_v39, %v2403_v39  ;;  %v748_v47 = vsel %vm736_vm4, %v734_v43, 0.0  ;;  %v1892_v27 = vcombine.high %v822_v21, %v838_v22  ;;  %v824_v31 = vld [vmem:[%s2609_s9 + $0x68] sm:$0xff]  ;;  %v842_v43 = vld [vmem:[%s2609_s9 + $0xf8] sm:$0xff] }
 0x260   :  { %v746_v44 = vsel %vm736_vm4, %v733_v38, 0.0  ;;  %v1889_v33 = vcombine.low %v821_v19, %v837_v20  ;;  %v1891_v34 = vcombine.low %v822_v21, %v838_v22  ;;  %v825_v38 = vld [vmem:[%s2609_s9 + $0x70] sm:$0xff] }
 0x261   :  { %v743_v40 = vadd.f32 %v742_v37, %v741_v36  ;;  %v750_v49 = vsel %vm736_vm4, %v735_v45, 0.0  ;;  %v1894_v36 = vcombine.high %v823_v28, %v839_v29  ;;  %v1896_v37 = vcombine.high %v824_v31, %v840_v32 }
 0x263   :  { %v745_v3 = vadd.f32 %v744_v42, %v743_v40  ;;  %v841_v40 = vld [vmem:[%s2609_s9 + $0xf0] sm:$0xff]  ;;  %v826_v42 = vld [vmem:[%s2609_s9 + $0x78] sm:$0xff] }
 0x265   :  { %v747_v46 = vadd.f32 %v746_v44, %v745_v3  ;;  %v1893_v3 = vcombine.low %v823_v28, %v839_v29  ;;  %v1895_v44 = vcombine.low %v824_v31, %v840_v32 }
 0x267   :  { %v749_v48 = vadd.f32 %v748_v47, %v747_v46  ;;  %v1898_v46 = vcombine.high %v825_v38, %v841_v40  ;;  %v1900_v47 = vcombine.high %v826_v42, %v842_v43 }
 0x269   :  { %v751_v55 = vadd.f32 %v750_v49, %v749_v48  ;;  %v1897_v49 = vcombine.low %v825_v38, %v841_v40 }
 0x26b   :  { %752 = vadd.xlane.f32.xlu1 %v751_v55  ;;  %v1899_v55 = vcombine.low %v826_v42, %v842_v43 }
 0x2ba   :  { %v358_v58 = vpop.xlane.xlu0 %357 }
 0x2bb   :  { %1996 = vrcp.f32 %v358_v58  ;;  %v2002_v58 = vmov 1983009808  }
 0x2c8   :  { %v1997_v59 = vpop.eup %1996 }
 0x2c9   :  { %v360_v61 = vmul.f32 %v1997_v59, %v2314_v41  ;;  %v817_v41 = vld [vmem:[%s2609_s9 + $0x30] sm:$0xff]  ;;  %v775_v59 = vunpack.c.l.s4 %v2002_v58 }
 0x2ca   :  { %v1882_v56 = vcombine.high %v817_v41, %v833_v5  ;;  %v1881_v10 = vcombine.low %v817_v41, %v833_v5 }
 0x2cb   :  { %v2426_v1 = vpack.c.bf16 %v360_v61, %v360_v61  ;;  %v776_v60 = vunpack.c.0.s8 %v775_v59 }
 0x2cd   :  { %1901 = vmatmul.mubr.msk.bf16.vlgmr.msra.gmra.mxu1 %vm55_vm0, %v2426_v1  ;;  %1902 = vmatmul.mubr.msk.bf16.vlgmr.msra.gmra.mxu0 %vm55_vm0, %v2426_v1  ;;  %v2537_v62 = vsub.s32 %v776_v60, %v2272_v8 }
 0x2ce   :  { %1103 = vmatpush1.bf16.msra.mxu1 %v1873_v54  ;;  %1144 = vmatpush1.bf16.msra.mxu0 %v1875_v57  ;;  %v1879_v54 = vcombine.low %v816_v63, %v832_v0  ;;  %v1884_v57 = vcombine.high %v818_v50, %v834_v51 }
 0x2cf   :  { %1120 = vmatprep.mubr.bf16.mxu1 %v2001_v53  ;;  %1161 = vmatprep.mubr.bf16.mxu0 %v2001_v53 }
 0x2d0   :  { %1184 = vmatprep.subr.bf16.mxu1 %v1878_v2  ;;  %1225 = vmatprep.subr.bf16.mxu0 %v1880_v4 }
 0x2d5   :  { %1903 = vmatmul.mubr.msk.bf16.vlgmr.msra.gmra.mxu1 %vm55_vm0, %v2426_v1  ;;  %1904 = vmatmul.mubr.msk.bf16.vlgmr.msra.gmra.mxu0 %vm55_vm0, %v2426_v1 }
 0x2d6   :  { %1185 = vmatpush1.bf16.msra.mxu1 %v1877_v52  ;;  %1226 = vmatpush1.bf16.msra.mxu0 %v1879_v54 }
 0x2d7   :  { %1202 = vmatprep.mubr.bf16.mxu1 %v2001_v53  ;;  %1243 = vmatprep.mubr.bf16.mxu0 %v2001_v53 }
 0x2d8   :  { %1266 = vmatprep.subr.bf16.mxu1 %v1882_v56  ;;  %1307 = vmatprep.subr.bf16.mxu0 %v1884_v57 }
 0x2dd   :  { %1905 = vmatmul.mubr.msk.bf16.vlgmr.msra.gmra.mxu1 %vm55_vm0, %v2426_v1  ;;  %1906 = vmatmul.mubr.msk.bf16.vlgmr.msra.gmra.mxu0 %vm55_vm0, %v2426_v1 }
 0x2de   :  { %1267 = vmatpush1.bf16.msra.mxu1 %v1881_v10  ;;  %1308 = vmatpush1.bf16.msra.mxu0 %v1883_v15 }
 0x2df   :  { %1284 = vmatprep.mubr.bf16.mxu1 %v2001_v53  ;;  %1325 = vmatprep.mubr.bf16.mxu0 %v2001_v53 }
 0x2e0   :  { %1348 = vmatprep.subr.bf16.mxu1 %v1886_v16  ;;  %1389 = vmatprep.subr.bf16.mxu0 %v1888_v18 }
 0x2e5   :  { %1907 = vmatmul.mubr.msk.bf16.vlgmr.msra.gmra.mxu1 %vm55_vm0, %v2426_v1  ;;  %1908 = vmatmul.mubr.msk.bf16.vlgmr.msra.gmra.mxu0 %vm55_vm0, %v2426_v1 }
 0x2e6   :  { %1349 = vmatpush1.bf16.msra.mxu1 %v1885_v23  ;;  %1390 = vmatpush1.bf16.msra.mxu0 %v1887_v25 }
 0x2e7   :  { %1366 = vmatprep.mubr.bf16.mxu1 %v2001_v53  ;;  %1407 = vmatprep.mubr.bf16.mxu0 %v2001_v53 }
 0x2e8   :  { %1430 = vmatprep.subr.bf16.mxu1 %v1890_v26  ;;  %1471 = vmatprep.subr.bf16.mxu0 %v1892_v27 }
 0x2ed   :  { %1909 = vmatmul.mubr.msk.bf16.vlgmr.msra.gmra.mxu1 %vm55_vm0, %v2426_v1  ;;  %1910 = vmatmul.mubr.msk.bf16.vlgmr.msra.gmra.mxu0 %vm55_vm0, %v2426_v1 }
 0x2ee   :  { %1431 = vmatpush1.bf16.msra.mxu1 %v1889_v33  ;;  %1472 = vmatpush1.bf16.msra.mxu0 %v1891_v34 }
 0x2ef   :  { %1448 = vmatprep.mubr.bf16.mxu1 %v2001_v53  ;;  %1489 = vmatprep.mubr.bf16.mxu0 %v2001_v53 }
 0x2f0   :  { %1512 = vmatprep.subr.bf16.mxu1 %v1894_v36  ;;  %1553 = vmatprep.subr.bf16.mxu0 %v1896_v37 }
 0x2f4   :  { %v753_v45 = vpop.xlane.xlu1 %752 }
 0x2f5   :  { %v754_v48 = vadd.f32 1e-12, %v753_v45  ;;  %1911 = vmatmul.mubr.msk.bf16.vlgmr.msra.gmra.mxu1 %vm55_vm0, %v2426_v1  ;;  %1912 = vmatmul.mubr.msk.bf16.vlgmr.msra.gmra.mxu0 %vm55_vm0, %v2426_v1 }
 0x2f6   :  { %1513 = vmatpush1.bf16.msra.mxu1 %v1893_v3  ;;  %1554 = vmatpush1.bf16.msra.mxu0 %v1895_v44 }
 0x2f7   :  { %1998 = vrsqrt.f32 %v754_v48  ;;  %1530 = vmatprep.mubr.bf16.mxu1 %v2001_v53  ;;  %1571 = vmatprep.mubr.bf16.mxu0 %v2001_v53 }
 0x2f8   :  { %1594 = vmatprep.subr.bf16.mxu1 %v1898_v46  ;;  %1635 = vmatprep.subr.bf16.mxu0 %v1900_v47 }
 0x2fd   :  { %1913 = vmatmul.mubr.msk.bf16.vlgmr.msra.gmra.mxu1 %vm55_vm0, %v2426_v1  ;;  %1914 = vmatmul.mubr.msk.bf16.vlgmr.msra.gmra.mxu0 %vm55_vm0, %v2426_v1 }
 0x2fe   :  { %1595 = vmatpush1.bf16.msra.mxu1 %v1897_v49  ;;  %1636 = vmatpush1.bf16.msra.mxu0 %v1899_v55 }
 0x2ff   :  { %1612 = vmatprep.mubr.bf16.mxu1 %v2001_v53  ;;  %1653 = vmatprep.mubr.bf16.mxu0 %v2001_v53 }
 0x304   :  { %v1999_v61 = vpop.eup %1998 }
 0x305   :  { %v756_v63 = vmul.f32 %v1999_v61, %v2371_v7  ;;  %v757_v0 = vmul.f32 %v1999_v61, %v2379_v9  ;;  %v758_v2 = vmul.f32 %v1999_v61, %v2373_v11  ;;  %v759_v4 = vmul.f32 %v1999_v61, %v2381_v17  ;;  %1915 = vmatmul.mubr.msk.bf16.vlgmr.msra.gmra.mxu1 %vm55_vm0, %v2426_v1 }
 0x306   :  { %v760_v41 = vmul.f32 %v1999_v61, %v2387_v24  ;;  %v761_v53 = vmul.f32 %v1999_v61, %v2393_v30  ;;  %v762_v5 = vmul.f32 %v1999_v61, %v2398_v35  ;;  %v763_v8 = vmul.f32 %v1999_v61, %v2403_v39  ;;  %1916 = vmatmul.mubr.msk.bf16.vlgmr.msra.gmra.mxu0 %vm55_vm0, %v2426_v1 }
 0x307   :  { %v772_v7 = vcombine.low %v756_v63, %v757_v0  ;;  %v773_v9 = vcombine.low %v758_v2, %v759_v4 }
 0x308   :  { %v789_v50 = vcombine.low %v760_v41, %v761_v53  ;;  %v790_v11 = vcombine.low %v762_v5, %v763_v8 }
 0x309   :  { %v780_v17 = vrot.slane %v772_v7, %v2537_v62  ;;  %v787_v51 = vrot.slane %v773_v9, %v2537_v62 }
 0x30a   :  { %v797_v52 = vrot.slane %v789_v50, %v2537_v62  ;;  %v804_v24 = vrot.slane %v790_v11, %v2537_v62 }
 0x30b   :  { %v788_v30 = vcombine.low %v780_v17, %v787_v51 }
 0x30c   :  { %v805_v54 = vcombine.low %v797_v52, %v804_v24 }
 0x30d   :  { %808 = vst [vmem:[%s2611_s10] sm:$0xff] %v788_v30 }
 0x30e   :  { %809 = vst [vmem:[%s2611_s10 + $0x8] sm:$0xff] %v805_v54 }
 0x38d   :  { %v1040_v35 = vpop.f32.mrf.mxu1  ;;  %v1081_v39 = vpop.f32.mrf.mxu0 }
 0x38f   :  { %v1042_v1 = vpop.f32.mrf.mxu1  ;;  %v1083_v56 = vpop.f32.mrf.mxu0 }
 0x390   :  { %v1694_v57 = vcombine.low %v1040_v35, %v1042_v1  ;;  %v1695_v6 = vcombine.low %v1081_v39, %v1083_v56 }
 0x391   :  { %v1044_v12 = vpop.f32.mrf.mxu1  ;;  %v1085_v13 = vpop.f32.mrf.mxu0 }
 0x392   :  { %v1702_v14 = vrot.slane %v1694_v57, %v2537_v62  ;;  %v1709_v10 = vrot.slane %v1695_v6, %v2537_v62 }
 0x393   :  { %v1045_v15 = vpop.f32.mrf.mxu1  ;;  %v1086_v16 = vpop.f32.mrf.mxu0 }
 0x394   :  { %v1710_v18 = vcombine.low %v1702_v14, %v1709_v10 }
 0x395   :  { %v1122_v19 = vpop.f32.mrf.mxu1  ;;  %v1163_v20 = vpop.f32.mrf.mxu0 }
 0x396   :  { %1838 = vst [vmem:[%s2612_s11] sm:$0xff] %v1710_v18 }
 0x397   :  { %v1124_v21 = vpop.f32.mrf.mxu1  ;;  %v1165_v22 = vpop.f32.mrf.mxu0 }
 0x398   :  { %v1711_v23 = vcombine.low %v1122_v19, %v1124_v21  ;;  %v1712_v25 = vcombine.low %v1163_v20, %v1165_v22 }
 0x399   :  { %v1126_v26 = vpop.f32.mrf.mxu1  ;;  %v1167_v27 = vpop.f32.mrf.mxu0 }
 0x39a   :  { %v1719_v28 = vrot.slane %v1711_v23, %v2537_v62  ;;  %v1726_v29 = vrot.slane %v1712_v25, %v2537_v62 }
 0x39b   :  { %v1127_v31 = vpop.f32.mrf.mxu1  ;;  %v1168_v32 = vpop.f32.mrf.mxu0 }
 0x39c   :  { %v1727_v33 = vcombine.low %v1719_v28, %v1726_v29 }
 0x39d   :  { %v1204_v34 = vpop.f32.mrf.mxu1  ;;  %v1245_v36 = vpop.f32.mrf.mxu0 }
 0x39e   :  { %1839 = vst [vmem:[%s2612_s11 + $0x8] sm:$0xff] %v1727_v33 }
 0x39f   :  { %v1206_v37 = vpop.f32.mrf.mxu1  ;;  %v1247_v38 = vpop.f32.mrf.mxu0 }
 0x3a0   :  { %v1728_v40 = vcombine.low %v1204_v34, %v1206_v37  ;;  %v1729_v42 = vcombine.low %v1245_v36, %v1247_v38 }
 0x3a1   :  { %v1208_v43 = vpop.f32.mrf.mxu1  ;;  %v1249_v3 = vpop.f32.mrf.mxu0 }
 0x3a2   :  { %v1736_v44 = vrot.slane %v1728_v40, %v2537_v62  ;;  %v1743_v45 = vrot.slane %v1729_v42, %v2537_v62 }
 0x3a3   :  { %v1209_v46 = vpop.f32.mrf.mxu1  ;;  %v1250_v47 = vpop.f32.mrf.mxu0 }
 0x3a4   :  { %v1744_v48 = vcombine.low %v1736_v44, %v1743_v45 }
 0x3a5   :  { %v1286_v49 = vpop.f32.mrf.mxu1  ;;  %v1327_v55 = vpop.f32.mrf.mxu0 }
 0x3a6   :  { %1840 = vst [vmem:[%s2612_s11 + $0x10] sm:$0xff] %v1744_v48 }
 0x3a7   :  { %v1288_v58 = vpop.f32.mrf.mxu1  ;;  %v1329_v59 = vpop.f32.mrf.mxu0 }
 0x3a8   :  { %v1745_v60 = vcombine.low %v1286_v49, %v1288_v58  ;;  %v1746_v61 = vcombine.low %v1327_v55, %v1329_v59 }
 0x3a9   :  { %v1290_v63 = vpop.f32.mrf.mxu1  ;;  %v1331_v0 = vpop.f32.mrf.mxu0 }
 0x3aa   :  { %v1753_v2 = vrot.slane %v1745_v60, %v2537_v62  ;;  %v1760_v4 = vrot.slane %v1746_v61, %v2537_v62 }
 0x3ab   :  { %v1291_v41 = vpop.f32.mrf.mxu1  ;;  %v1332_v53 = vpop.f32.mrf.mxu0 }
 0x3ac   :  { %v1761_v5 = vcombine.low %v1753_v2, %v1760_v4 }
 0x3ad   :  { %v1368_v8 = vpop.f32.mrf.mxu1  ;;  %v1409_v7 = vpop.f32.mrf.mxu0 }
 0x3ae   :  { %1841 = vst [vmem:[%s2612_s11 + $0x18] sm:$0xff] %v1761_v5 }
 0x3af   :  { %v1370_v9 = vpop.f32.mrf.mxu1  ;;  %v1411_v50 = vpop.f32.mrf.mxu0 }
 0x3b0   :  { %v1762_v11 = vcombine.low %v1368_v8, %v1370_v9  ;;  %v1763_v17 = vcombine.low %v1409_v7, %v1411_v50 }
 0x3b1   :  { %v1372_v51 = vpop.f32.mrf.mxu1  ;;  %v1413_v52 = vpop.f32.mrf.mxu0 }
 0x3b2   :  { %v1770_v24 = vrot.slane %v1762_v11, %v2537_v62  ;;  %v1777_v30 = vrot.slane %v1763_v17, %v2537_v62 }
 0x3b3   :  { %v1373_v54 = vpop.f32.mrf.mxu1  ;;  %v1414_v35 = vpop.f32.mrf.mxu0 }
 0x3b4   :  { %v1778_v39 = vcombine.low %v1770_v24, %v1777_v30 }
 0x3b5   :  { %v1450_v1 = vpop.f32.mrf.mxu1  ;;  %v1491_v56 = vpop.f32.mrf.mxu0 }
 0x3b6   :  { %1842 = vst [vmem:[%s2612_s11 + $0x20] sm:$0xff] %v1778_v39 }
 0x3b7   :  { %v1452_v57 = vpop.f32.mrf.mxu1  ;;  %v1493_v6 = vpop.f32.mrf.mxu0 }
 0x3b8   :  { %v1779_v12 = vcombine.low %v1450_v1, %v1452_v57  ;;  %v1780_v13 = vcombine.low %v1491_v56, %v1493_v6 }
 0x3b9   :  { %v1454_v14 = vpop.f32.mrf.mxu1  ;;  %v1495_v10 = vpop.f32.mrf.mxu0 }
 0x3ba   :  { %v1787_v15 = vrot.slane %v1779_v12, %v2537_v62  ;;  %v1794_v16 = vrot.slane %v1780_v13, %v2537_v62 }
 0x3bb   :  { %v1455_v18 = vpop.f32.mrf.mxu1  ;;  %v1496_v19 = vpop.f32.mrf.mxu0 }
 0x3bc   :  { %v1795_v20 = vcombine.low %v1787_v15, %v1794_v16 }
 0x3bd   :  { %v1532_v21 = vpop.f32.mrf.mxu1  ;;  %v1573_v22 = vpop.f32.mrf.mxu0 }
 0x3be   :  { %1843 = vst [vmem:[%s2612_s11 + $0x28] sm:$0xff] %v1795_v20 }
 0x3bf   :  { %v1534_v23 = vpop.f32.mrf.mxu1  ;;  %v1575_v25 = vpop.f32.mrf.mxu0 }
 0x3c0   :  { %v1796_v26 = vcombine.low %v1532_v21, %v1534_v23  ;;  %v1797_v27 = vcombine.low %v1573_v22, %v1575_v25 }
 0x3c1   :  { %v1536_v28 = vpop.f32.mrf.mxu1  ;;  %v1577_v29 = vpop.f32.mrf.mxu0 }
 0x3c2   :  { %v1804_v31 = vrot.slane %v1796_v26, %v2537_v62  ;;  %v1811_v32 = vrot.slane %v1797_v27, %v2537_v62 }
 0x3c3   :  { %v1537_v33 = vpop.f32.mrf.mxu1  ;;  %v1578_v34 = vpop.f32.mrf.mxu0 }
 0x3c4   :  { %v1812_v36 = vcombine.low %v1804_v31, %v1811_v32 }
 0x3c5   :  { %v1614_v37 = vpop.f32.mrf.mxu1 }
 0x3c6   :  { %1844 = vst [vmem:[%s2612_s11 + $0x30] sm:$0xff] %v1812_v36  ;;  %v1655_v38 = vpop.f32.mrf.mxu0 }
 0x3c7   :  { %v1616_v40 = vpop.f32.mrf.mxu1 }
 0x3c8   :  { %v1813_v42 = vcombine.low %v1614_v37, %v1616_v40  ;;  %v1657_v43 = vpop.f32.mrf.mxu0 }
 0x3c9   :  { %v1814_v3 = vcombine.low %v1655_v38, %v1657_v43  ;;  %v1618_v44 = vpop.f32.mrf.mxu1 }
 0x3ca   :  { %v1821_v45 = vrot.slane %v1813_v42, %v2537_v62  ;;  %v1659_v46 = vpop.f32.mrf.mxu0 }
 0x3cb   :  { %v1828_v47 = vrot.slane %v1814_v3, %v2537_v62  ;;  %v1619_v48 = vpop.f32.mrf.mxu1 }
 0x3cc   :  { %v1660_v49 = vpop.f32.mrf.mxu0 }
 0x3cd   :  { %v1829_v55 = vcombine.low %v1821_v45, %v1828_v47 }
 0x3cf   :  { %1845 = vst [vmem:[%s2612_s11 + $0x38] sm:$0xff] %v1829_v55 }

// kernel: reverse.29
= control target key start
LH: loop header
LB: loop body
LE: loop exit
PB: predicated region body
PF: predicated region fallthrough
CT: control target
= control target key end

     0   :  { %v2_v0 = vlaneseq  ;;  %s318_s0 = inlined_call_operand.vmem [shape: f32[2,4096], index: 0, kind: input, shape index: {}]   ;;  %s319_s1 = inlined_call_operand.vmem [shape: f32[2,4096], index: 1, kind: output, shape index: {}]  }
   0x2   :  { %v3_v1 = vsub.s32 127, %v2_v0 }
   0x4   :  { %4 = vset.pattern.permute.xlu0 %v3_v1 }
   0x5   :  { %s278_s6 = smov 0   ;;  %s280_s7 = smov 0  }
   0x6   :  { %s282_s8 = smov 0  }
   0x7 LB: > { %s208_s9 = sadd.s32 4294967295, %s266_s8   ;;  %s19_s10 = sadd.s32 1, %s262_s7  ;;  %s266_s8 = sphi %s282_s8, %s10_s8   ;;  %s262_s7 = sphi %s280_s7, %s321_s7   ;;  %s258_s6 = sphi %s278_s6, %s320_s6  }
   0x8   : > { %p20_p0 = scmp.ge.s32.totalorder %s19_s10, 32  ;;  %p210_p1 = scmp.ge.s32.totalorder %s266_s8, 32 }
   0x9   : > { %s38_s11 = sand.u32 (!%p210_p1), 1, %s266_s8   ;;  %s41_s12 = ssub.s32 (!%p210_p1), 31, %s262_s7 }
   0xa   : > { %s323_s10 = smov (%p20_p0, %s19_s10), 0  ;;  %36 = sbr.rel (%p210_p1) target bundleno = 17 (0x11), region = 16 }
   0xb   : > { %s211_s13 = sshll.u32 (!%p210_p1), %s38_s11, 1  ;;  %s212_s14 = sshll.u32 (!%p210_p1), %s41_s12, 1 }
   0xc   : > { %s45_s17 = scalar_lea.vmem (!%p210_p1), %s318_s0, %s212_s14  ;;  %s40_s18 = scalar_lea.vmem (!%p210_p1), [#allocation1], %s211_s13 }
   0xf   : > { %v62_v2 = vld [vmem:[%s45_s17] sm:$0x3] }
  0x10   : > { %63 = vst [vmem:[%s40_s18] sm:$0x3] %v62_v2 }
  0x11 PF: > { %p213_p2 = scmp.ge.s32.totalorder %s266_s8, 1  ;;  %p80_p3 = scmp.lt.s32.totalorder %s266_s8, 33 }
  0x13   : > { %p81_p4 = pnand %p213_p2, %p80_p3 }
  0x14   : > { %s91_s19 = sand.u32 (!%p81_p4), 1, %s208_s9   ;;  %s217_s23 = sshll.u32 (!%p81_p4), %s258_s6, 1 }
  0x15   : > { %84 = sbr.rel (%p81_p4) target bundleno = 176 (0xb0), region = 50  ;;  %s214_s20 = sshll.u32 (!%p81_p4), %s91_s19, 1 }
  0x16   : > { %s93_s21 = scalar_lea.vmem (!%p81_p4), [#allocation1], %s214_s20  ;;  %s97_s22 = scalar_lea.vmem (!%p81_p4), [#allocation3], %s214_s20 }
  0x17   : > { %s123_s26 = scalar_lea.vmem (!%p81_p4), %s319_s1, %s217_s23 }
  0x1a   : > { %v101_v3 = vld [vmem:[%s93_s21] sm:$0x3] }
  0x1b   : > { %102 = vst [vmem:[#allocation0] sm:$0x3] %v101_v3 }
  0x22   : > { %v104_v4 = vld [vmem:[#allocation0] sm:$0xff] }
  0x23   : > { %105 = vperm.xlu0 %4, %v104_v4  }
  0x9e   : > { %v106_v5 = vpop.permute.xlu0 %105 }
  0x9f   : > { %107 = vst [vmem:[#allocation2] sm:$0xff] %v106_v5 }
  0xa6   : > { %v112_v6 = vld [vmem:[#allocation2] sm:$0x3] }
  0xa7   : > { %115 = vst [vmem:[%s97_s22] sm:$0x3] %v112_v6 }
  0xae   : > { %v140_v7 = vld [vmem:[%s97_s22] sm:$0x3] }
  0xaf   : > { %141 = vst [vmem:[%s123_s26] sm:$0x3] %v140_v7 }
  0xb0 PF: > { %s10_s8 = sadd.s32 1, %s266_s8   ;;  %s320_s6 = smov %s262_s7 }
  0xb1   : > { %p7_p5 = scmp.ge.s32.totalorder %s10_s8, 34   ;;  %s321_s7 = smov %s323_s10 }
  0xb3   :  { %9 = sbr.rel (!%p7_p5) target bundleno = 7 (0x7), region = 110 }

// kernel: reverse.31
= control target key start
LH: loop header
LB: loop body
LE: loop exit
PB: predicated region body
PF: predicated region fallthrough
CT: control target
= control target key end

     0   :  { %v2_v0 = vlaneseq  ;;  %s336_s0 = inlined_call_operand.vmem [shape: f32[2,1,4096], index: 0, kind: input, shape index: {}]   ;;  %s337_s1 = inlined_call_operand.vmem [shape: f32[2,1,4096], index: 1, kind: output, shape index: {}]  }
   0x2   :  { %v3_v1 = vsub.s32 127, %v2_v0 }
   0x4   :  { %4 = vset.pattern.permute.xlu0 %v3_v1 }
   0x5   :  { %s296_s6 = smov 0   ;;  %s298_s7 = smov 0  }
   0x6   :  { %s300_s8 = smov 0  }
   0x7 LB: > { %s226_s9 = sadd.s32 4294967295, %s284_s8   ;;  %s22_s10 = sadd.s32 1, %s280_s7  ;;  %s284_s8 = sphi %s300_s8, %s10_s8   ;;  %s280_s7 = sphi %s298_s7, %s339_s7   ;;  %s276_s6 = sphi %s296_s6, %s338_s6  }
   0x8   : > { %p23_p0 = scmp.ge.s32.totalorder %s22_s10, 32  ;;  %p228_p1 = scmp.ge.s32.totalorder %s284_s8, 32 }
   0x9   : > { %s45_s11 = sand.u32 (!%p228_p1), 1, %s284_s8   ;;  %s48_s12 = ssub.s32 (!%p228_p1), 31, %s280_s7 }
   0xa   : > { %s341_s10 = smov (%p23_p0, %s22_s10), 0  ;;  %43 = sbr.rel (%p228_p1) target bundleno = 17 (0x11), region = 16 }
   0xb   : > { %s229_s13 = sshll.u32 (!%p228_p1), %s45_s11, 1  ;;  %s230_s14 = sshll.u32 (!%p228_p1), %s48_s12, 1 }
   0xc   : > { %s54_s17 = scalar_lea.vmem (!%p228_p1), %s336_s0, %s230_s14  ;;  %s47_s18 = scalar_lea.vmem (!%p228_p1), [#allocation1], %s229_s13 }
   0xf   : > { %v71_v2 = vld [vmem:[%s54_s17] sm:$0x3] }
  0x10   : > { %72 = vst [vmem:[%s47_s18] sm:$0x3] %v71_v2 }
  0x11 PF: > { %p231_p2 = scmp.ge.s32.totalorder %s284_s8, 1  ;;  %p89_p3 = scmp.lt.s32.totalorder %s284_s8, 33 }
  0x13   : > { %p90_p4 = pnand %p231_p2, %p89_p3 }
  0x14   : > { %s100_s19 = sand.u32 (!%p90_p4), 1, %s226_s9   ;;  %s235_s23 = sshll.u32 (!%p90_p4), %s276_s6, 1 }
  0x15   : > { %93 = sbr.rel (%p90_p4) target bundleno = 176 (0xb0), region = 50  ;;  %s232_s20 = sshll.u32 (!%p90_p4), %s100_s19, 1 }
  0x16   : > { %s102_s21 = scalar_lea.vmem (!%p90_p4), [#allocation1], %s232_s20  ;;  %s106_s22 = scalar_lea.vmem (!%p90_p4), [#allocation3], %s232_s20 }
  0x17   : > { %s134_s26 = scalar_lea.vmem (!%p90_p4), %s337_s1, %s235_s23 }
  0x1a   : > { %v110_v3 = vld [vmem:[%s102_s21] sm:$0x3] }
  0x1b   : > { %111 = vst [vmem:[#allocation0] sm:$0x3] %v110_v3 }
  0x22   : > { %v113_v4 = vld [vmem:[#allocation0] sm:$0xff] }
  0x23   : > { %114 = vperm.xlu0 %4, %v113_v4  }
  0x9e   : > { %v115_v5 = vpop.permute.xlu0 %114 }
  0x9f   : > { %116 = vst [vmem:[#allocation2] sm:$0xff] %v115_v5 }
  0xa6   : > { %v121_v6 = vld [vmem:[#allocation2] sm:$0x3] }
  0xa7   : > { %124 = vst [vmem:[%s106_s22] sm:$0x3] %v121_v6 }
  0xae   : > { %v151_v7 = vld [vmem:[%s106_s22] sm:$0x3] }
  0xaf   : > { %152 = vst [vmem:[%s134_s26] sm:$0x3] %v151_v7 }
  0xb0 PF: > { %s10_s8 = sadd.s32 1, %s284_s8   ;;  %s338_s6 = smov %s280_s7 }
  0xb1   : > { %p7_p5 = scmp.ge.s32.totalorder %s10_s8, 34   ;;  %s339_s7 = smov %s341_s10 }
  0xb3   :  { %9 = sbr.rel (!%p7_p5) target bundleno = 7 (0x7), region = 110 }

// kernel: forward.9
= control target key start
LH: loop header
LB: loop body
LE: loop exit
PB: predicated region body
PF: predicated region fallthrough
CT: control target
= control target key end

     0   :  { %v1868_v3 = vmov 0.0   ;;  %vm55_vm0 = vcmask 130048   ;;  %vm377_vm1 = vcmask 1043456   ;;  %vm349_vm2 = vcmask 125952   ;;  %s2475_s1 = inlined_call_operand.vmem [shape: f32[16,256], index: 1, kind: input, shape index: {}]   ;;  %s2476_s0 = inlined_call_operand.vmem [shape: f32[4,16], index: 0, kind: input, shape index: {}]   ;;  %s2477_s3 = inlined_call_operand.vmem [shape: f32[256,4], index: 3, kind: input, shape index: {}]   ;;  %s2478_s5 = inlined_call_operand.vmem [shape: f32[256,16], index: 5, kind: input, shape index: {}]   ;;  %s2479_s2 = inlined_call_operand.vmem [shape: f32[1,256], index: 2, kind: input, shape index: {}]   ;;  %s2480_s7 = inlined_call_operand.vmem [shape: f32[4,1024], index: 7, kind: input, shape index: {}]   ;;  %s2481_s4 = inlined_call_operand.vmem [shape: f32[1,4], index: 4, kind: input, shape index: {}]   ;;  %s2482_s6 = inlined_call_operand.vmem [shape: f32[1,16], index: 6, kind: input, shape index: {}]   ;;  %s2483_s9 = inlined_call_operand.vmem [shape: bf16[16,4096], index: 9, kind: input, shape index: {}]   ;;  %s2484_s8 = inlined_call_operand.vmem [shape: f32[1,1024], index: 8, kind: input, shape index: {}]   ;;  %s2485_s10 = inlined_call_operand.vmem [shape: f32[4,1024], index: 10, kind: output, shape index: {0}]   ;;  %s2486_s11 = inlined_call_operand.vmem [shape: f32[4,4096], index: 11, kind: output, shape index: {1}]  }
   0x1   :  { %v42_v0 = vld [vmem:[%s2475_s1 + $0x18] sm:$0xff]  ;;  %v41_v1 = vld [vmem:[%s2475_s1 + $0x10] sm:$0xff]  ;;  %v40_v2 = vld [vmem:[%s2475_s1 + $0x8] sm:$0xff]  ;;  %123 = vmatprep.mubr.f32.mxu0 %v1868_v3  ;;  %vm373_vm3 = vcmask 31744  }
   0x2   :  { %87 = vmatprep.subr.mxu0 %v42_v0  ;;  %v39_v4 = vld [vmem:[%s2475_s1] sm:$0xff]  ;;  %v161_v5 = vld [vmem:[%s2477_s3 + $0xf8] sm:$0xff]  ;;  %v160_v10 = vld [vmem:[%s2477_s3 + $0xf0] sm:$0xff] }
   0x3   :  { %88 = vmatpush1.msra.mxu0 %v41_v1  ;;  %v38_v6 = vld [vmem:[%s2476_s0] sm:$0xf]  ;;  %1786 = vmatprep.subr.mxu1 %v161_v5  ;;  %v271_v7 = vld [vmem:[%s2478_s5 + $0xf8] sm:$0xff]  ;;  %v144_v11 = vld [vmem:[%s2477_s3 + $0x70] sm:$0xff] }
   0x4   :  { %v145_v8 = vld [vmem:[%s2477_s3 + $0x78] sm:$0xff]  ;;  %89 = vmatprep.subr.mxu0 %v40_v2  ;;  %v270_v12 = vld [vmem:[%s2478_s5 + $0xf0] sm:$0xff]  ;;  %v159_v13 = vld [vmem:[%s2477_s3 + $0xe8] sm:$0xff] }
   0x5   :  { %1787 = vmatpush3.msra.mxu1 %v145_v8  ;;  %v255_v9 = vld [vmem:[%s2478_s5 + $0x78] sm:$0xff]  ;;  %90 = vmatpush1.msra.mxu0 %v39_v4  ;;  %v254_v14 = vld [vmem:[%s2478_s5 + $0x70] sm:$0xff]  ;;  %v143_v15 = vld [vmem:[%s2477_s3 + $0x68] sm:$0xff] }
   0x6   :  { %1788 = vmatprep.subr.mxu1 %v160_v10  ;;  %1723 = vmatmul.mubr.msk.f32.vlgmr.msra.gmra.mxu0 %vm55_vm0, %v38_v6  ;;  %v269_v16 = vld [vmem:[%s2478_s5 + $0xe8] sm:$0xff]  ;;  %v158_v17 = vld [vmem:[%s2477_s3 + $0xe0] sm:$0xff]  ;;  %v157_v21 = vld [vmem:[%s2477_s3 + $0xd8] sm:$0xff] }
   0x7   :  { %1821 = vmatprep.subr.mxu0 %v271_v7  ;;  %1789 = vmatpush3.msra.mxu1 %v144_v11  ;;  %v253_v18 = vld [vmem:[%s2478_s5 + $0x68] sm:$0xff]  ;;  %v142_v19 = vld [vmem:[%s2477_s3 + $0x60] sm:$0xff]  ;;  %v141_v23 = vld [vmem:[%s2477_s3 + $0x58] sm:$0xff]  ;;  %v45_v7 = vlaneseq }
   0x8   :  { %1822 = vmatpush3.msra.mxu0 %v255_v9  ;;  %1790 = vmatprep.subr.mxu1 %v159_v13  ;;  %v268_v20 = vld [vmem:[%s2478_s5 + $0xe0] sm:$0xff]  ;;  %v267_v24 = vld [vmem:[%s2478_s5 + $0xd8] sm:$0xff]  ;;  %v156_v25 = vld [vmem:[%s2477_s3 + $0xd0] sm:$0xff] }
   0x9   :  { %1823 = vmatprep.subr.mxu0 %v270_v12  ;;  %1791 = vmatpush3.msra.mxu1 %v143_v15  ;;  %v252_v22 = vld [vmem:[%s2478_s5 + $0x60] sm:$0xff]  ;;  %v251_v26 = vld [vmem:[%s2478_s5 + $0x58] sm:$0xff]  ;;  %v140_v27 = vld [vmem:[%s2477_s3 + $0x50] sm:$0xff]  ;;  %v2139_v8 = vshrl.u32 %v45_v7, 7 }
   0xa   :  { %1824 = vmatpush3.msra.mxu0 %v254_v14  ;;  %1792 = vmatprep.subr.mxu1 %v158_v17  ;;  %v266_v28 = vld [vmem:[%s2478_s5 + $0xd0] sm:$0xff]  ;;  %v155_v29 = vld [vmem:[%s2477_s3 + $0xc8] sm:$0xff]  ;;  %v154_v33 = vld [vmem:[%s2477_s3 + $0xc0] sm:$0xff] }
   0xb   :  { %1825 = vmatprep.subr.mxu0 %v269_v16  ;;  %1793 = vmatpush3.msra.mxu1 %v142_v19  ;;  %v250_v30 = vld [vmem:[%s2478_s5 + $0x50] sm:$0xff]  ;;  %v139_v31 = vld [vmem:[%s2477_s3 + $0x48] sm:$0xff]  ;;  %v138_v35 = vld [vmem:[%s2477_s3 + $0x40] sm:$0xff]  ;;  %v51_v9 = vsub.s32 1, %v2139_v8  ;;  %v47_v10 = vsub.s32 0, %v2139_v8 }
   0xc   :  { %1826 = vmatpush3.msra.mxu0 %v253_v18  ;;  %1794 = vmatprep.subr.mxu1 %v157_v21  ;;  %v265_v32 = vld [vmem:[%s2478_s5 + $0xc8] sm:$0xff]  ;;  %v264_v36 = vld [vmem:[%s2478_s5 + $0xc0] sm:$0xff]  ;;  %v153_v37 = vld [vmem:[%s2477_s3 + $0xb8] sm:$0xff] }
   0xd   :  { %1827 = vmatprep.subr.mxu0 %v268_v20  ;;  %1795 = vmatpush3.msra.mxu1 %v141_v23  ;;  %v249_v34 = vld [vmem:[%s2478_s5 + $0x48] sm:$0xff]  ;;  %v248_v38 = vld [vmem:[%s2478_s5 + $0x40] sm:$0xff]  ;;  %v137_v39 = vld [vmem:[%s2477_s3 + $0x38] sm:$0xff] }
   0xe   :  { %1828 = vmatpush3.msra.mxu0 %v252_v22  ;;  %1796 = vmatprep.subr.mxu1 %v156_v25  ;;  %v263_v40 = vld [vmem:[%s2478_s5 + $0xb8] sm:$0xff]  ;;  %v152_v41 = vld [vmem:[%s2477_s3 + $0xb0] sm:$0xff]  ;;  %v151_v45 = vld [vmem:[%s2477_s3 + $0xa8] sm:$0xff] }
   0xf   :  { %1829 = vmatprep.subr.mxu0 %v267_v24  ;;  %1797 = vmatpush3.msra.mxu1 %v140_v27  ;;  %v247_v42 = vld [vmem:[%s2478_s5 + $0x38] sm:$0xff]  ;;  %v136_v43 = vld [vmem:[%s2477_s3 + $0x30] sm:$0xff]  ;;  %v135_v47 = vld [vmem:[%s2477_s3 + $0x28] sm:$0xff] }
  0x10   :  { %1830 = vmatpush3.msra.mxu0 %v251_v26  ;;  %1798 = vmatprep.subr.mxu1 %v155_v29  ;;  %v262_v44 = vld [vmem:[%s2478_s5 + $0xb0] sm:$0xff]  ;;  %v261_v48 = vld [vmem:[%s2478_s5 + $0xa8] sm:$0xff]  ;;  %v150_v49 = vld [vmem:[%s2477_s3 + $0xa0] sm:$0xff] }
  0x11   :  { %1831 = vmatprep.subr.mxu0 %v266_v28  ;;  %1799 = vmatpush3.msra.mxu1 %v139_v31  ;;  %v246_v46 = vld [vmem:[%s2478_s5 + $0x30] sm:$0xff]  ;;  %v245_v50 = vld [vmem:[%s2478_s5 + $0x28] sm:$0xff]  ;;  %v134_v51 = vld [vmem:[%s2477_s3 + $0x20] sm:$0xff] }
  0x12   :  { %1832 = vmatpush3.msra.mxu0 %v250_v30  ;;  %1800 = vmatprep.subr.mxu1 %v154_v33  ;;  %v260_v52 = vld [vmem:[%s2478_s5 + $0xa0] sm:$0xff]  ;;  %v149_v53 = vld [vmem:[%s2477_s3 + $0x98] sm:$0xff]  ;;  %v148_v58 = vld [vmem:[%s2477_s3 + $0x90] sm:$0xff] }
  0x13   :  { %1833 = vmatprep.subr.mxu0 %v265_v32  ;;  %1801 = vmatpush3.msra.mxu1 %v138_v35  ;;  %v244_v54 = vld [vmem:[%s2478_s5 + $0x20] sm:$0xff]  ;;  %v133_v55 = vld [vmem:[%s2477_s3 + $0x18] sm:$0xff]  ;;  %v258_v59 = vld [vmem:[%s2478_s5 + $0x90] sm:$0xff] }
  0x14   :  { %1834 = vmatpush3.msra.mxu0 %v249_v34  ;;  %1802 = vmatprep.subr.mxu1 %v153_v37  ;;  %v259_v56 = vld [vmem:[%s2478_s5 + $0x98] sm:$0xff]  ;;  %v132_v60 = vld [vmem:[%s2477_s3 + $0x10] sm:$0xff]  ;;  %v147_v62 = vld [vmem:[%s2477_s3 + $0x88] sm:$0xff] }
  0x15   :  { %1835 = vmatprep.subr.mxu0 %v264_v36  ;;  %1803 = vmatpush3.msra.mxu1 %v137_v39  ;;  %v243_v57 = vld [vmem:[%s2478_s5 + $0x18] sm:$0xff]  ;;  %v242_v61 = vld [vmem:[%s2478_s5 + $0x10] sm:$0xff]  ;;  %v257_v63 = vld [vmem:[%s2478_s5 + $0x88] sm:$0xff] }
  0x16   :  { %1836 = vmatpush3.msra.mxu0 %v248_v38  ;;  %1804 = vmatprep.subr.mxu1 %v152_v41  ;;  %v131_v0 = vld [vmem:[%s2477_s3 + $0x8] sm:$0xff]  ;;  %v146_v2 = vld [vmem:[%s2477_s3 + $0x80] sm:$0xff]  ;;  %v363_v22 = vld [vmem:[%s2480_s7 + $0x10] sm:$0xff] }
  0x17   :  { %1837 = vmatprep.subr.mxu0 %v263_v40  ;;  %1805 = vmatpush3.msra.mxu1 %v136_v43  ;;  %v241_v1 = vld [vmem:[%s2478_s5 + $0x8] sm:$0xff]  ;;  %v256_v4 = vld [vmem:[%s2478_s5 + $0x80] sm:$0xff]  ;;  %v364_v23 = vld [vmem:[%s2480_s7 + $0x18] sm:$0xff]  ;;  %v371_v24 = vcombine.high %v363_v22, %v363_v22 }
  0x18   :  { %1838 = vmatpush3.msra.mxu0 %v247_v42  ;;  %1806 = vmatprep.subr.mxu1 %v151_v45  ;;  %v130_v5 = vld [vmem:[%s2477_s3] sm:$0xff]  ;;  %v362_v19 = vld [vmem:[%s2480_s7 + $0x8] sm:$0xff]  ;;  %v372_v25 = vcombine.high %v364_v23, %v364_v23 }
  0x19   :  { %1839 = vmatprep.subr.mxu0 %v262_v44  ;;  %1807 = vmatpush3.msra.mxu1 %v135_v47  ;;  %v240_v6 = vld [vmem:[%s2478_s5] sm:$0xff]  ;;  %v370_v21 = vcombine.high %v362_v19, %v362_v19  ;;  %v785_v44 = vld [vmem:[%s2483_s9 + $0x8] sm:$0xff] }
  0x1a   :  { %1840 = vmatpush3.msra.mxu0 %v246_v46  ;;  %1808 = vmatprep.subr.mxu1 %v150_v49  ;;  %v43_v11 = vld [vmem:[%s2479_s2] sm:$0x3]  ;;  %v801_v46 = vld [vmem:[%s2483_s9 + $0x88] sm:$0xff] }
  0x1b   :  { %1841 = vmatprep.subr.mxu0 %v261_v48  ;;  %1809 = vmatpush3.msra.mxu1 %v134_v51  ;;  %v52_v12 = vrot.slane %v43_v11, %v51_v9  ;;  %v48_v13 = vrot.slane %v43_v11, %v47_v10  ;;  %v361_v18 = vld [vmem:[%s2480_s7] sm:$0xff]  ;;  %v1740_v48 = vcombine.low %v785_v44, %v801_v46  ;;  %v2205_v51 = vld [vmem:[%s2483_s9 + $0x90] sm:$0xff] }
  0x1c   :  { %1842 = vmatpush3.msra.mxu0 %v245_v50  ;;  %1810 = vmatprep.subr.mxu1 %v149_v53  ;;  %v369_v20 = vcombine.high %v361_v18, %v361_v18  ;;  %v1724_v28 = vld [vmem:[%s2481_s4] ss:$0 sm:$0xff]  ;;  %v1741_v49 = vcombine.high %v785_v44, %v801_v46  ;;  %v2200_v50 = vld [vmem:[%s2483_s9 + $0x10] sm:$0xff]  ;;  %v1869_v53 = vmov 0  }
  0x1d   :  { %1843 = vmatprep.subr.mxu0 %v260_v52  ;;  %1811 = vmatpush3.msra.mxu1 %v133_v55  ;;  %v1725_v31 = vld [vmem:[%s2482_s6] ss:$0 sm:$0xff]  ;;  %v2210_v52 = vld [vmem:[%s2483_s9 + $0x18] sm:$0xff]  ;;  %v1743_v55 = vcombine.high %v2200_v50, %v2205_v51 }
  0x1e   :  { %1844 = vmatpush3.msra.mxu0 %v244_v54  ;;  %1812 = vmatprep.subr.mxu1 %v148_v58  ;;  %v784_v43 = vld [vmem:[%s2483_s9] sm:$0xff]  ;;  %v1742_v54 = vcombine.low %v2200_v50, %v2205_v51  ;;  %v791_v50 = vld [vmem:[%s2483_s9 + $0x38] sm:$0xff] }
  0x1f   :  { %1845 = vmatprep.subr.mxu0 %v259_v56  ;;  %1813 = vmatpush3.msra.mxu1 %v132_v60  ;;  %v2220_v56 = vld [vmem:[%s2483_s9 + $0x98] sm:$0xff]  ;;  %v678_v60 = vld [vmem:[%s2484_s8] sm:$0xff] }
  0x20   :  { %1846 = vmatpush3.msra.mxu0 %v243_v57  ;;  %1814 = vmatprep.subr.mxu1 %v147_v62  ;;  %v1744_v57 = vcombine.low %v2210_v52, %v2220_v56  ;;  %v1745_v58 = vcombine.high %v2210_v52, %v2220_v56  ;;  %v683_v62 = vrot.slane %v678_v60, %v47_v10  ;;  %v807_v51 = vld [vmem:[%s2483_s9 + $0xb8] sm:$0xff] }
  0x21   :  { %1847 = vmatprep.subr.mxu0 %v258_v59  ;;  %1815 = vmatpush3.msra.mxu1 %v131_v0  ;;  %v690_v59 = vsub.s32 2, %v2139_v8  ;;  %v698_v0 = vsub.s32 4, %v2139_v8 }
  0x22   :  { %1848 = vmatpush3.msra.mxu0 %v242_v61  ;;  %1816 = vmatprep.subr.mxu1 %v146_v2  ;;  %v694_v61 = vsub.s32 3, %v2139_v8 }
  0x23   :  { %1849 = vmatprep.subr.mxu0 %v257_v63  ;;  %1817 = vmatpush3.msra.mxu1 %v130_v5  ;;  %v691_v63 = vrot.slane %v678_v60, %v690_v59  ;;  %v699_v10 = vrot.slane %v678_v60, %v698_v0  ;;  %v788_v59 = vld [vmem:[%s2483_s9 + $0x20] sm:$0xff] }
  0x24   :  { %1850 = vmatpush3.msra.mxu0 %v241_v1  ;;  %1726 = vmatprep.subr.msk.mxu1 %vm377_vm1, %v369_v20  ;;  %v687_v1 = vrot.slane %v678_v60, %v51_v9  ;;  %v695_v2 = vrot.slane %v678_v60, %v694_v61  ;;  %v804_v61 = vld [vmem:[%s2483_s9 + $0xa0] sm:$0xff] }
  0x25   :  { %1851 = vmatprep.subr.mxu0 %v256_v4  ;;  %v702_v4 = vsub.s32 5, %v2139_v8  ;;  %v1746_v52 = vcombine.low %v788_v59, %v804_v61 }
  0x26   :  { %1852 = vmatpush3.msra.mxu0 %v240_v6 }
  0x27   :  { %1729 = vmatprep.subr.msk.mxu0 %vm377_vm1, %v370_v21 }
  0xc6   :  { %v125_v14 = vpop.f32.mrf.mxu0 }
  0xc7   :  { %v126_v17 = vadd.f32 %v125_v14, %v48_v13 }
  0xc8   :  { %v127_v15 = vpop.f32.mrf.mxu0 }
  0xc9   :  { %v128_v16 = vadd.f32 %v127_v15, %v52_v12  ;;  %v706_v12 = vsub.s32 6, %v2139_v8  ;;  %v710_v15 = vsub.s32 7, %v2139_v8 }
  0xcb   :  { %233 = vmatprep.mubr.f32.mxu1 %v128_v16  ;;  %343 = vmatprep.mubr.f32.mxu0 %v128_v16 }
  0xcc   :  { %234 = vmatmul.mubr.f32.vlgmr.msra.gmra.mxu1 %v126_v17  ;;  %344 = vmatmul.mubr.f32.vlgmr.msra.gmra.mxu0 %v126_v17 }
  0xcd   :  { %529 = vmatprep.mubr.f32.mxu0 %v1868_v3  ;;  %458 = vmatprep.mubr.f32.mxu1 %v1868_v3 }
  0xce   :  { %1730 = vmatpush1.msk.msra.mxu0 %vm377_vm1, %v362_v19  ;;  %1727 = vmatpush1.msk.msra.mxu1 %vm377_vm1, %v361_v18  ;;  %v703_v18 = vrot.slane %v678_v60, %v702_v4  ;;  %v806_v4 = vld [vmem:[%s2483_s9 + $0xb0] sm:$0xff] }
  0xcf   :  { %1732 = vmatprep.subr.msk.mxu1 %vm377_vm1, %v371_v24  ;;  %1735 = vmatprep.subr.msk.mxu0 %vm377_vm1, %v372_v25  ;;  %v711_v25 = vrot.slane %v678_v60, %v710_v15 }
 0x18c   :  { %v1818_v26 = vpop.f32.mrf.mxu1  ;;  %v1853_v27 = vpop.f32.mrf.mxu0 }
 0x18e   :  { %v1819_v29 = vpop.f32.mrf.mxu1  ;;  %v1854_v30 = vpop.f32.mrf.mxu0 }
 0x18f   :  { %v1820_v32 = vadd.f32 %v1819_v29, %v1818_v26  ;;  %v1855_v33 = vadd.f32 %v1854_v30, %v1853_v27 }
 0x191   :  { %v236_v34 = vadd.f32 %v1820_v32, %v1724_v28  ;;  %v346_v35 = vadd.f32 %v1855_v33, %v1725_v31 }
 0x193   :  { %v239_v36 = vmul.f32 %v236_v34, %v236_v34  ;;  %v350_v37 = vsel %vm349_vm2, %v346_v35, -inf }
 0x194   :  { %351 = vmax.xlane.f32.xlu0 %v350_v37 }
 0x195   :  { %1728 = vmatmul.mubr.msk.f32.vlgmr.msra.gmra.mxu1 %vm373_vm3, %v239_v36  ;;  %1731 = vmatmul.mubr.msk.f32.vlgmr.msra.gmra.mxu0 %vm373_vm3, %v239_v36 }
 0x196   :  { %1733 = vmatpush1.msk.msra.mxu1 %vm377_vm1, %v363_v22  ;;  %600 = vmatprep.mubr.f32.mxu1 %v1868_v3 }
 0x197   :  { %1736 = vmatpush1.msk.msra.mxu0 %vm377_vm1, %v364_v23  ;;  %671 = vmatprep.mubr.f32.mxu0 %v1868_v3  ;;  %v800_v3 = vld [vmem:[%s2483_s9 + $0x80] sm:$0xff]  ;;  %v707_v23 = vrot.slane %v678_v60, %v706_v12  ;;  %v793_v12 = vld [vmem:[%s2483_s9 + $0x48] sm:$0xff] }
 0x198   :  { %v1739_v45 = vcombine.high %v784_v43, %v800_v3  ;;  %v1738_v47 = vcombine.low %v784_v43, %v800_v3  ;;  %1034 = vmatprep.subr.bf16.mxu0 %v1741_v49 }
 0x199   :  { %1734 = vmatmul.mubr.msk.f32.vlgmr.msra.gmra.mxu1 %vm373_vm3, %v239_v36  ;;  %1737 = vmatmul.mubr.msk.f32.vlgmr.msra.gmra.mxu0 %vm373_vm3, %v239_v36 }
 0x19a   :  { %993 = vmatprep.subr.bf16.mxu1 %v1739_v45  ;;  %1035 = vmatpush1.bf16.msra.mxu0 %v1740_v48 }
 0x19b   :  { %994 = vmatpush1.bf16.msra.mxu1 %v1738_v47  ;;  %1011 = vmatprep.mubr.bf16.mxu1 %v1869_v53 }
 0x19c   :  { %1052 = vmatprep.mubr.bf16.mxu0 %v1869_v53  ;;  %1075 = vmatprep.subr.bf16.mxu1 %v1743_v55 }
 0x19d   :  { %1116 = vmatprep.subr.bf16.mxu0 %v1745_v58 }
 0x21d   :  { %v352_v38 = vpop.xlane.xlu0 %351 }
 0x21e   :  { %v353_v39 = vsub.f32 %v346_v35, %v352_v38 }
 0x220   :  { %v354_v40 = vmul.f32 1.442695, %v353_v39 }
 0x222   :  { %1862 = vpow2.f32 %v354_v40 }
 0x22f   :  { %v2181_v41 = vpop.eup %1862 }
 0x230   :  { %v356_v42 = vsel %vm349_vm2, %v2181_v41, 0.0 }
 0x231   :  { %357 = vadd.xlane.f32.xlu0 %v356_v42 }
 0x255   :  { %v460_v5 = vpop.f32.mrf.mxu1  ;;  %v531_v6 = vpop.f32.mrf.mxu0 }
 0x256   :  { %v2238_v7 = vmul.f32 %v683_v62, %v460_v5  ;;  %v2240_v11 = vmul.f32 %v691_v63, %v531_v6  ;;  %v789_v62 = vld [vmem:[%s2483_s9 + $0x28] sm:$0xff]  ;;  %v792_v5 = vld [vmem:[%s2483_s9 + $0x40] sm:$0xff] }
 0x257   :  { %v462_v13 = vpop.f32.mrf.mxu1  ;;  %v533_v14 = vpop.f32.mrf.mxu0  ;;  %v805_v63 = vld [vmem:[%s2483_s9 + $0xa8] sm:$0xff]  ;;  %v808_v6 = vld [vmem:[%s2483_s9 + $0xc0] sm:$0xff] }
 0x258   :  { %v728_v16 = vmul.f32 %v2238_v7, %v2238_v7  ;;  %v2246_v9 = vmul.f32 %v687_v1, %v462_v13  ;;  %v2248_v17 = vmul.f32 %v695_v2, %v533_v14  ;;  %v730_v21 = vmul.f32 %v2240_v11, %v2240_v11  ;;  %v809_v13 = vld [vmem:[%s2483_s9 + $0xc8] sm:$0xff] }
 0x259   :  { %v602_v19 = vpop.f32.mrf.mxu1  ;;  %v673_v20 = vpop.f32.mrf.mxu0  ;;  %v1747_v1 = vcombine.high %v788_v59, %v804_v61  ;;  %v1749_v2 = vcombine.high %v789_v62, %v805_v63  ;;  %v1755_v15 = vcombine.high %v792_v5, %v808_v6 }
 0x25a   :  { %v729_v22 = vmul.f32 %v2246_v9, %v2246_v9  ;;  %v2254_v24 = vmul.f32 %v699_v10, %v602_v19  ;;  %v736_v26 = vsel %vm377_vm1, %v728_v16, 0.0  ;;  %v731_v28 = vmul.f32 %v2248_v17, %v2248_v17  ;;  %v810_v19 = vld [vmem:[%s2483_s9 + $0xd0] sm:$0xff] }
 0x25b   :  { %v604_v8 = vpop.f32.mrf.mxu1  ;;  %v675_v31 = vpop.f32.mrf.mxu0  ;;  %v739_v32 = vsel %vm377_vm1, %v730_v21, 0.0  ;;  %v2265_v34 = vmul.f32 %v707_v23, %v673_v20  ;;  %v1752_v10 = vcombine.low %v791_v50, %v807_v51  ;;  %v1757_v16 = vcombine.high %v793_v12, %v809_v13  ;;  %v795_v20 = vld [vmem:[%s2483_s9 + $0x58] sm:$0xff] }
 0x25c   :  { %v737_v27 = vsel %vm377_vm1, %v729_v22, 0.0  ;;  %v2260_v29 = vmul.f32 %v703_v18, %v604_v8  ;;  %v732_v33 = vmul.f32 %v2254_v24, %v2254_v24  ;;  %v741_v36 = vsel %vm377_vm1, %v731_v28, 0.0  ;;  %v794_v18 = vld [vmem:[%s2483_s9 + $0x50] sm:$0xff]  ;;  %v811_v21 = vld [vmem:[%s2483_s9 + $0xd8] sm:$0xff]  ;;  %v797_v28 = vld [vmem:[%s2483_s9 + $0x68] sm:$0xff] }
 0x25d   :  { %v738_v30 = vadd.f32 %v737_v27, %v736_v26  ;;  %v2270_v38 = vmul.f32 %v711_v25, %v675_v31  ;;  %v734_v42 = vmul.f32 %v2265_v34, %v2265_v34  ;;  %v1754_v22 = vcombine.low %v792_v5, %v808_v6  ;;  %v796_v26 = vld [vmem:[%s2483_s9 + $0x60] sm:$0xff] }
 0x25e   :  { %v733_v37 = vmul.f32 %v2260_v29, %v2260_v29  ;;  %v743_v40 = vsel %vm377_vm1, %v732_v33, 0.0  ;;  %v1756_v23 = vcombine.low %v793_v12, %v809_v13  ;;  %v1759_v8 = vcombine.high %v794_v18, %v810_v19  ;;  %v812_v27 = vld [vmem:[%s2483_s9 + $0xe0] sm:$0xff] }
 0x25f   :  { %v740_v35 = vadd.f32 %v739_v32, %v738_v30  ;;  %v735_v44 = vmul.f32 %v2270_v38, %v2270_v38  ;;  %v747_v46 = vsel %vm377_vm1, %v734_v42, 0.0  ;;  %v1761_v25 = vcombine.high %v795_v20, %v811_v21  ;;  %v813_v30 = vld [vmem:[%s2483_s9 + $0xe8] sm:$0xff] }
 0x260   :  { %v745_v3 = vsel %vm377_vm1, %v733_v37, 0.0  ;;  %v1758_v31 = vcombine.low %v794_v18, %v810_v19  ;;  %v1760_v32 = vcombine.low %v795_v20, %v811_v21  ;;  %v1763_v33 = vcombine.high %v796_v26, %v812_v27  ;;  %v814_v37 = vld [vmem:[%s2483_s9 + $0xf0] sm:$0xff] }
 0x261   :  { %v742_v39 = vadd.f32 %v741_v36, %v740_v35  ;;  %v749_v48 = vsel %vm377_vm1, %v735_v44, 0.0  ;;  %v1765_v35 = vcombine.high %v797_v28, %v813_v30  ;;  %v798_v36 = vld [vmem:[%s2483_s9 + $0x70] sm:$0xff]  ;;  %v1762_v42 = vcombine.low %v796_v26, %v812_v27 }
 0x262   :  { %v1767_v44 = vcombine.high %v798_v36, %v814_v37 }
 0x263   :  { %v744_v43 = vadd.f32 %v743_v40, %v742_v39  ;;  %v799_v39 = vld [vmem:[%s2483_s9 + $0x78] sm:$0xff] }
 0x264   :  { %v815_v40 = vld [vmem:[%s2483_s9 + $0xf8] sm:$0xff] }
 0x265   :  { %v746_v45 = vadd.f32 %v745_v3, %v744_v43  ;;  %v1764_v43 = vcombine.low %v797_v28, %v813_v30 }
 0x267   :  { %v748_v47 = vadd.f32 %v747_v46, %v746_v45  ;;  %v1769_v45 = vcombine.high %v799_v39, %v815_v40 }
 0x269   :  { %v750_v49 = vadd.f32 %v749_v48, %v748_v47  ;;  %v1766_v47 = vcombine.low %v798_v36, %v814_v37  ;;  %v1768_v48 = vcombine.low %v799_v39, %v815_v40 }
 0x26b   :  { %751 = vadd.xlane.f32.xlu1 %v750_v49 }
 0x2ba   :  { %v358_v55 = vpop.xlane.xlu0 %357 }
 0x2bb   :  { %1864 = vrcp.f32 %v358_v55 }
 0x2c8   :  { %v1865_v58 = vpop.eup %1864 }
 0x2c9   :  { %v360_v60 = vmul.f32 %v1865_v58, %v2181_v41  ;;  %v790_v41 = vld [vmem:[%s2483_s9 + $0x30] sm:$0xff] }
 0x2ca   :  { %v1751_v56 = vcombine.high %v790_v41, %v806_v4  ;;  %v1750_v14 = vcombine.low %v790_v41, %v806_v4 }
 0x2cb   :  { %v2293_v0 = vpack.c.bf16 %v360_v60, %v360_v60 }
 0x2cd   :  { %1770 = vmatmul.mubr.msk.bf16.vlgmr.msra.gmra.mxu1 %vm55_vm0, %v2293_v0  ;;  %1771 = vmatmul.mubr.msk.bf16.vlgmr.msra.gmra.mxu0 %vm55_vm0, %v2293_v0 }
 0x2ce   :  { %1076 = vmatpush1.bf16.msra.mxu1 %v1742_v54  ;;  %1117 = vmatpush1.bf16.msra.mxu0 %v1744_v57  ;;  %v1748_v54 = vcombine.low %v789_v62, %v805_v63  ;;  %v1753_v57 = vcombine.high %v791_v50, %v807_v51 }
 0x2cf   :  { %1093 = vmatprep.mubr.bf16.mxu1 %v1869_v53  ;;  %1134 = vmatprep.mubr.bf16.mxu0 %v1869_v53 }
 0x2d0   :  { %1157 = vmatprep.subr.bf16.mxu1 %v1747_v1  ;;  %1198 = vmatprep.subr.bf16.mxu0 %v1749_v2 }
 0x2d5   :  { %1772 = vmatmul.mubr.msk.bf16.vlgmr.msra.gmra.mxu1 %vm55_vm0, %v2293_v0  ;;  %1773 = vmatmul.mubr.msk.bf16.vlgmr.msra.gmra.mxu0 %vm55_vm0, %v2293_v0 }
 0x2d6   :  { %1158 = vmatpush1.bf16.msra.mxu1 %v1746_v52  ;;  %1199 = vmatpush1.bf16.msra.mxu0 %v1748_v54 }
 0x2d7   :  { %1175 = vmatprep.mubr.bf16.mxu1 %v1869_v53  ;;  %1216 = vmatprep.mubr.bf16.mxu0 %v1869_v53 }
 0x2d8   :  { %1239 = vmatprep.subr.bf16.mxu1 %v1751_v56  ;;  %1280 = vmatprep.subr.bf16.mxu0 %v1753_v57 }
 0x2dd   :  { %1774 = vmatmul.mubr.msk.bf16.vlgmr.msra.gmra.mxu1 %vm55_vm0, %v2293_v0  ;;  %1775 = vmatmul.mubr.msk.bf16.vlgmr.msra.gmra.mxu0 %vm55_vm0, %v2293_v0 }
 0x2de   :  { %1240 = vmatpush1.bf16.msra.mxu1 %v1750_v14  ;;  %1281 = vmatpush1.bf16.msra.mxu0 %v1752_v10 }
 0x2df   :  { %1257 = vmatprep.mubr.bf16.mxu1 %v1869_v53  ;;  %1298 = vmatprep.mubr.bf16.mxu0 %v1869_v53 }
 0x2e0   :  { %1321 = vmatprep.subr.bf16.mxu1 %v1755_v15  ;;  %1362 = vmatprep.subr.bf16.mxu0 %v1757_v16 }
 0x2e5   :  { %1776 = vmatmul.mubr.msk.bf16.vlgmr.msra.gmra.mxu1 %vm55_vm0, %v2293_v0  ;;  %1777 = vmatmul.mubr.msk.bf16.vlgmr.msra.gmra.mxu0 %vm55_vm0, %v2293_v0 }
 0x2e6   :  { %1322 = vmatpush1.bf16.msra.mxu1 %v1754_v22  ;;  %1363 = vmatpush1.bf16.msra.mxu0 %v1756_v23 }
 0x2e7   :  { %1339 = vmatprep.mubr.bf16.mxu1 %v1869_v53  ;;  %1380 = vmatprep.mubr.bf16.mxu0 %v1869_v53 }
 0x2e8   :  { %1403 = vmatprep.subr.bf16.mxu1 %v1759_v8  ;;  %1444 = vmatprep.subr.bf16.mxu0 %v1761_v25 }
 0x2ed   :  { %1778 = vmatmul.mubr.msk.bf16.vlgmr.msra.gmra.mxu1 %vm55_vm0, %v2293_v0  ;;  %1779 = vmatmul.mubr.msk.bf16.vlgmr.msra.gmra.mxu0 %vm55_vm0, %v2293_v0 }
 0x2ee   :  { %1404 = vmatpush1.bf16.msra.mxu1 %v1758_v31  ;;  %1445 = vmatpush1.bf16.msra.mxu0 %v1760_v32 }
 0x2ef   :  { %1421 = vmatprep.mubr.bf16.mxu1 %v1869_v53  ;;  %1462 = vmatprep.mubr.bf16.mxu0 %v1869_v53 }
 0x2f0   :  { %1485 = vmatprep.subr.bf16.mxu1 %v1763_v33  ;;  %1526 = vmatprep.subr.bf16.mxu0 %v1765_v35 }
 0x2f4   :  { %v752_v3 = vpop.xlane.xlu1 %751 }
 0x2f5   :  { %v753_v46 = vadd.f32 1e-12, %v752_v3  ;;  %1780 = vmatmul.mubr.msk.bf16.vlgmr.msra.gmra.mxu1 %vm55_vm0, %v2293_v0  ;;  %1781 = vmatmul.mubr.msk.bf16.vlgmr.msra.gmra.mxu0 %vm55_vm0, %v2293_v0 }
 0x2f6   :  { %1486 = vmatpush1.bf16.msra.mxu1 %v1762_v42  ;;  %1527 = vmatpush1.bf16.msra.mxu0 %v1764_v43 }
 0x2f7   :  { %1866 = vrsqrt.f32 %v753_v46  ;;  %1503 = vmatprep.mubr.bf16.mxu1 %v1869_v53  ;;  %1544 = vmatprep.mubr.bf16.mxu0 %v1869_v53 }
 0x2f8   :  { %1567 = vmatprep.subr.bf16.mxu1 %v1767_v44  ;;  %1608 = vmatprep.subr.bf16.mxu0 %v1769_v45 }
 0x2fd   :  { %1782 = vmatmul.mubr.msk.bf16.vlgmr.msra.gmra.mxu1 %vm55_vm0, %v2293_v0  ;;  %1783 = vmatmul.mubr.msk.bf16.vlgmr.msra.gmra.mxu0 %vm55_vm0, %v2293_v0 }
 0x2fe   :  { %1568 = vmatpush1.bf16.msra.mxu1 %v1766_v47  ;;  %1609 = vmatpush1.bf16.msra.mxu0 %v1768_v48 }
 0x2ff   :  { %1585 = vmatprep.mubr.bf16.mxu1 %v1869_v53  ;;  %1626 = vmatprep.mubr.bf16.mxu0 %v1869_v53 }
 0x304   :  { %v1867_v49 = vpop.eup %1866 }
 0x305   :  { %v755_v55 = vmul.f32 %v1867_v49, %v2238_v7  ;;  %v756_v58 = vmul.f32 %v1867_v49, %v2246_v9  ;;  %v757_v59 = vmul.f32 %v1867_v49, %v2240_v11  ;;  %v758_v60 = vmul.f32 %v1867_v49, %v2248_v17  ;;  %1784 = vmatmul.mubr.msk.bf16.vlgmr.msra.gmra.mxu1 %vm55_vm0, %v2293_v0 }
 0x306   :  { %v759_v61 = vmul.f32 %v1867_v49, %v2254_v24  ;;  %v760_v62 = vmul.f32 %v1867_v49, %v2260_v29  ;;  %v761_v63 = vmul.f32 %v1867_v49, %v2265_v34  ;;  %v762_v53 = vmul.f32 %v1867_v49, %v2270_v38  ;;  %1785 = vmatmul.mubr.msk.bf16.vlgmr.msra.gmra.mxu0 %vm55_vm0, %v2293_v0 }
 0x307   :  { %v771_v7 = vcombine.low %v755_v55, %v756_v58  ;;  %v772_v9 = vcombine.low %v757_v59, %v758_v60 }
 0x308   :  { %v773_v1 = vcombine.low %v759_v61, %v760_v62  ;;  %v774_v11 = vcombine.low %v761_v63, %v762_v53 }
 0x309   :  { %779 = vst [vmem:[%s2485_s10] sm:$0xff] %v771_v7  ;;  %780 = vst [vmem:[%s2485_s10 + $0x8] sm:$0xff] %v772_v9 }
 0x30a   :  { %781 = vst [vmem:[%s2485_s10 + $0x10] sm:$0xff] %v773_v1  ;;  %782 = vst [vmem:[%s2485_s10 + $0x18] sm:$0xff] %v774_v11 }
 0x38d   :  { %v1013_v17 = vpop.f32.mrf.mxu1  ;;  %v1054_v24 = vpop.f32.mrf.mxu0 }
 0x38f   :  { %v1015_v29 = vpop.f32.mrf.mxu1  ;;  %v1056_v34 = vpop.f32.mrf.mxu0 }
 0x390   :  { %v1667_v38 = vcombine.low %v1013_v17, %v1015_v29  ;;  %v1668_v0 = vcombine.low %v1054_v24, %v1056_v34 }
 0x391   :  { %v1017_v2 = vpop.f32.mrf.mxu1  ;;  %v1058_v41 = vpop.f32.mrf.mxu0 }
 0x392   :  { %1699 = vst [vmem:[%s2486_s11] sm:$0xff] %v1667_v38  ;;  %1700 = vst [vmem:[%s2486_s11 + $0x8] sm:$0xff] %v1668_v0 }
 0x393   :  { %v1018_v4 = vpop.f32.mrf.mxu1  ;;  %v1059_v50 = vpop.f32.mrf.mxu0 }
 0x395   :  { %v1095_v51 = vpop.f32.mrf.mxu1  ;;  %v1136_v52 = vpop.f32.mrf.mxu0 }
 0x397   :  { %v1097_v54 = vpop.f32.mrf.mxu1  ;;  %v1138_v56 = vpop.f32.mrf.mxu0 }
 0x398   :  { %v1669_v57 = vcombine.low %v1095_v51, %v1097_v54  ;;  %v1670_v5 = vcombine.low %v1136_v52, %v1138_v56 }
 0x399   :  { %v1099_v6 = vpop.f32.mrf.mxu1  ;;  %v1140_v12 = vpop.f32.mrf.mxu0 }
 0x39a   :  { %1701 = vst [vmem:[%s2486_s11 + $0x10] sm:$0xff] %v1669_v57  ;;  %1702 = vst [vmem:[%s2486_s11 + $0x18] sm:$0xff] %v1670_v5 }
 0x39b   :  { %v1100_v13 = vpop.f32.mrf.mxu1  ;;  %v1141_v14 = vpop.f32.mrf.mxu0 }
 0x39d   :  { %v1177_v10 = vpop.f32.mrf.mxu1  ;;  %v1218_v15 = vpop.f32.mrf.mxu0 }
 0x39f   :  { %v1179_v16 = vpop.f32.mrf.mxu1  ;;  %v1220_v18 = vpop.f32.mrf.mxu0 }
 0x3a0   :  { %v1671_v19 = vcombine.low %v1177_v10, %v1179_v16  ;;  %v1672_v20 = vcombine.low %v1218_v15, %v1220_v18 }
 0x3a1   :  { %v1181_v21 = vpop.f32.mrf.mxu1  ;;  %v1222_v22 = vpop.f32.mrf.mxu0 }
 0x3a2   :  { %1703 = vst [vmem:[%s2486_s11 + $0x20] sm:$0xff] %v1671_v19  ;;  %1704 = vst [vmem:[%s2486_s11 + $0x28] sm:$0xff] %v1672_v20 }
 0x3a3   :  { %v1182_v23 = vpop.f32.mrf.mxu1  ;;  %v1223_v8 = vpop.f32.mrf.mxu0 }
 0x3a5   :  { %v1259_v25 = vpop.f32.mrf.mxu1  ;;  %v1300_v26 = vpop.f32.mrf.mxu0 }
 0x3a7   :  { %v1261_v27 = vpop.f32.mrf.mxu1  ;;  %v1302_v28 = vpop.f32.mrf.mxu0 }
 0x3a8   :  { %v1673_v30 = vcombine.low %v1259_v25, %v1261_v27  ;;  %v1674_v31 = vcombine.low %v1300_v26, %v1302_v28 }
 0x3a9   :  { %v1263_v32 = vpop.f32.mrf.mxu1  ;;  %v1304_v33 = vpop.f32.mrf.mxu0 }
 0x3aa   :  { %1705 = vst [vmem:[%s2486_s11 + $0x30] sm:$0xff] %v1673_v30  ;;  %1706 = vst [vmem:[%s2486_s11 + $0x38] sm:$0xff] %v1674_v31 }
 0x3ab   :  { %v1264_v35 = vpop.f32.mrf.mxu1  ;;  %v1305_v36 = vpop.f32.mrf.mxu0 }
 0x3ad   :  { %v1341_v37 = vpop.f32.mrf.mxu1  ;;  %v1382_v39 = vpop.f32.mrf.mxu0 }
 0x3af   :  { %v1343_v40 = vpop.f32.mrf.mxu1  ;;  %v1384_v42 = vpop.f32.mrf.mxu0 }
 0x3b0   :  { %v1675_v43 = vcombine.low %v1341_v37, %v1343_v40  ;;  %v1676_v3 = vcombine.low %v1382_v39, %v1384_v42 }
 0x3b1   :  { %v1345_v44 = vpop.f32.mrf.mxu1  ;;  %v1386_v45 = vpop.f32.mrf.mxu0 }
 0x3b2   :  { %1707 = vst [vmem:[%s2486_s11 + $0x40] sm:$0xff] %v1675_v43  ;;  %1708 = vst [vmem:[%s2486_s11 + $0x48] sm:$0xff] %v1676_v3 }
 0x3b3   :  { %v1346_v46 = vpop.f32.mrf.mxu1  ;;  %v1387_v47 = vpop.f32.mrf.mxu0 }
 0x3b5   :  { %v1423_v48 = vpop.f32.mrf.mxu1  ;;  %v1464_v49 = vpop.f32.mrf.mxu0 }
 0x3b7   :  { %v1425_v55 = vpop.f32.mrf.mxu1  ;;  %v1466_v58 = vpop.f32.mrf.mxu0 }
 0x3b8   :  { %v1677_v59 = vcombine.low %v1423_v48, %v1425_v55  ;;  %v1678_v60 = vcombine.low %v1464_v49, %v1466_v58 }
 0x3b9   :  { %v1427_v61 = vpop.f32.mrf.mxu1  ;;  %v1468_v62 = vpop.f32.mrf.mxu0 }
 0x3ba   :  { %1709 = vst [vmem:[%s2486_s11 + $0x50] sm:$0xff] %v1677_v59  ;;  %1710 = vst [vmem:[%s2486_s11 + $0x58] sm:$0xff] %v1678_v60 }
 0x3bb   :  { %v1428_v63 = vpop.f32.mrf.mxu1  ;;  %v1469_v53 = vpop.f32.mrf.mxu0 }
 0x3bd   :  { %v1505_v7 = vpop.f32.mrf.mxu1  ;;  %v1546_v9 = vpop.f32.mrf.mxu0 }
 0x3bf   :  { %v1507_v1 = vpop.f32.mrf.mxu1  ;;  %v1548_v11 = vpop.f32.mrf.mxu0 }
 0x3c0   :  { %v1679_v17 = vcombine.low %v1505_v7, %v1507_v1  ;;  %v1680_v24 = vcombine.low %v1546_v9, %v1548_v11 }
 0x3c1   :  { %v1509_v29 = vpop.f32.mrf.mxu1  ;;  %v1550_v34 = vpop.f32.mrf.mxu0 }
 0x3c2   :  { %1711 = vst [vmem:[%s2486_s11 + $0x60] sm:$0xff] %v1679_v17  ;;  %1712 = vst [vmem:[%s2486_s11 + $0x68] sm:$0xff] %v1680_v24 }
 0x3c3   :  { %v1510_v38 = vpop.f32.mrf.mxu1  ;;  %v1551_v0 = vpop.f32.mrf.mxu0 }
 0x3c5   :  { %v1587_v2 = vpop.f32.mrf.mxu1 }
 0x3c6   :  { %v1628_v41 = vpop.f32.mrf.mxu0 }
 0x3c7   :  { %v1589_v4 = vpop.f32.mrf.mxu1 }
 0x3c8   :  { %v1681_v50 = vcombine.low %v1587_v2, %v1589_v4  ;;  %v1630_v51 = vpop.f32.mrf.mxu0 }
 0x3c9   :  { %v1682_v52 = vcombine.low %v1628_v41, %v1630_v51  ;;  %v1591_v54 = vpop.f32.mrf.mxu1 }
 0x3ca   :  { %1713 = vst [vmem:[%s2486_s11 + $0x70] sm:$0xff] %v1681_v50  ;;  %v1632_v56 = vpop.f32.mrf.mxu0 }
 0x3cb   :  { %1714 = vst [vmem:[%s2486_s11 + $0x78] sm:$0xff] %v1682_v52  ;;  %v1592_v57 = vpop.f32.mrf.mxu1 }
 0x3cc   :  { %v1633_v5 = vpop.f32.mrf.mxu0 }

// kernel: reverse.39
= control target key start
LH: loop header
LB: loop body
LE: loop exit
PB: predicated region body
PF: predicated region fallthrough
CT: control target
= control target key end

     0   :  { %v2_v0 = vlaneseq  ;;  %s318_s0 = inlined_call_operand.vmem [shape: f32[4,4096], index: 0, kind: input, shape index: {}]   ;;  %s319_s1 = inlined_call_operand.vmem [shape: f32[4,4096], index: 1, kind: output, shape index: {}]  }
   0x2   :  { %v3_v1 = vsub.s32 127, %v2_v0 }
   0x4   :  { %4 = vset.pattern.permute.xlu0 %v3_v1 }
   0x5   :  { %s278_s6 = smov 0   ;;  %s280_s7 = smov 0  }
   0x6   :  { %s282_s8 = smov 0  }
   0x7 LB: > { %s208_s9 = sadd.s32 4294967295, %s266_s8   ;;  %s19_s10 = sadd.s32 1, %s262_s7  ;;  %s266_s8 = sphi %s282_s8, %s10_s8   ;;  %s262_s7 = sphi %s280_s7, %s321_s7   ;;  %s258_s6 = sphi %s278_s6, %s320_s6  }
   0x8   : > { %p20_p0 = scmp.ge.s32.totalorder %s19_s10, 32  ;;  %p210_p1 = scmp.ge.s32.totalorder %s266_s8, 32 }
   0x9   : > { %s38_s11 = sand.u32 (!%p210_p1), 1, %s266_s8   ;;  %s41_s12 = ssub.s32 (!%p210_p1), 31, %s262_s7 }
   0xa   : > { %s323_s10 = smov (%p20_p0, %s19_s10), 0  ;;  %36 = sbr.rel (%p210_p1) target bundleno = 17 (0x11), region = 16 }
   0xb   : > { %s211_s13 = sshll.u32 (!%p210_p1), %s38_s11, 2  ;;  %s212_s14 = sshll.u32 (!%p210_p1), %s41_s12, 2 }
   0xc   : > { %s45_s17 = scalar_lea.vmem (!%p210_p1), %s318_s0, %s212_s14  ;;  %s40_s18 = scalar_lea.vmem (!%p210_p1), [#allocation1], %s211_s13 }
   0xf   : > { %v62_v2 = vld [vmem:[%s45_s17] sm:$0xf] }
  0x10   : > { %63 = vst [vmem:[%s40_s18] sm:$0xf] %v62_v2 }
  0x11 PF: > { %p213_p2 = scmp.ge.s32.totalorder %s266_s8, 1  ;;  %p80_p3 = scmp.lt.s32.totalorder %s266_s8, 33 }
  0x13   : > { %p81_p4 = pnand %p213_p2, %p80_p3 }
  0x14   : > { %s91_s19 = sand.u32 (!%p81_p4), 1, %s208_s9   ;;  %s217_s23 = sshll.u32 (!%p81_p4), %s258_s6, 2 }
  0x15   : > { %84 = sbr.rel (%p81_p4) target bundleno = 176 (0xb0), region = 50  ;;  %s214_s20 = sshll.u32 (!%p81_p4), %s91_s19, 2 }
  0x16   : > { %s93_s21 = scalar_lea.vmem (!%p81_p4), [#allocation1], %s214_s20  ;;  %s97_s22 = scalar_lea.vmem (!%p81_p4), [#allocation3], %s214_s20 }
  0x17   : > { %s123_s26 = scalar_lea.vmem (!%p81_p4), %s319_s1, %s217_s23 }
  0x1a   : > { %v101_v3 = vld [vmem:[%s93_s21] sm:$0xf] }
  0x1b   : > { %102 = vst [vmem:[#allocation0] sm:$0xf] %v101_v3 }
  0x22   : > { %v104_v4 = vld [vmem:[#allocation0] sm:$0xff] }
  0x23   : > { %105 = vperm.xlu0 %4, %v104_v4  }
  0x9e   : > { %v106_v5 = vpop.permute.xlu0 %105 }
  0x9f   : > { %107 = vst [vmem:[#allocation2] sm:$0xff] %v106_v5 }
  0xa6   : > { %v112_v6 = vld [vmem:[#allocation2] sm:$0xf] }
  0xa7   : > { %115 = vst [vmem:[%s97_s22] sm:$0xf] %v112_v6 }
  0xae   : > { %v140_v7 = vld [vmem:[%s97_s22] sm:$0xf] }
  0xaf   : > { %141 = vst [vmem:[%s123_s26] sm:$0xf] %v140_v7 }
  0xb0 PF: > { %s10_s8 = sadd.s32 1, %s266_s8   ;;  %s320_s6 = smov %s262_s7 }
  0xb1   : > { %p7_p5 = scmp.ge.s32.totalorder %s10_s8, 34   ;;  %s321_s7 = smov %s323_s10 }
  0xb3   :  { %9 = sbr.rel (!%p7_p5) target bundleno = 7 (0x7), region = 110 }

// kernel: mul.81
= control target key start
LH: loop header
LB: loop body
LE: loop exit
PB: predicated region body
PF: predicated region fallthrough
CT: control target
= control target key end

     0   :  { %vm8_vm0 = vcmask 15360   ;;  %vm14_vm1 = vcmask 31760   ;;  %s42_s0 = inlined_call_operand.vmem [shape: f32[2,2], index: 0, kind: input, shape index: {}]   ;;  %s43_s1 = inlined_call_operand.vmem [shape: f32[4], index: 1, kind: output, shape index: {}]  }
   0x1   :  { %v5_v0 = vld [vmem:[%s42_s0] sm:$0x3]  ;;  %s25_s0 = smov 2  }
   0x2   :  { %6 = vst [vmem:[#allocation1] sm:$0x3] %v5_v0 }
   0x9   :  { %v11_v1 = vld [vmem:[#allocation1 + $0x1] sm:$0x1]   ;;  %v7_v2 = vld [vmem:[#allocation1] sm:$0x1]  }
   0xa   :  { %12 = vrot.lane.b32.xlu0 %v11_v1, %s25_s0  ;;  %9 = vst.msk [vmem:[#allocation0] sm:$0x1] %vm8_vm0, %v7_v2  }
  0x7c   :  { %v13_v3 = vpop.permute.xlu0 %12  }
  0x7d   :  { %15 = vst.msk [vmem:[#allocation0] sm:$0x1] %vm14_vm1, %v13_v3  }
  0x84   :  { %v20_v4 = vld [vmem:[#allocation0] sm:$0x1] }
  0x85   :  { %23 = vst [vmem:[%s43_s1] sm:$0x1] %v20_v4 }

</bundles_post_ra>
